<compile_context>
chip_gen: v5e
topology: v5e:2x2
jax: 0.10.0
libtpu: 0.0.40
codegen_flags: <defaults>
</compile_context>

<pallas_src>
import math
import jax
import jax.numpy as jnp
from jax.experimental import pallas as pl
from jax.experimental.pallas import tpu as pltpu

# ---- "configs" (small synthetic sizes) -------------------------------------
D_DEPTH     = 8          # configs['model']['netdepth']
W_WIDTH     = 32         # configs['model']['netwidth']
PTS_DIM     = 3          # pts_input_dim
VIEWS_DIM   = 3          # views_input_dim
SKIPS       = (4,)
SIGMA_BIAS  = 0.5        # configs['model']['sigma_bias']
RGB_PADDING = 0.001      # configs['model']['rgb_padding']
OUT_CH      = 4          # packed output: [sigma, r, g, b]


def _relu(x):
    return jnp.maximum(x, 0.0)


def _sigmoid(x):
    return 1.0 / (1.0 + jnp.exp(-x))


def _softplus(x):
    # numerically-stable softplus
    return jnp.maximum(x, 0.0) + jnp.log1p(jnp.exp(-jnp.abs(x)))


# -----------------------------------------------------------------------------
# Kernel: one grid step processes tm samples (lanes).  Activations are (C, tm).
# -----------------------------------------------------------------------------
def mlp_kernel(pts_ref, views_ref,
               w_first_ref, w_main_ref, w_skip_ref, b_pts_ref,
               w_head_ref, b_head_ref,
               w_vf_ref, w_vv_ref, b_v_ref,
               w_vo_ref, b_vo_ref,
               out_ref):
    f32 = jnp.float32
    pts = pts_ref[...]       # (PTS_DIM,   tm)
    views = views_ref[...]   # (VIEWS_DIM, tm)

    # ---- view-independent trunk (pts_linears, skip after layer 4) ----
    h = _relu(jnp.dot(w_first_ref[...], pts, preferred_element_type=f32)
              + b_pts_ref[0:W_WIDTH, :])                       # (W, tm)
    for i in range(1, D_DEPTH):
        z = jnp.dot(w_main_ref[i - 1], h, preferred_element_type=f32)
        if (i - 1) in SKIPS:
            # layer after the skip: input was cat([pts, h]) -> split-weight sum
            z = z + jnp.dot(w_skip_ref[...], pts, preferred_element_type=f32)
        h = _relu(z + b_pts_ref[i * W_WIDTH:(i + 1) * W_WIDTH, :])

    # ---- fused head: rows 0:W -> feature_linear, row W -> pts_output (sigma)
    head = jnp.dot(w_head_ref[...], h, preferred_element_type=f32) + b_head_ref[...]
    feature = head[0:W_WIDTH, :]                               # (W, tm)
    sigma = _softplus(head[W_WIDTH:W_WIDTH + 1, :] + SIGMA_BIAS)   # (1, tm)

    # ---- view-dependent head: input was cat([feature, views]) -> split sum
    hv = _relu(jnp.dot(w_vf_ref[...], feature, preferred_element_type=f32)
               + jnp.dot(w_vv_ref[...], views, preferred_element_type=f32)
               + b_v_ref[...])                                 # (W//2, tm)
    rgb_lin = jnp.dot(w_vo_ref[...], hv, preferred_element_type=f32) + b_vo_ref[...]
    rgb = _sigmoid(rgb_lin) * (1.0 + 2.0 * RGB_PADDING) - RGB_PADDING   # (3, tm)

    out_ref[...] = jnp.concatenate([sigma, rgb], axis=0)       # (4, tm), lane-dense


def _full_block_spec(shape):
    nd = len(shape)
    return pl.BlockSpec(shape, lambda i, _nd=nd: (0,) * _nd)


def mlp_forward(pts, views, packed_params, *, tm=1024):
    """pts: (N, 3) f32, views: (N, 3) f32 -> (sigma (N, 1), rgb (N, 3))."""
    n = pts.shape[0]

    # Clamp tile to a lane-aligned size and pad N up to a multiple of it.
    tm = min(tm, max(128, pl.cdiv(n, 128) * 128))
    assert tm % 128 == 0
    n_pad = pl.cdiv(n, tm) * tm
    if n_pad != n:
        pad = n_pad - n
        pts = jnp.pad(pts, ((0, pad), (0, 0)))
        views = jnp.pad(views, ((0, pad), (0, 0)))

    # Channels-first slabs so samples live on the lane axis inside the kernel.
    pts_t = pts.T        # (PTS_DIM,   n_pad)
    views_t = views.T    # (VIEWS_DIM, n_pad)

    grid = (n_pad // tm,)

    in_specs = [
        pl.BlockSpec((PTS_DIM, tm), lambda i: (0, i)),
        pl.BlockSpec((VIEWS_DIM, tm), lambda i: (0, i)),
    ]
    for p in packed_params:
        in_specs.append(_full_block_spec(p.shape))

    out_specs = pl.BlockSpec((OUT_CH, tm), lambda i: (0, i))
    out_shape = jax.ShapeDtypeStruct((OUT_CH, n_pad), jnp.float32)

    out = pl.pallas_call(
        mlp_kernel,
        out_shape=out_shape,
        grid_spec=pltpu.PrefetchScalarGridSpec(
            num_scalar_prefetch=0,
            grid=grid,
            in_specs=in_specs,
            out_specs=out_specs,
        ),
        compiler_params=pltpu.CompilerParams(
            dimension_semantics=("parallel",),
            vmem_limit_bytes=32 * 1024 * 1024,
        ),
    )(pts_t, views_t, *packed_params)

    sigma = out[0:1, :n].T   # (N, 1)
    rgb = out[1:4, :n].T     # (N, 3)
    return sigma, rgb


# ---- deterministic parameter initialization (PyTorch Linear-style) ----------
def _init_linear(key, in_dim, out_dim):
    kw, kb = jax.random.split(key)
    bound = 1.0 / math.sqrt(in_dim)
    w = jax.random.uniform(kw, (out_dim, in_dim), jnp.float32, -bound, bound)  # (out, in)
    b = jax.random.uniform(kb, (out_dim,), jnp.float32, -bound, bound)
    return w, b


def make_raw_params(key):
    """Per-layer params in PyTorch (out, in) layout."""
    keys = jax.random.split(key, D_DEPTH + 4)
    pts_ws, pts_bs = [], []
    in_dim = PTS_DIM
    for i in range(D_DEPTH):
        w, b = _init_linear(keys[i], in_dim, W_WIDTH)
        pts_ws.append(w)
        pts_bs.append(b)
        in_dim = W_WIDTH + (PTS_DIM if i in SKIPS else 0)
    w_sig, b_sig = _init_linear(keys[D_DEPTH + 0], W_WIDTH, 1)                    # pts_output_linear
    w_feat, b_feat = _init_linear(keys[D_DEPTH + 1], W_WIDTH, W_WIDTH)            # feature_linear
    w_view, b_view = _init_linear(keys[D_DEPTH + 2], W_WIDTH + VIEWS_DIM, W_WIDTH // 2)  # views_linears[0]
    w_vout, b_vout = _init_linear(keys[D_DEPTH + 3], W_WIDTH // 2, 3)             # views_output_linear
    return dict(pts_ws=pts_ws, pts_bs=pts_bs,
                w_sig=w_sig, b_sig=b_sig,
                w_feat=w_feat, b_feat=b_feat,
                w_view=w_view, b_view=b_view,
                w_vout=w_vout, b_vout=b_vout)


def pack_params(raw):
    """Consolidate 24 tensors into 11 kernel-friendly refs."""
    pts_ws, pts_bs = raw['pts_ws'], raw['pts_bs']
    w_first = pts_ws[0]                                        # (W, 3)
    mains, w_skip = [], None
    for i in range(1, D_DEPTH):
        w = pts_ws[i]
        if (i - 1) in SKIPS:
            # input order was cat([pts, h]) -> cols 0:3 act on pts, 3: on h
            w_skip = w[:, :PTS_DIM]                            # (W, 3)
            mains.append(w[:, PTS_DIM:])                       # (W, W)
        else:
            mains.append(w)                                    # (W, W)
    w_main = jnp.stack(mains, axis=0)                          # (D-1, W, W)
    b_pts = jnp.concatenate(pts_bs, axis=0)[:, None]           # (D*W, 1)

    # fused head: rows 0:W -> feature_linear, row W -> pts_output_linear
    w_head = jnp.concatenate([raw['w_feat'], raw['w_sig']], axis=0)            # (W+1, W)
    b_head = jnp.concatenate([raw['b_feat'], raw['b_sig']], axis=0)[:, None]   # (W+1, 1)

    # views_linears[0]: input was cat([feature, views]) -> split weight
    w_vf = raw['w_view'][:, :W_WIDTH]                          # (W//2, W)
    w_vv = raw['w_view'][:, W_WIDTH:]                          # (W//2, 3)
    b_v = raw['b_view'][:, None]                               # (W//2, 1)

    w_vo = raw['w_vout']                                       # (3, W//2)
    b_vo = raw['b_vout'][:, None]                              # (3, 1)

    return [w_first, w_main, w_skip, b_pts,
            w_head, b_head,
            w_vf, w_vv, b_v,
            w_vo, b_vo]


# ---- pure-JAX reference (mirrors the PyTorch forward) ------------------------
def mlp_reference(pts, views, raw):
    h = pts
    for i in range(D_DEPTH):
        w, b = raw['pts_ws'][i], raw['pts_bs'][i]
        h = jnp.maximum(h @ w.T + b, 0.0)
        if i in SKIPS:
            h = jnp.concatenate([pts, h], axis=-1)
    pts_out = h @ raw['w_sig'].T + raw['b_sig']                # (N, 1)
    sigma = jax.nn.softplus(pts_out + SIGMA_BIAS)
    feature = h @ raw['w_feat'].T + raw['b_feat']
    hv = jnp.concatenate([feature, views], axis=-1)
    hv = jnp.maximum(hv @ raw['w_view'].T + raw['b_view'], 0.0)
    rgb = jax.nn.sigmoid(hv @ raw['w_vout'].T + raw['b_vout'])
    rgb = rgb * (1.0 + 2.0 * RGB_PADDING) - RGB_PADDING
    return sigma, rgb


if __name__ == "__main__":
    key = jax.random.PRNGKey(0)
    k_pts, k_views, k_params = jax.random.split(key, 3)

    N = 2000  # rays * samples, flattened (not a multiple of tm -> exercises padding)
    pts = jax.random.normal(k_pts, (N, PTS_DIM), jnp.float32)
    views = jax.random.normal(k_views, (N, VIEWS_DIM), jnp.float32)
    views = views / jnp.linalg.norm(views, axis=-1, keepdims=True)

    raw = make_raw_params(k_params)
    packed = pack_params(raw)

    sigma, rgb = mlp_forward(pts, views, packed, tm=1024)
    jax.block_until_ready((sigma, rgb))

    sigma_ref, rgb_ref = mlp_reference(pts, views, raw)
    assert sigma.shape == (N, 1) and rgb.shape == (N, 3)
    assert jnp.allclose(sigma, sigma_ref, atol=1e-4, rtol=1e-4)
    assert jnp.allclose(rgb, rgb_ref, atol=1e-4, rtol=1e-4)

    print("KERNEL_OK")
</pallas_src>

<mosaic_0001>
module attributes {stable_mosaic.version = 11 : i64} {
  func.func @mlp_kernel(%arg0: i32, %arg1: memref<3x1024xf32, #tpu.memory_space<vmem>>, %arg2: memref<3x1024xf32, #tpu.memory_space<vmem>>, %arg3: memref<32x3xf32, #tpu.memory_space<vmem>>, %arg4: memref<7x32x32xf32, #tpu.memory_space<vmem>>, %arg5: memref<32x3xf32, #tpu.memory_space<vmem>>, %arg6: memref<256x1xf32, #tpu.memory_space<vmem>>, %arg7: memref<33x32xf32, #tpu.memory_space<vmem>>, %arg8: memref<33x1xf32, #tpu.memory_space<vmem>>, %arg9: memref<16x32xf32, #tpu.memory_space<vmem>>, %arg10: memref<16x3xf32, #tpu.memory_space<vmem>>, %arg11: memref<16x1xf32, #tpu.memory_space<vmem>>, %arg12: memref<3x16xf32, #tpu.memory_space<vmem>>, %arg13: memref<3x1xf32, #tpu.memory_space<vmem>>, %arg14: memref<4x1024xf32, #tpu.memory_space<vmem>>) attributes {dimension_semantics = [#tpu.dimension_semantics<parallel>], iteration_bounds = array<i64: 2>, scalar_prefetch = 0 : i64, scratch_operands = 0 : i64, tpu.core_type = #tpu.core_type<tc>, window_params = [{transform_indices = @transform_0, window_bounds = array<i64: 3, 1024>}, {transform_indices = @transform_1, window_bounds = array<i64: 3, 1024>}, {pipeline_mode = #tpu.pipeline_mode<synchronous>, transform_indices = @transform_2, window_bounds = array<i64: 32, 3>}, {pipeline_mode = #tpu.pipeline_mode<synchronous>, transform_indices = @transform_3, window_bounds = array<i64: 7, 32, 32>}, {pipeline_mode = #tpu.pipeline_mode<synchronous>, transform_indices = @transform_4, window_bounds = array<i64: 32, 3>}, {pipeline_mode = #tpu.pipeline_mode<synchronous>, transform_indices = @transform_5, window_bounds = array<i64: 256, 1>}, {pipeline_mode = #tpu.pipeline_mode<synchronous>, transform_indices = @transform_6, window_bounds = array<i64: 33, 32>}, {pipeline_mode = #tpu.pipeline_mode<synchronous>, transform_indices = @transform_7, window_bounds = array<i64: 33, 1>}, {pipeline_mode = #tpu.pipeline_mode<synchronous>, transform_indices = @transform_8, window_bounds = array<i64: 16, 32>}, {pipeline_mode = #tpu.pipeline_mode<synchronous>, transform_indices = @transform_9, window_bounds = array<i64: 16, 3>}, {pipeline_mode = #tpu.pipeline_mode<synchronous>, transform_indices = @transform_10, window_bounds = array<i64: 16, 1>}, {pipeline_mode = #tpu.pipeline_mode<synchronous>, transform_indices = @transform_11, window_bounds = array<i64: 3, 16>}, {pipeline_mode = #tpu.pipeline_mode<synchronous>, transform_indices = @transform_12, window_bounds = array<i64: 3, 1>}, {transform_indices = @transform_13, window_bounds = array<i64: 4, 1024>}]} {
    %c0 = arith.constant 0 : index
    %c0_0 = arith.constant 0 : index
    %0 = vector.load %arg1[%c0, %c0_0] : memref<3x1024xf32, #tpu.memory_space<vmem>>, vector<3x1024xf32>
    %c0_1 = arith.constant 0 : index
    %c0_2 = arith.constant 0 : index
    %1 = vector.load %arg2[%c0_1, %c0_2] : memref<3x1024xf32, #tpu.memory_space<vmem>>, vector<3x1024xf32>
    %c0_3 = arith.constant 0 : index
    %c0_4 = arith.constant 0 : index
    %2 = vector.load %arg3[%c0_3, %c0_4] : memref<32x3xf32, #tpu.memory_space<vmem>>, vector<32x3xf32>
    %cst = arith.constant dense<0.000000e+00> : vector<32x1024xf32>
    %3 = tpu.matmul %2, %0, %cst {dimension_numbers = #tpu.dot_dimension_numbers<[1], [0], [0], [1], [0, 0, 1, 1], [], []>} : vector<32x3xf32>, vector<3x1024xf32>, vector<32x1024xf32> -> vector<32x1024xf32>
    %c0_5 = arith.constant 0 : index
    %c0_6 = arith.constant 0 : index
    %4 = vector.load %arg6[%c0_5, %c0_6] : memref<256x1xf32, #tpu.memory_space<vmem>>, vector<32x1xf32>
    %5 = vector.broadcast %4 : vector<32x1xf32> to vector<32x1024xf32>
    %6 = arith.addf %3, %5 : vector<32x1024xf32>
    %cst_7 = arith.constant 0.000000e+00 : f32
    %7 = vector.broadcast %cst_7 : f32 to vector<32x1024xf32>
    %8 = arith.maximumf %6, %7 : vector<32x1024xf32>
    %c0_8 = arith.constant 0 : index
    %c0_9 = arith.constant 0 : index
    %c0_10 = arith.constant 0 : index
    %9 = vector.load %arg4[%c0_8, %c0_9, %c0_10] : memref<7x32x32xf32, #tpu.memory_space<vmem>>, vector<1x32x32xf32>
    %10 = vector.shape_cast %9 : vector<1x32x32xf32> to vector<32x32xf32>
    %cst_11 = arith.constant dense<0.000000e+00> : vector<32x1024xf32>
    %11 = tpu.matmul %10, %8, %cst_11 {dimension_numbers = #tpu.dot_dimension_numbers<[1], [0], [0], [1], [0, 0, 1, 1], [], []>} : vector<32x32xf32>, vector<32x1024xf32>, vector<32x1024xf32> -> vector<32x1024xf32>
    %c32 = arith.constant 32 : index
    %c0_12 = arith.constant 0 : index
    %12 = vector.load %arg6[%c32, %c0_12] : memref<256x1xf32, #tpu.memory_space<vmem>>, vector<32x1xf32>
    %13 = vector.broadcast %12 : vector<32x1xf32> to vector<32x1024xf32>
    %14 = arith.addf %11, %13 : vector<32x1024xf32>
    %cst_13 = arith.constant 0.000000e+00 : f32
    %15 = vector.broadcast %cst_13 : f32 to vector<32x1024xf32>
    %16 = arith.maximumf %14, %15 : vector<32x1024xf32>
    %c1 = arith.constant 1 : index
    %c0_14 = arith.constant 0 : index
    %c0_15 = arith.constant 0 : index
    %17 = vector.load %arg4[%c1, %c0_14, %c0_15] : memref<7x32x32xf32, #tpu.memory_space<vmem>>, vector<1x32x32xf32>
    %18 = vector.shape_cast %17 : vector<1x32x32xf32> to vector<32x32xf32>
    %cst_16 = arith.constant dense<0.000000e+00> : vector<32x1024xf32>
    %19 = tpu.matmul %18, %16, %cst_16 {dimension_numbers = #tpu.dot_dimension_numbers<[1], [0], [0], [1], [0, 0, 1, 1], [], []>} : vector<32x32xf32>, vector<32x1024xf32>, vector<32x1024xf32> -> vector<32x1024xf32>
    %c64 = arith.constant 64 : index
    %c0_17 = arith.constant 0 : index
    %20 = vector.load %arg6[%c64, %c0_17] : memref<256x1xf32, #tpu.memory_space<vmem>>, vector<32x1xf32>
    %21 = vector.broadcast %20 : vector<32x1xf32> to vector<32x1024xf32>
    %22 = arith.addf %19, %21 : vector<32x1024xf32>
    %cst_18 = arith.constant 0.000000e+00 : f32
    %23 = vector.broadcast %cst_18 : f32 to vector<32x1024xf32>
    %24 = arith.maximumf %22, %23 : vector<32x1024xf32>
    %c2 = arith.constant 2 : index
    %c0_19 = arith.constant 0 : index
    %c0_20 = arith.constant 0 : index
    %25 = vector.load %arg4[%c2, %c0_19, %c0_20] : memref<7x32x32xf32, #tpu.memory_space<vmem>>, vector<1x32x32xf32>
    %26 = vector.shape_cast %25 : vector<1x32x32xf32> to vector<32x32xf32>
    %cst_21 = arith.constant dense<0.000000e+00> : vector<32x1024xf32>
    %27 = tpu.matmul %26, %24, %cst_21 {dimension_numbers = #tpu.dot_dimension_numbers<[1], [0], [0], [1], [0, 0, 1, 1], [], []>} : vector<32x32xf32>, vector<32x1024xf32>, vector<32x1024xf32> -> vector<32x1024xf32>
    %c96 = arith.constant 96 : index
    %c0_22 = arith.constant 0 : index
    %28 = vector.load %arg6[%c96, %c0_22] : memref<256x1xf32, #tpu.memory_space<vmem>>, vector<32x1xf32>
    %29 = vector.broadcast %28 : vector<32x1xf32> to vector<32x1024xf32>
    %30 = arith.addf %27, %29 : vector<32x1024xf32>
    %cst_23 = arith.constant 0.000000e+00 : f32
    %31 = vector.broadcast %cst_23 : f32 to vector<32x1024xf32>
    %32 = arith.maximumf %30, %31 : vector<32x1024xf32>
    %c3 = arith.constant 3 : index
    %c0_24 = arith.constant 0 : index
    %c0_25 = arith.constant 0 : index
    %33 = vector.load %arg4[%c3, %c0_24, %c0_25] : memref<7x32x32xf32, #tpu.memory_space<vmem>>, vector<1x32x32xf32>
    %34 = vector.shape_cast %33 : vector<1x32x32xf32> to vector<32x32xf32>
    %cst_26 = arith.constant dense<0.000000e+00> : vector<32x1024xf32>
    %35 = tpu.matmul %34, %32, %cst_26 {dimension_numbers = #tpu.dot_dimension_numbers<[1], [0], [0], [1], [0, 0, 1, 1], [], []>} : vector<32x32xf32>, vector<32x1024xf32>, vector<32x1024xf32> -> vector<32x1024xf32>
    %c128 = arith.constant 128 : index
    %c0_27 = arith.constant 0 : index
    %36 = vector.load %arg6[%c128, %c0_27] : memref<256x1xf32, #tpu.memory_space<vmem>>, vector<32x1xf32>
    %37 = vector.broadcast %36 : vector<32x1xf32> to vector<32x1024xf32>
    %38 = arith.addf %35, %37 : vector<32x1024xf32>
    %cst_28 = arith.constant 0.000000e+00 : f32
    %39 = vector.broadcast %cst_28 : f32 to vector<32x1024xf32>
    %40 = arith.maximumf %38, %39 : vector<32x1024xf32>
    %c4 = arith.constant 4 : index
    %c0_29 = arith.constant 0 : index
    %c0_30 = arith.constant 0 : index
    %41 = vector.load %arg4[%c4, %c0_29, %c0_30] : memref<7x32x32xf32, #tpu.memory_space<vmem>>, vector<1x32x32xf32>
    %42 = vector.shape_cast %41 : vector<1x32x32xf32> to vector<32x32xf32>
    %cst_31 = arith.constant dense<0.000000e+00> : vector<32x1024xf32>
    %43 = tpu.matmul %42, %40, %cst_31 {dimension_numbers = #tpu.dot_dimension_numbers<[1], [0], [0], [1], [0, 0, 1, 1], [], []>} : vector<32x32xf32>, vector<32x1024xf32>, vector<32x1024xf32> -> vector<32x1024xf32>
    %c0_32 = arith.constant 0 : index
    %c0_33 = arith.constant 0 : index
    %44 = vector.load %arg5[%c0_32, %c0_33] : memref<32x3xf32, #tpu.memory_space<vmem>>, vector<32x3xf32>
    %cst_34 = arith.constant dense<0.000000e+00> : vector<32x1024xf32>
    %45 = tpu.matmul %44, %0, %cst_34 {dimension_numbers = #tpu.dot_dimension_numbers<[1], [0], [0], [1], [0, 0, 1, 1], [], []>} : vector<32x3xf32>, vector<3x1024xf32>, vector<32x1024xf32> -> vector<32x1024xf32>
    %46 = arith.addf %43, %45 : vector<32x1024xf32>
    %c160 = arith.constant 160 : index
    %c0_35 = arith.constant 0 : index
    %47 = vector.load %arg6[%c160, %c0_35] : memref<256x1xf32, #tpu.memory_space<vmem>>, vector<32x1xf32>
    %48 = vector.broadcast %47 : vector<32x1xf32> to vector<32x1024xf32>
    %49 = arith.addf %46, %48 : vector<32x1024xf32>
    %cst_36 = arith.constant 0.000000e+00 : f32
    %50 = vector.broadcast %cst_36 : f32 to vector<32x1024xf32>
    %51 = arith.maximumf %49, %50 : vector<32x1024xf32>
    %c5 = arith.constant 5 : index
    %c0_37 = arith.constant 0 : index
    %c0_38 = arith.constant 0 : index
    %52 = vector.load %arg4[%c5, %c0_37, %c0_38] : memref<7x32x32xf32, #tpu.memory_space<vmem>>, vector<1x32x32xf32>
    %53 = vector.shape_cast %52 : vector<1x32x32xf32> to vector<32x32xf32>
    %cst_39 = arith.constant dense<0.000000e+00> : vector<32x1024xf32>
    %54 = tpu.matmul %53, %51, %cst_39 {dimension_numbers = #tpu.dot_dimension_numbers<[1], [0], [0], [1], [0, 0, 1, 1], [], []>} : vector<32x32xf32>, vector<32x1024xf32>, vector<32x1024xf32> -> vector<32x1024xf32>
    %c192 = arith.constant 192 : index
    %c0_40 = arith.constant 0 : index
    %55 = vector.load %arg6[%c192, %c0_40] : memref<256x1xf32, #tpu.memory_space<vmem>>, vector<32x1xf32>
    %56 = vector.broadcast %55 : vector<32x1xf32> to vector<32x1024xf32>
    %57 = arith.addf %54, %56 : vector<32x1024xf32>
    %cst_41 = arith.constant 0.000000e+00 : f32
    %58 = vector.broadcast %cst_41 : f32 to vector<32x1024xf32>
    %59 = arith.maximumf %57, %58 : vector<32x1024xf32>
    %c6 = arith.constant 6 : index
    %c0_42 = arith.constant 0 : index
    %c0_43 = arith.constant 0 : index
    %60 = vector.load %arg4[%c6, %c0_42, %c0_43] : memref<7x32x32xf32, #tpu.memory_space<vmem>>, vector<1x32x32xf32>
    %61 = vector.shape_cast %60 : vector<1x32x32xf32> to vector<32x32xf32>
    %cst_44 = arith.constant dense<0.000000e+00> : vector<32x1024xf32>
    %62 = tpu.matmul %61, %59, %cst_44 {dimension_numbers = #tpu.dot_dimension_numbers<[1], [0], [0], [1], [0, 0, 1, 1], [], []>} : vector<32x32xf32>, vector<32x1024xf32>, vector<32x1024xf32> -> vector<32x1024xf32>
    %c224 = arith.constant 224 : index
    %c0_45 = arith.constant 0 : index
    %63 = vector.load %arg6[%c224, %c0_45] : memref<256x1xf32, #tpu.memory_space<vmem>>, vector<32x1xf32>
    %64 = vector.broadcast %63 : vector<32x1xf32> to vector<32x1024xf32>
    %65 = arith.addf %62, %64 : vector<32x1024xf32>
    %cst_46 = arith.constant 0.000000e+00 : f32
    %66 = vector.broadcast %cst_46 : f32 to vector<32x1024xf32>
    %67 = arith.maximumf %65, %66 : vector<32x1024xf32>
    %c0_47 = arith.constant 0 : index
    %c0_48 = arith.constant 0 : index
    %68 = vector.load %arg7[%c0_47, %c0_48] : memref<33x32xf32, #tpu.memory_space<vmem>>, vector<33x32xf32>
    %cst_49 = arith.constant dense<0.000000e+00> : vector<33x1024xf32>
    %69 = tpu.matmul %68, %67, %cst_49 {dimension_numbers = #tpu.dot_dimension_numbers<[1], [0], [0], [1], [0, 0, 1, 1], [], []>} : vector<33x32xf32>, vector<32x1024xf32>, vector<33x1024xf32> -> vector<33x1024xf32>
    %c0_50 = arith.constant 0 : index
    %c0_51 = arith.constant 0 : index
    %70 = vector.load %arg8[%c0_50, %c0_51] : memref<33x1xf32, #tpu.memory_space<vmem>>, vector<33x1xf32>
    %71 = vector.broadcast %70 : vector<33x1xf32> to vector<33x1024xf32>
    %72 = arith.addf %69, %71 : vector<33x1024xf32>
    %73 = vector.extract_strided_slice %72 {offsets = [0, 0], sizes = [32, 1024], strides = [1, 1]} : vector<33x1024xf32> to vector<32x1024xf32>
    %74 = vector.extract_strided_slice %72 {offsets = [32, 0], sizes = [1, 1024], strides = [1, 1]} : vector<33x1024xf32> to vector<1x1024xf32>
    %cst_52 = arith.constant 5.000000e-01 : f32
    %75 = vector.broadcast %cst_52 : f32 to vector<1x1024xf32>
    %76 = arith.addf %74, %75 : vector<1x1024xf32>
    %cst_53 = arith.constant 0.000000e+00 : f32
    %77 = vector.broadcast %cst_53 : f32 to vector<1x1024xf32>
    %78 = arith.maximumf %76, %77 : vector<1x1024xf32>
    %79 = math.absf %76 : vector<1x1024xf32>
    %cst_54 = arith.constant 0.000000e+00 : f32
    %80 = vector.broadcast %cst_54 : f32 to vector<1x1024xf32>
    %81 = arith.subf %80, %79 : vector<1x1024xf32>
    %82 = math.exp %81 : vector<1x1024xf32>
    %83 = math.log1p %82 : vector<1x1024xf32>
    %84 = arith.addf %78, %83 : vector<1x1024xf32>
    %c0_55 = arith.constant 0 : index
    %c0_56 = arith.constant 0 : index
    %85 = vector.load %arg9[%c0_55, %c0_56] : memref<16x32xf32, #tpu.memory_space<vmem>>, vector<16x32xf32>
    %cst_57 = arith.constant dense<0.000000e+00> : vector<16x1024xf32>
    %86 = tpu.matmul %85, %73, %cst_57 {dimension_numbers = #tpu.dot_dimension_numbers<[1], [0], [0], [1], [0, 0, 1, 1], [], []>} : vector<16x32xf32>, vector<32x1024xf32>, vector<16x1024xf32> -> vector<16x1024xf32>
    %c0_58 = arith.constant 0 : index
    %c0_59 = arith.constant 0 : index
    %87 = vector.load %arg10[%c0_58, %c0_59] : memref<16x3xf32, #tpu.memory_space<vmem>>, vector<16x3xf32>
    %cst_60 = arith.constant dense<0.000000e+00> : vector<16x1024xf32>
    %88 = tpu.matmul %87, %1, %cst_60 {dimension_numbers = #tpu.dot_dimension_numbers<[1], [0], [0], [1], [0, 0, 1, 1], [], []>} : vector<16x3xf32>, vector<3x1024xf32>, vector<16x1024xf32> -> vector<16x1024xf32>
    %89 = arith.addf %86, %88 : vector<16x1024xf32>
    %c0_61 = arith.constant 0 : index
    %c0_62 = arith.constant 0 : index
    %90 = vector.load %arg11[%c0_61, %c0_62] : memref<16x1xf32, #tpu.memory_space<vmem>>, vector<16x1xf32>
    %91 = vector.broadcast %90 : vector<16x1xf32> to vector<16x1024xf32>
    %92 = arith.addf %89, %91 : vector<16x1024xf32>
    %cst_63 = arith.constant 0.000000e+00 : f32
    %93 = vector.broadcast %cst_63 : f32 to vector<16x1024xf32>
    %94 = arith.maximumf %92, %93 : vector<16x1024xf32>
    %c0_64 = arith.constant 0 : index
    %c0_65 = arith.constant 0 : index
    %95 = vector.load %arg12[%c0_64, %c0_65] : memref<3x16xf32, #tpu.memory_space<vmem>>, vector<3x16xf32>
    %cst_66 = arith.constant dense<0.000000e+00> : vector<3x1024xf32>
    %96 = tpu.matmul %95, %94, %cst_66 {dimension_numbers = #tpu.dot_dimension_numbers<[1], [0], [0], [1], [0, 0, 1, 1], [], []>} : vector<3x16xf32>, vector<16x1024xf32>, vector<3x1024xf32> -> vector<3x1024xf32>
    %c0_67 = arith.constant 0 : index
    %c0_68 = arith.constant 0 : index
    %97 = vector.load %arg13[%c0_67, %c0_68] : memref<3x1xf32, #tpu.memory_space<vmem>>, vector<3x1xf32>
    %98 = vector.broadcast %97 : vector<3x1xf32> to vector<3x1024xf32>
    %99 = arith.addf %96, %98 : vector<3x1024xf32>
    %cst_69 = arith.constant 0.000000e+00 : f32
    %100 = vector.broadcast %cst_69 : f32 to vector<3x1024xf32>
    %101 = arith.subf %100, %99 : vector<3x1024xf32>
    %102 = math.exp %101 : vector<3x1024xf32>
    %cst_70 = arith.constant 1.000000e+00 : f32
    %103 = vector.broadcast %cst_70 : f32 to vector<3x1024xf32>
    %104 = arith.addf %103, %102 : vector<3x1024xf32>
    %cst_71 = arith.constant 1.000000e+00 : f32
    %105 = vector.broadcast %cst_71 : f32 to vector<3x1024xf32>
    %106 = arith.divf %105, %104 : vector<3x1024xf32>
    %cst_72 = arith.constant 1.002000e+00 : f32
    %107 = vector.broadcast %cst_72 : f32 to vector<3x1024xf32>
    %108 = arith.mulf %106, %107 : vector<3x1024xf32>
    %cst_73 = arith.constant 1.000000e-03 : f32
    %109 = vector.broadcast %cst_73 : f32 to vector<3x1024xf32>
    %110 = arith.subf %108, %109 : vector<3x1024xf32>
    %111 = tpu.concatenate %84, %110 in 0 : vector<1x1024xf32>, vector<3x1024xf32> -> vector<4x1024xf32>
    %c0_74 = arith.constant 0 : index
    %c0_75 = arith.constant 0 : index
    %112 = vector.load %arg14[%c0_74, %c0_75] : memref<4x1024xf32, #tpu.memory_space<vmem>>, vector<4x1024xf32>
    tpu.vector_store %arg14[%c0_74, %c0_75], %111 {strides = array<i32>} : memref<4x1024xf32, #tpu.memory_space<vmem>>, vector<4x1024xf32>,
    return
  }
  func.func @transform_0(%arg0: i32) -> (i32, i32) {
    %c0_i32 = arith.constant 0 : i32
    %c0_i32_0 = arith.constant 0 : i32
    return %c0_i32, %arg0 : i32, i32
  }
  func.func @transform_1(%arg0: i32) -> (i32, i32) {
    %c0_i32 = arith.constant 0 : i32
    %c0_i32_0 = arith.constant 0 : i32
    return %c0_i32, %arg0 : i32, i32
  }
  func.func @transform_2(%arg0: i32) -> (i32, i32) {
    %c0_i32 = arith.constant 0 : i32
    %c0_i32_0 = arith.constant 0 : i32
    %c0_i32_1 = arith.constant 0 : i32
    return %c0_i32, %c0_i32_0 : i32, i32
  }
  func.func @transform_3(%arg0: i32) -> (i32, i32, i32) {
    %c0_i32 = arith.constant 0 : i32
    %c0_i32_0 = arith.constant 0 : i32
    %c0_i32_1 = arith.constant 0 : i32
    %c0_i32_2 = arith.constant 0 : i32
    return %c0_i32, %c0_i32_0, %c0_i32_1 : i32, i32, i32
  }
  func.func @transform_4(%arg0: i32) -> (i32, i32) {
    %c0_i32 = arith.constant 0 : i32
    %c0_i32_0 = arith.constant 0 : i32
    %c0_i32_1 = arith.constant 0 : i32
    return %c0_i32, %c0_i32_0 : i32, i32
  }
  func.func @transform_5(%arg0: i32) -> (i32, i32) {
    %c0_i32 = arith.constant 0 : i32
    %c0_i32_0 = arith.constant 0 : i32
    %c0_i32_1 = arith.constant 0 : i32
    return %c0_i32, %c0_i32_0 : i32, i32
  }
  func.func @transform_6(%arg0: i32) -> (i32, i32) {
    %c0_i32 = arith.constant 0 : i32
    %c0_i32_0 = arith.constant 0 : i32
    %c0_i32_1 = arith.constant 0 : i32
    return %c0_i32, %c0_i32_0 : i32, i32
  }
  func.func @transform_7(%arg0: i32) -> (i32, i32) {
    %c0_i32 = arith.constant 0 : i32
    %c0_i32_0 = arith.constant 0 : i32
    %c0_i32_1 = arith.constant 0 : i32
    return %c0_i32, %c0_i32_0 : i32, i32
  }
  func.func @transform_8(%arg0: i32) -> (i32, i32) {
    %c0_i32 = arith.constant 0 : i32
    %c0_i32_0 = arith.constant 0 : i32
    %c0_i32_1 = arith.constant 0 : i32
    return %c0_i32, %c0_i32_0 : i32, i32
  }
  func.func @transform_9(%arg0: i32) -> (i32, i32) {
    %c0_i32 = arith.constant 0 : i32
    %c0_i32_0 = arith.constant 0 : i32
    %c0_i32_1 = arith.constant 0 : i32
    return %c0_i32, %c0_i32_0 : i32, i32
  }
  func.func @transform_10(%arg0: i32) -> (i32, i32) {
    %c0_i32 = arith.constant 0 : i32
    %c0_i32_0 = arith.constant 0 : i32
    %c0_i32_1 = arith.constant 0 : i32
    return %c0_i32, %c0_i32_0 : i32, i32
  }
  func.func @transform_11(%arg0: i32) -> (i32, i32) {
    %c0_i32 = arith.constant 0 : i32
    %c0_i32_0 = arith.constant 0 : i32
    %c0_i32_1 = arith.constant 0 : i32
    return %c0_i32, %c0_i32_0 : i32, i32
  }
  func.func @transform_12(%arg0: i32) -> (i32, i32) {
    %c0_i32 = arith.constant 0 : i32
    %c0_i32_0 = arith.constant 0 : i32
    %c0_i32_1 = arith.constant 0 : i32
    return %c0_i32, %c0_i32_0 : i32, i32
  }
  func.func @transform_13(%arg0: i32) -> (i32, i32) {
    %c0_i32 = arith.constant 0 : i32
    %c0_i32_0 = arith.constant 0 : i32
    return %c0_i32, %arg0 : i32, i32
  }
}

</mosaic_0001>

<bundles_post_ra>
// kernel: tpu_custom_call.1
= control target key start
LH: loop header
LB: loop body
LE: loop exit
PB: predicated region body
PF: predicated region fallthrough
CT: control target
= control target key end

     0   :  { %s7084_s0 = inlined_call_operand.vmem [shape: f32[3,2048], index: 0, kind: input, shape index: {}]   ;;  %s7085_s1 = inlined_call_operand.vmem [shape: f32[3,2048], index: 1, kind: input, shape index: {}]   ;;  %s7086_s2 = inlined_call_operand.vmem [shape: f32[32,3], index: 2, kind: input, shape index: {}]   ;;  %s7087_s3 = inlined_call_operand.vmem [shape: f32[7,32,32], index: 3, kind: input, shape index: {}]   ;;  %s7088_s4 = inlined_call_operand.vmem [shape: f32[32,3], index: 4, kind: input, shape index: {}]   ;;  %s7089_s5 = inlined_call_operand.vmem [shape: f32[256,1], index: 5, kind: input, shape index: {}]   ;;  %s7090_s6 = inlined_call_operand.vmem [shape: f32[33,32], index: 6, kind: input, shape index: {}]   ;;  %s7091_s7 = inlined_call_operand.vmem [shape: f32[33,1], index: 7, kind: input, shape index: {}]   ;;  %s7092_s8 = inlined_call_operand.vmem [shape: f32[16,32], index: 8, kind: input, shape index: {}]   ;;  %s7093_s9 = inlined_call_operand.vmem [shape: f32[16,3], index: 9, kind: input, shape index: {}]   ;;  %s7094_s10 = inlined_call_operand.vmem [shape: f32[16,1], index: 10, kind: input, shape index: {}]   ;;  %s7095_s11 = inlined_call_operand.vmem [shape: f32[3,16], index: 11, kind: input, shape index: {}]   ;;  %s7096_s12 = inlined_call_operand.vmem [shape: f32[3,1], index: 12, kind: input, shape index: {}]   ;;  %s7097_s13 = inlined_call_operand.hbm [shape: f32[4,2048], index: 13, kind: output, shape index: {}]  }
   0x1   :  { %7099 = sst [smem:[#allocation6_spill]] %s7084_s0 }
   0x2   :  { %7100 = sst [smem:[#allocation7_spill]] %s7086_s2 }
   0x3   :  { %18 = vsyncpa [#allocation3], 0 }
   0x4   :  { %20 = vsyncpa [#allocation3 + $0x1], 0  ;;  %s5322_s25 = smov 0   ;;  %s5324_s26 = smov 0  }
   0x5   :  { %s5326_s27 = smov 0   ;;  %s5328_s28 = smov 0  }
   0x6 LB: > { %s5343_s29 = sadd.s32 4294967295, %s5249_s28   ;;  %s4641_s30 = sadd.s32 4294967294, %s5249_s28   ;;  %s5249_s28 = sphi %s5328_s28, %s7111_s28   ;;  %s5245_s27 = sphi %s5326_s27, %s7110_s27   ;;  %s5241_s26 = sphi %s5324_s26, %s7109_s26   ;;  %s5237_s25 = sphi %s5322_s25, %s7108_s25  }
   0x7   : > { %s5347_s14 = sadd.s32 1, %s5249_s28   ;;  %s316_s15 = sadd.s32 1, %s5245_s27 }
   0x8   : > { %s313_s16 = ssub.s32 %s5249_s28, %s5347_s14  ;;  %p326_p0 = scmp.ne.s32.totalorder %s5245_s27, %s5241_s26 }
   0x9   : > { %p314_p1 = scmp.eq.s32.totalorder %s313_s16, 0  ;;  %p327_p2 = scmp.eq.s32.totalorder %s5343_s29, 1 }
   0xa   : > { %p332_p3 = scmp.ne.s32.totalorder %s5241_s26, %s5237_s25  ;;  %p333_p4 = scmp.eq.s32.totalorder %s4641_s30, 1 }
   0xb   : > { %s5358_s17 = scalar_select %p314_p1, %s5245_s27, %s316_s15  }
   0xc   : > { %p5360_p5 = por %p327_p2, %p326_p0  ;;  %p5364_p6 = por %p333_p4, %p332_p3 }
   0xd   : > { %7101 = sst [smem:[#allocation5_spill]] %s5358_s17  ;;  %p4644_p7 = scmp.ge.s32.totalorder %s5249_s28, 1 }
   0xe   : > { %p402_p8 = scmp.lt.s32.totalorder %s5249_s28, 3 }
  0x10   : > { %p403_p9 = pnand %p4644_p7, %p402_p8 }
  0x11   : > { %s4646_s24 = sshll.u32 (!%p403_p9), %s5343_s29, 3  ;;  %s7104_s0 = sld [smem:[#allocation6_spill]] (!%p403_p9) }
  0x12   : > { %406 = sbr.rel (%p403_p9) target bundleno = 1914 (0x77a), region = 72  ;;  %p452_p10 = scmp.lt.s32.totalorder (!%p403_p9), %s4646_s24, 15 }
  0x13   : > { %s7105_s2 = sld [smem:[#allocation7_spill]] (!%p403_p9)  ;;  %s448_s15 = sand.u32 (!%p403_p9), 1, %s5241_s26  }
  0x14   : > { %s4645_s16 = sshll.u32 (!%p403_p9), %s448_s15, 5  ;;  %s5207_s20 = scalar_lea.hbm (!%p403_p9), %s7097_s13, 64 }
  0x17   : > { %v479_v0 = vld [vmem:[%s7089_s5 + $0x18] sm:$0xff]  ;;  %v477_v1 = vld [vmem:[%s7089_s5 + $0x8] sm:$0xff]  ;;  %v5251_v2 = vmov 0   ;;  %s7113_s24 = smov (!%p452_p10, %s4646_s24), 15  ;;  %v478_v3 = vld [vmem:[%s7089_s5 + $0x10] sm:$0xff]  ;;  %vm532_vm0 = vcmask 1042432  }
  0x18   : > { %5121 = vset.pattern.permute.xlu1 %v5251_v2  ;;  %5120 = vset.pattern.permute.xlu0 %v5251_v2  ;;  %s7098_s30 = sshll.u32 %s7113_s24, 2  ;;  %v476_v4 = vld [vmem:[%s7089_s5] sm:$0xff]  ;;  %vm519_vm1 = vcmask 23552   ;;  %v818_v12 = vld [vmem:[%s7089_s5 + $0x28] sm:$0xff]  ;;  %v1125_v21 = vld [vmem:[%s7089_s5 + $0x50] sm:$0xff]  ;;  %vm841_vm2 = vcmask 261120  }
  0x19   : > { %497 = vperm.xlu0 %5120, %v479_v0   ;;  %487 = vperm.xlu1 %5121, %v477_v1   ;;  %s455_s22 = scalar_lea.vmem %s7104_s0, %s7098_s30  ;;  %v472_v9 = vld [vmem:[%s7105_s2] sm:$0xff]  ;;  %v473_v20 = vld [vmem:[%s7105_s2 + $0x8] sm:$0xff]  ;;  %v474_v23 = vld [vmem:[%s7105_s2 + $0x10] sm:$0xff]  ;;  %s7106_s30 = sshll.u32 %s7113_s24, 2  ;;  %vm4163_vm3 = vcmask 130048   ;;  %vm4519_vm14 = vcmask 1040384  }
  0x1a   : > { %5122 = vset.pattern.permute.xlu2 %v5251_v2  ;;  %v464_v5 = vld [vmem:[%s455_s22] sm:$0x77]  ;;  %v465_v6 = vld [vmem:[%s455_s22 + $0x8] sm:$0x77]  ;;  %v466_v7 = vld [vmem:[%s455_s22 + $0x10] sm:$0x77]  ;;  %s6066_s17 = scalar_lea.vmem %s7085_s1, %s7106_s30 }
  0x1b   : > { %504 = vst [vmem:[#allocation1] ss:$2 sm:$0xff] %v464_v5  ;;  %v467_v8 = vld [vmem:[%s455_s22 + $0x18] sm:$0x77]  ;;  %v817_v14 = vld [vmem:[%s7089_s5 + $0x20] sm:$0xff]  ;;  %v1124_v22 = vld [vmem:[%s7089_s5 + $0x48] sm:$0xff] }
  0x1c   : > { %506 = vst [vmem:[#allocation1 + $0x10] ss:$2 sm:$0xff] %v465_v6  ;;  %v1431_v24 = vld [vmem:[%s7089_s5 + $0x78] sm:$0xff]  ;;  %v1430_v25 = vld [vmem:[%s7089_s5 + $0x70] sm:$0xff]  ;;  %v1428_v27 = vld [vmem:[%s7089_s5 + $0x60] sm:$0xff]  ;;  %vm4540_vm15 = vcmask 1043456  }
  0x1d   : > { %508 = vst [vmem:[#allocation1 + $0x20] ss:$2 sm:$0xff] %v466_v7  ;;  %v475_v26 = vld [vmem:[%s7105_s2 + $0x18] sm:$0xff]  ;;  %v1734_v29 = vld [vmem:[%s7089_s5 + $0x88] sm:$0xff]  ;;  %v1733_v30 = vld [vmem:[%s7089_s5 + $0x80] sm:$0xff]  ;;  %s5079_s24 = sshll.u32 %s5343_s29, 5 }
  0x1e   : > { %510 = vst [vmem:[#allocation1 + $0x30] ss:$2 sm:$0xff] %v467_v8  ;;  %v1736_v28 = vld [vmem:[%s7089_s5 + $0x98] sm:$0xff]  ;;  %v2563_v31 = vld [vmem:[%s7089_s5 + $0xb0] sm:$0xff]  ;;  %v2562_v32 = vld [vmem:[%s7089_s5 + $0xa8] sm:$0xff]  ;;  %s4565_s0 = scalar_lea.hbm %s7097_s13, %s5079_s24  ;;  %s4554_s22 = scalar_lea.sflag [#allocation3], %s448_s15 }
  0x1f   : > { %v2657_v33 = vld [vmem:[%s7089_s5 + $0xd8] sm:$0xff]  ;;  %v2656_v34 = vld [vmem:[%s7089_s5 + $0xd0] sm:$0xff]  ;;  %v2654_v35 = vld [vmem:[%s7089_s5 + $0xc0] sm:$0xff]  ;;  %s4569_s2 = sshll.u32 %s4565_s0, 4  ;;  %s4570_s2 = int_to_ptr.hbm [resolvable:$true] %s4569_s2 }
  0x20   : > { %v2962_v36 = vld [vmem:[%s7089_s5 + $0xf8] sm:$0xff]  ;;  %v2960_v37 = vld [vmem:[%s7089_s5 + $0xe8] sm:$0xff]  ;;  %v2959_v38 = vld [vmem:[%s7089_s5 + $0xe0] sm:$0xff]  ;;  %s5201_s23 = sshra.s32 %s4570_s2, 4  ;;  %s5202_s23 = int_to_ptr.hbm [resolvable:$true] %s5201_s23 }
  0x21   : > { %492 = vperm.xlu0 %5120, %v478_v3   ;;  %482 = vperm.xlu1 %5121, %v476_v4   ;;  %v3266_v39 = vld [vmem:[%s7091_s7 + $0x10] sm:$0xff]  ;;  %v3265_v40 = vld [vmem:[%s7091_s7 + $0x8] sm:$0xff]  ;;  %v4112_v42 = vld [vmem:[%s7094_s10] sm:$0xff]  ;;  %s5203_s30 = scalar_lea.hbm %s5202_s23, 32  ;;  %p5208_p0 = scmp.lt.s32.totalorder %s5202_s23, %s7097_s13 }
  0x22   : > { %v511_v10 = vld.sshfl [vmem:[#allocation1] sm:$0xff pattern:$0x75316420]  ;;  %v512_v11 = vld.sshfl [vmem:[#allocation1 + $0x8] sm:$0xff pattern:$0x75316420]  ;;  %p5204_p11 = scmp.ne.s32.totalorder %s5202_s23, %s5203_s30  ;;  %p5209_p1 = scmp.lt.s32.totalorder %s5207_s20, %s5203_s30 }
  0x23   : > { %4650 = vmatpush.msk.msra.mxu0 %vm532_vm0, %v511_v10  ;;  %4655 = vmatpush.msk.msra.mxu1 %vm532_vm0, %v512_v11  ;;  %2042 = vst [vmem:[#allocation1] ss:$2 sm:$0xff] %v464_v5  ;;  %v513_v13 = vld.sshfl [vmem:[#allocation1 + $0x10] sm:$0xff pattern:$0x75316420]  ;;  %v4113_v41 = vld [vmem:[%s7094_s10 + $0x8] sm:$0xff] }
  0x24   : > { %4660 = vmatpush.msk.msra.mxu2 %vm532_vm0, %v513_v13  ;;  %v514_v15 = vld.sshfl [vmem:[#allocation1 + $0x18] sm:$0xff pattern:$0x75316420]  ;;  %4651 = vmatmul.msk.f32.vlgmr.msra.gmra.mxu0 %vm519_vm1, %v472_v9  ;;  %v515_v16 = vld.sshfl [vmem:[#allocation1 + $0x20] sm:$0xff pattern:$0x75316420]  ;;  %p5205_p12 = pnand %p5204_p11, %p5360_p5  ;;  %p5210_p2 = por %p5209_p1, %p5208_p0 }
  0x25   : > { %4665 = vmatpush.msk.msra.mxu3 %vm532_vm0, %v514_v15  ;;  %2044 = vst [vmem:[#allocation1 + $0x10] ss:$2 sm:$0xff] %v465_v6  ;;  %4656 = vmatmul.msk.f32.vlgmr.msra.gmra.mxu1 %vm519_vm1, %v472_v9  ;;  %v516_v17 = vld.sshfl [vmem:[#allocation1 + $0x28] sm:$0xff pattern:$0x75316420]  ;;  %v820_v44 = vld [vmem:[%s7089_s5 + $0x38] sm:$0xff] }
  0x26   : > { %4661 = vmatmul.msk.f32.vlgmr.msra.gmra.mxu2 %vm519_vm1, %v472_v9  ;;  %4666 = vmatmul.msk.f32.vlgmr.msra.gmra.mxu3 %vm519_vm1, %v472_v9  ;;  %2046 = vst [vmem:[#allocation1 + $0x20] ss:$2 sm:$0xff] %v466_v7  ;;  %v517_v18 = vld.sshfl [vmem:[#allocation1 + $0x30] sm:$0xff pattern:$0x75316420]  ;;  %v1126_v46 = vld [vmem:[%s7089_s5 + $0x58] sm:$0xff]  ;;  %p5206_p13 = pneg %p5205_p12 }
  0x27   : > { %v518_v19 = vld.sshfl [vmem:[#allocation1 + $0x38] sm:$0xff pattern:$0x75316420]  ;;  %4670 = vmatpush.msk.msrb.mxu0 %vm532_vm0, %v515_v16  ;;  %4675 = vmatpush.msk.msrb.mxu1 %vm532_vm0, %v516_v17  ;;  %v3268_v43 = vld [vmem:[%s7091_s7 + $0x20] sm:$0x1]  ;;  %v819_v45 = vld [vmem:[%s7089_s5 + $0x30] sm:$0xff] }
  0x28   : > { %2048 = vst [vmem:[#allocation1 + $0x30] ss:$2 sm:$0xff] %v467_v8  ;;  %4680 = vmatpush.msk.msrb.mxu2 %vm532_vm0, %v517_v18  ;;  %4685 = vmatpush.msk.msrb.mxu3 %vm532_vm0, %v518_v19  ;;  %v1123_v47 = vld [vmem:[%s7089_s5 + $0x40] sm:$0xff]  ;;  %v1429_v50 = vld [vmem:[%s7089_s5 + $0x68] sm:$0xff]  ;;  %v1735_v56 = vld [vmem:[%s7089_s5 + $0x90] sm:$0xff]  ;;  %p5211_p3 = pnand %p5210_p2, %p5206_p13 }
  0x29   : > { %828 = vperm.xlu0 %5120, %v818_v12   ;;  %823 = vperm.xlu1 %5121, %v817_v14   ;;  %v2564_v62 = vld [vmem:[%s7089_s5 + $0xb8] sm:$0xff]  ;;  %v2561_v19 = vld [vmem:[%s7089_s5 + $0xa0] sm:$0xff] }
  0x2a   : > { %838 = vperm.xlu2 %5122, %v820_v44  }
  0x2c   : > { %4652 = vmatmul.msk.f32.gmra.mxu0 %vm519_vm1, %v473_v20 }
  0x2d   : > { %4657 = vmatmul.msk.f32.gmra.mxu1 %vm519_vm1, %v473_v20 }
  0x2e   : > { %4662 = vmatmul.msk.f32.gmra.mxu2 %vm519_vm1, %v473_v20  ;;  %4667 = vmatmul.msk.f32.gmra.mxu3 %vm519_vm1, %v473_v20 }
  0x31   : > { %1139 = vperm.xlu0 %5120, %v1125_v21   ;;  %1134 = vperm.xlu1 %5121, %v1124_v22  }
  0x32   : > { %833 = vperm.xlu2 %5122, %v819_v45  }
  0x34   : > { %4653 = vmatmul.msk.f32.gmra.mxu0 %vm519_vm1, %v474_v23 }
  0x35   : > { %4658 = vmatmul.msk.f32.gmra.mxu1 %vm519_vm1, %v474_v23 }
  0x36   : > { %4663 = vmatmul.msk.f32.gmra.mxu2 %vm519_vm1, %v474_v23  ;;  %4668 = vmatmul.msk.f32.gmra.mxu3 %vm519_vm1, %v474_v23 }
  0x39   : > { %1449 = vperm.xlu0 %5120, %v1431_v24   ;;  %1444 = vperm.xlu1 %5121, %v1430_v25  }
  0x3a   : > { %1144 = vperm.xlu2 %5122, %v1126_v46  }
  0x3c   : > { %4654 = vmatmul.msk.f32.gmra.mxu0 %vm519_vm1, %v475_v26 }
  0x3d   : > { %4659 = vmatmul.msk.f32.gmra.mxu1 %vm519_vm1, %v475_v26 }
  0x3e   : > { %4664 = vmatmul.msk.f32.gmra.mxu2 %vm519_vm1, %v475_v26  ;;  %4669 = vmatmul.msk.f32.gmra.mxu3 %vm519_vm1, %v475_v26 }
  0x41   : > { %1434 = vperm.xlu0 %5120, %v1428_v27   ;;  %1754 = vperm.xlu1 %5121, %v1736_v28  }
  0x42   : > { %1129 = vperm.xlu2 %5122, %v1123_v47  }
  0x44   : > { %4671 = vmatmul.msk.f32.vlgmr.msrb.gmra.mxu0 %vm519_vm1, %v472_v9 }
  0x45   : > { %4676 = vmatmul.msk.f32.vlgmr.msrb.gmra.mxu1 %vm519_vm1, %v472_v9 }
  0x46   : > { %4681 = vmatmul.msk.f32.vlgmr.msrb.gmra.mxu2 %vm519_vm1, %v472_v9  ;;  %4686 = vmatmul.msk.f32.vlgmr.msrb.gmra.mxu3 %vm519_vm1, %v472_v9 }
  0x49   : > { %1744 = vperm.xlu0 %5120, %v1734_v29   ;;  %1739 = vperm.xlu1 %5121, %v1733_v30  }
  0x4a   : > { %1439 = vperm.xlu2 %5122, %v1429_v50  }
  0x4c   : > { %4672 = vmatmul.msk.f32.gmra.mxu0 %vm519_vm1, %v473_v20 }
  0x4d   : > { %4677 = vmatmul.msk.f32.gmra.mxu1 %vm519_vm1, %v473_v20 }
  0x4e   : > { %4682 = vmatmul.msk.f32.gmra.mxu2 %vm519_vm1, %v473_v20  ;;  %4687 = vmatmul.msk.f32.gmra.mxu3 %vm519_vm1, %v473_v20 }
  0x51   : > { %2577 = vperm.xlu0 %5120, %v2563_v31   ;;  %2572 = vperm.xlu1 %5121, %v2562_v32  }
  0x52   : > { %1749 = vperm.xlu2 %5122, %v1735_v56   ;;  %v3267_v56 = vld [vmem:[%s7091_s7 + $0x18] sm:$0xff] }
  0x54   : > { %4673 = vmatmul.msk.f32.gmra.mxu0 %vm519_vm1, %v474_v23 }
  0x55   : > { %4678 = vmatmul.msk.f32.gmra.mxu1 %vm519_vm1, %v474_v23 }
  0x56   : > { %4683 = vmatmul.msk.f32.gmra.mxu2 %vm519_vm1, %v474_v23  ;;  %4688 = vmatmul.msk.f32.gmra.mxu3 %vm519_vm1, %v474_v23 }
  0x59   : > { %2675 = vperm.xlu0 %5120, %v2657_v33   ;;  %2670 = vperm.xlu1 %5121, %v2656_v34   ;;  %v5565_v34 = vld [vmem:[%s7087_s3] sm:$0xff] }
  0x5a   : > { %2582 = vperm.xlu2 %5122, %v2564_v62  }
  0x5c   : > { %4674 = vmatmul.msk.f32.gmra.mxu0 %vm519_vm1, %v475_v26 }
  0x5d   : > { %4679 = vmatmul.msk.f32.gmra.mxu1 %vm519_vm1, %v475_v26 }
  0x5e   : > { %4684 = vmatmul.msk.f32.gmra.mxu2 %vm519_vm1, %v475_v26  ;;  %4689 = vmatmul.msk.f32.gmra.mxu3 %vm519_vm1, %v475_v26 }
  0x61   : > { %2660 = vperm.xlu0 %5120, %v2654_v35   ;;  %2980 = vperm.xlu1 %5121, %v2962_v36  }
  0x62   : > { %2567 = vperm.xlu2 %5122, %v2561_v19  }
  0x69   : > { %2970 = vperm.xlu0 %5120, %v2960_v37   ;;  %2965 = vperm.xlu1 %5121, %v2959_v38  }
  0x71   : > { %3281 = vperm.xlu0 %5120, %v3266_v39   ;;  %3276 = vperm.xlu1 %5121, %v3265_v40  }
  0x79   : > { %4121 = vperm.xlu0 %5120, %v4113_v41   ;;  %4116 = vperm.xlu1 %5121, %v4112_v42   ;;  %v2655_v41 = vld [vmem:[%s7089_s5 + $0xc8] sm:$0xff] }
  0x7a   : > { %2665 = vperm.xlu2 %5122, %v2655_v41  }
  0x81   : > { %3291 = vperm.xlu0 %5120, %v3268_v43  }
  0x8b   : > { %v5527_v55 = vpop.permute.xlu0 %497  ;;  %v5532_v61 = vpop.permute.xlu1 %487 }
  0x93   : > { %v5537_v63 = vpop.permute.xlu0 %492  ;;  %v5545_v10 = vpop.permute.xlu1 %482 }
  0xa1   : > { %v566_v48 = vpop.f32.mrf.mxu0 }
  0xa2   : > { %v595_v49 = vpop.f32.mrf.mxu1  ;;  %v567_v13 = vadd.f32 %v566_v48, %v5545_v10  ;;  %v5583_v48 = vld [vmem:[%s7087_s3 + $0x8] sm:$0xff] }
  0xa3   : > { %v596_v14 = vadd.f32 %v595_v49, %v5545_v10  ;;  %v2961_v49 = vld [vmem:[%s7089_s5 + $0xf0] sm:$0xff] }
  0xa4   : > { %v781_v28 = vmax.f32 %v567_v13, 0.0  ;;  %2975 = vperm.xlu2 %5122, %v2961_v49   ;;  %v3264_v13 = vld [vmem:[%s7091_s7] sm:$0xff]  ;;  %v5693_v49 = vpop.permute.xlu0 %828 }
  0xa5   : > { %v782_v29 = vmax.f32 %v596_v14, 0.0 }
  0xa9   : > { %v624_v51 = vpop.f32.mrf.mxu2  ;;  %v653_v52 = vpop.f32.mrf.mxu3 }
  0xaa   : > { %v569_v53 = vpop.f32.mrf.mxu0  ;;  %v598_v54 = vpop.f32.mrf.mxu1  ;;  %v625_v35 = vadd.f32 %v624_v51, %v5545_v10  ;;  %v654_v36 = vadd.f32 %v653_v52, %v5545_v10 }
  0xab   : > { %v570_v2 = vadd.f32 %v569_v53, %v5532_v61  ;;  %v599_v3 = vadd.f32 %v598_v54, %v5532_v61  ;;  %v5599_v54 = vld [vmem:[%s7087_s3 + $0x10] sm:$0xff] }
  0xac   : > { %v783_v44 = vmax.f32 %v625_v35, 0.0  ;;  %v784_v45 = vmax.f32 %v654_v36, 0.0  ;;  %3286 = vperm.xlu2 %5122, %v3267_v56  }
  0xad   : > { %v789_v15 = vmax.f32 %v570_v2, 0.0  ;;  %v790_v16 = vmax.f32 %v599_v3, 0.0  ;;  %v5619_v3 = vld [vmem:[%s7087_s3 + $0x18] sm:$0xff] }
  0xb1   : > { %v627_v57 = vpop.f32.mrf.mxu2  ;;  %v656_v58 = vpop.f32.mrf.mxu3 }
  0xb2   : > { %v572_v59 = vpop.f32.mrf.mxu0  ;;  %v601_v60 = vpop.f32.mrf.mxu1  ;;  %v628_v30 = vadd.f32 %v627_v57, %v5532_v61  ;;  %v657_v31 = vadd.f32 %v656_v58, %v5532_v61 }
  0xb3   : > { %v573_v6 = vadd.f32 %v572_v59, %v5537_v63  ;;  %v602_v7 = vadd.f32 %v601_v60, %v5537_v63 }
  0xb4   : > { %v791_v39 = vmax.f32 %v628_v30, 0.0  ;;  %v792_v40 = vmax.f32 %v657_v31, 0.0  ;;  %3271 = vperm.xlu2 %5122, %v3264_v13  }
  0xb5   : > { %v797_v17 = vmax.f32 %v573_v6, 0.0  ;;  %v798_v18 = vmax.f32 %v602_v7, 0.0 }
  0xb9   : > { %v630_v0 = vpop.f32.mrf.mxu2  ;;  %v659_v1 = vpop.f32.mrf.mxu3 }
  0xba   : > { %v575_v4 = vpop.f32.mrf.mxu0  ;;  %v604_v5 = vpop.f32.mrf.mxu1  ;;  %v631_v22 = vadd.f32 %v630_v0, %v5537_v63  ;;  %v660_v23 = vadd.f32 %v659_v1, %v5537_v63 }
  0xbb   : > { %v576_v8 = vadd.f32 %v575_v4, %v5527_v55  ;;  %v605_v9 = vadd.f32 %v604_v5, %v5527_v55 }
  0xbc   : > { %v799_v37 = vmax.f32 %v631_v22, 0.0  ;;  %v800_v38 = vmax.f32 %v660_v23, 0.0 }
  0xbd   : > { %v805_v11 = vmax.f32 %v576_v8, 0.0  ;;  %v806_v12 = vmax.f32 %v605_v9, 0.0 }
  0xbf   : > { %866 = vmatpush.msra.mxu0 %v805_v11  ;;  %895 = vmatpush.msra.mxu1 %v806_v12 }
  0xc1   : > { %v633_v20 = vpop.f32.mrf.mxu2  ;;  %v662_v21 = vpop.f32.mrf.mxu3  ;;  %867 = vmatpush.msra.mxu0 %v797_v17  ;;  %896 = vmatpush.msra.mxu1 %v798_v18 }
  0xc2   : > { %v634_v24 = vadd.f32 %v633_v20, %v5527_v55  ;;  %v663_v25 = vadd.f32 %v662_v21, %v5527_v55  ;;  %v5556_v26 = vpop.f32.mrf.mxu0  ;;  %v5558_v27 = vpop.f32.mrf.mxu1 }
  0xc3   : > { %868 = vmatpush.msra.mxu0 %v789_v15  ;;  %897 = vmatpush.msra.mxu1 %v790_v16  ;;  %v683_v8 = vadd.f32 %v5556_v26, %v5545_v10  ;;  %v712_v9 = vadd.f32 %v5558_v27, %v5545_v10 }
  0xc4   : > { %v807_v32 = vmax.f32 %v634_v24, 0.0  ;;  %v808_v33 = vmax.f32 %v663_v25, 0.0 }
  0xc5   : > { %869 = vmatpush.msra.mxu0 %v781_v28  ;;  %898 = vmatpush.msra.mxu1 %v782_v29  ;;  %v785_v22 = vmax.f32 %v683_v8, 0.0  ;;  %v786_v23 = vmax.f32 %v712_v9, 0.0  ;;  %v5710_v8 = vld [vmem:[%s7087_s3 + $0x20] sm:$0xff] }
  0xc6   : > { %924 = vmatpush.msra.mxu2 %v807_v32  ;;  %953 = vmatpush.msra.mxu3 %v808_v33 }
  0xc7   : > { %4690 = vmatmul.msk.f32.vlgmr.msra.gmra.mxu0 %vm841_vm2, %v5565_v34  ;;  %4694 = vmatmul.msk.f32.vlgmr.msra.gmra.mxu1 %vm841_vm2, %v5565_v34 }
  0xc8   : > { %925 = vmatpush.msra.mxu2 %v799_v37  ;;  %954 = vmatpush.msra.mxu3 %v800_v38  ;;  %v5687_v37 = vpop.permute.xlu2 %838 }
  0xc9   : > { %v5576_v42 = vpop.f32.mrf.mxu2  ;;  %v5578_v43 = vpop.f32.mrf.mxu3 }
  0xca   : > { %926 = vmatpush.msra.mxu2 %v791_v39  ;;  %955 = vmatpush.msra.mxu3 %v792_v40  ;;  %v685_v46 = vpop.f32.mrf.mxu0  ;;  %v714_v47 = vpop.f32.mrf.mxu1 }
  0xcb   : > { %v686_v6 = vadd.f32 %v685_v46, %v5532_v61  ;;  %v715_v7 = vadd.f32 %v714_v47, %v5532_v61 }
  0xcc   : > { %927 = vmatpush.msra.mxu2 %v783_v44  ;;  %956 = vmatpush.msra.mxu3 %v784_v45 }
  0xcd   : > { %4698 = vmatmul.msk.f32.vlgmr.msra.gmra.mxu2 %vm841_vm2, %v5565_v34  ;;  %4702 = vmatmul.msk.f32.vlgmr.msra.gmra.mxu3 %vm841_vm2, %v5565_v34  ;;  %v793_v16 = vmax.f32 %v686_v6, 0.0  ;;  %v794_v17 = vmax.f32 %v715_v7, 0.0 }
  0xcf   : > { %4691 = vmatmul.msk.f32.gmra.mxu0 %vm841_vm2, %v5583_v48  ;;  %4695 = vmatmul.msk.f32.gmra.mxu1 %vm841_vm2, %v5583_v48 }
  0xd0   : > { %v5689_v44 = vpop.permute.xlu2 %833 }
  0xd1   : > { %v743_v50 = vpop.f32.mrf.mxu2  ;;  %v772_v51 = vpop.f32.mrf.mxu3 }
  0xd2   : > { %v688_v52 = vpop.f32.mrf.mxu0  ;;  %v717_v53 = vpop.f32.mrf.mxu1  ;;  %v744_v26 = vadd.f32 %v743_v50, %v5532_v61  ;;  %v773_v27 = vadd.f32 %v772_v51, %v5532_v61  ;;  %v4157_v61 = vld [vmem:[%s7096_s12] sm:$0x7] }
  0xd3   : > { %v689_v1 = vadd.f32 %v688_v52, %v5537_v63  ;;  %v718_v2 = vadd.f32 %v717_v53, %v5537_v63  ;;  %4160 = vperm.xlu2 %5122, %v4157_v61  }
  0xd4   : > { %v795_v30 = vmax.f32 %v744_v26, 0.0  ;;  %v796_v31 = vmax.f32 %v773_v27, 0.0  ;;  %v5727_v26 = vld [vmem:[%s7087_s3 + $0x28] sm:$0xff] }
  0xd5   : > { %4699 = vmatmul.msk.f32.gmra.mxu2 %vm841_vm2, %v5583_v48  ;;  %4703 = vmatmul.msk.f32.gmra.mxu3 %vm841_vm2, %v5583_v48  ;;  %v801_v11 = vmax.f32 %v689_v1, 0.0  ;;  %v802_v12 = vmax.f32 %v718_v2, 0.0 }
  0xd7   : > { %4692 = vmatmul.msk.f32.gmra.mxu0 %vm841_vm2, %v5599_v54  ;;  %4696 = vmatmul.msk.f32.gmra.mxu1 %vm841_vm2, %v5599_v54 }
  0xd9   : > { %v746_v57 = vpop.f32.mrf.mxu2  ;;  %v775_v58 = vpop.f32.mrf.mxu3 }
  0xda   : > { %v691_v59 = vpop.f32.mrf.mxu0  ;;  %v720_v60 = vpop.f32.mrf.mxu1  ;;  %v747_v20 = vadd.f32 %v746_v57, %v5537_v63  ;;  %v776_v21 = vadd.f32 %v775_v58, %v5537_v63  ;;  %v770_v63 = vadd.f32 %v5578_v43, %v5545_v10 }
  0xdb   : > { %v692_v62 = vadd.f32 %v691_v59, %v5527_v55  ;;  %v721_v0 = vadd.f32 %v720_v60, %v5527_v55 }
  0xdc   : > { %v803_v28 = vmax.f32 %v747_v20, 0.0  ;;  %v804_v29 = vmax.f32 %v776_v21, 0.0  ;;  %v788_v32 = vmax.f32 %v770_v63, 0.0 }
  0xdd   : > { %v809_v4 = vmax.f32 %v692_v62, 0.0  ;;  %v810_v5 = vmax.f32 %v721_v0, 0.0  ;;  %4700 = vmatmul.msk.f32.gmra.mxu2 %vm841_vm2, %v5599_v54  ;;  %4704 = vmatmul.msk.f32.gmra.mxu3 %vm841_vm2, %v5599_v54 }
  0xdf   : > { %4693 = vmatmul.msk.f32.gmra.mxu0 %vm841_vm2, %v5619_v3  ;;  %4697 = vmatmul.msk.f32.gmra.mxu1 %vm841_vm2, %v5619_v3 }
  0xe0   : > { %982 = vmatpush.msrb.mxu0 %v809_v4  ;;  %1011 = vmatpush.msrb.mxu1 %v810_v5 }
  0xe1   : > { %v749_v14 = vpop.f32.mrf.mxu2  ;;  %v778_v15 = vpop.f32.mrf.mxu3 }
  0xe2   : > { %v750_v18 = vadd.f32 %v749_v14, %v5527_v55  ;;  %v779_v19 = vadd.f32 %v778_v15, %v5527_v55  ;;  %983 = vmatpush.msrb.mxu0 %v801_v11  ;;  %1012 = vmatpush.msrb.mxu1 %v802_v12  ;;  %v741_v55 = vadd.f32 %v5576_v42, %v5545_v10 }
  0xe4   : > { %v811_v24 = vmax.f32 %v750_v18, 0.0  ;;  %v812_v25 = vmax.f32 %v779_v19, 0.0  ;;  %984 = vmatpush.msrb.mxu0 %v793_v16  ;;  %1013 = vmatpush.msrb.mxu1 %v794_v17  ;;  %v787_v10 = vmax.f32 %v741_v55, 0.0 }
  0xe5   : > { %4701 = vmatmul.msk.f32.gmra.mxu2 %vm841_vm2, %v5619_v3  ;;  %4705 = vmatmul.msk.f32.gmra.mxu3 %vm841_vm2, %v5619_v3 }
  0xe6   : > { %985 = vmatpush.msrb.mxu0 %v785_v22  ;;  %1014 = vmatpush.msrb.mxu1 %v786_v23 }
  0xe7   : > { %1040 = vmatpush.msrb.mxu2 %v811_v24  ;;  %1069 = vmatpush.msrb.mxu3 %v812_v25 }
  0xe8   : > { %4706 = vmatmul.msk.f32.vlgmr.msrb.gmra.mxu0 %vm841_vm2, %v5565_v34  ;;  %4710 = vmatmul.msk.f32.vlgmr.msrb.gmra.mxu1 %vm841_vm2, %v5565_v34 }
  0xe9   : > { %1041 = vmatpush.msrb.mxu2 %v803_v28  ;;  %1070 = vmatpush.msrb.mxu3 %v804_v29 }
  0xeb   : > { %1042 = vmatpush.msrb.mxu2 %v795_v30  ;;  %1071 = vmatpush.msrb.mxu3 %v796_v31 }
  0xed   : > { %1043 = vmatpush.msrb.mxu2 %v787_v10  ;;  %1072 = vmatpush.msrb.mxu3 %v788_v32  ;;  %v5744_v10 = vld [vmem:[%s7087_s3 + $0x30] sm:$0xff] }
  0xee   : > { %4714 = vmatmul.msk.f32.vlgmr.msrb.gmra.mxu2 %vm841_vm2, %v5565_v34  ;;  %4718 = vmatmul.msk.f32.vlgmr.msrb.gmra.mxu3 %vm841_vm2, %v5565_v34 }
  0xf0   : > { %4707 = vmatmul.msk.f32.gmra.mxu0 %vm841_vm2, %v5583_v48  ;;  %4711 = vmatmul.msk.f32.gmra.mxu1 %vm841_vm2, %v5583_v48 }
  0xf6   : > { %4715 = vmatmul.msk.f32.gmra.mxu2 %vm841_vm2, %v5583_v48  ;;  %4719 = vmatmul.msk.f32.gmra.mxu3 %vm841_vm2, %v5583_v48 }
  0xf8   : > { %4708 = vmatmul.msk.f32.gmra.mxu0 %vm841_vm2, %v5599_v54  ;;  %4712 = vmatmul.msk.f32.gmra.mxu1 %vm841_vm2, %v5599_v54 }
  0xfe   : > { %4716 = vmatmul.msk.f32.gmra.mxu2 %vm841_vm2, %v5599_v54  ;;  %4720 = vmatmul.msk.f32.gmra.mxu3 %vm841_vm2, %v5599_v54  ;;  %v5699_v54 = vpop.permute.xlu1 %823 }
 0x100   : > { %4709 = vmatmul.msk.f32.gmra.mxu0 %vm841_vm2, %v5619_v3  ;;  %4713 = vmatmul.msk.f32.gmra.mxu1 %vm841_vm2, %v5619_v3 }
 0x106   : > { %4717 = vmatmul.msk.f32.gmra.mxu2 %vm841_vm2, %v5619_v3  ;;  %4721 = vmatmul.msk.f32.gmra.mxu3 %vm841_vm2, %v5619_v3 }
 0x144   : > { %v871_v33 = vpop.f32.mrf.mxu0  ;;  %v900_v34 = vpop.f32.mrf.mxu1 }
 0x145   : > { %v872_v0 = vadd.f32 %v871_v33, %v5699_v54  ;;  %v901_v1 = vadd.f32 %v900_v34, %v5699_v54 }
 0x147   : > { %v1086_v4 = vmax.f32 %v872_v0, 0.0  ;;  %v1087_v5 = vmax.f32 %v901_v1, 0.0 }
 0x14c   : > { %v874_v35 = vpop.f32.mrf.mxu0  ;;  %v903_v36 = vpop.f32.mrf.mxu1 }
 0x14d   : > { %v875_v52 = vadd.f32 %v874_v35, %v5693_v49  ;;  %v904_v53 = vadd.f32 %v903_v36, %v5693_v49  ;;  %v5757_v36 = vld [vmem:[%s7087_s3 + $0x38] sm:$0xff] }
 0x14f   : > { %v1094_v2 = vmax.f32 %v875_v52, 0.0  ;;  %v1095_v3 = vmax.f32 %v904_v53, 0.0 }
 0x150   : > { %v929_v38 = vpop.f32.mrf.mxu2  ;;  %v958_v39 = vpop.f32.mrf.mxu3 }
 0x151   : > { %v930_v20 = vadd.f32 %v929_v38, %v5699_v54  ;;  %v959_v21 = vadd.f32 %v958_v39, %v5699_v54 }
 0x153   : > { %v1088_v63 = vmax.f32 %v930_v20, 0.0  ;;  %v1089_v28 = vmax.f32 %v959_v21, 0.0 }
 0x154   : > { %v877_v40 = vpop.f32.mrf.mxu0  ;;  %v906_v41 = vpop.f32.mrf.mxu1 }
 0x155   : > { %v878_v45 = vadd.f32 %v877_v40, %v5689_v44  ;;  %v907_v46 = vadd.f32 %v906_v41, %v5689_v44 }
 0x157   : > { %v1102_v56 = vmax.f32 %v878_v45, 0.0  ;;  %v1103_v57 = vmax.f32 %v907_v46, 0.0 }
 0x158   : > { %v932_v42 = vpop.f32.mrf.mxu2  ;;  %v961_v43 = vpop.f32.mrf.mxu3 }
 0x159   : > { %v933_v16 = vadd.f32 %v932_v42, %v5693_v49  ;;  %v962_v17 = vadd.f32 %v961_v43, %v5693_v49 }
 0x15b   : > { %v1096_v27 = vmax.f32 %v933_v16, 0.0  ;;  %v1097_v55 = vmax.f32 %v962_v17, 0.0 }
 0x15c   : > { %v880_v47 = vpop.f32.mrf.mxu0  ;;  %v909_v48 = vpop.f32.mrf.mxu1 }
 0x15d   : > { %v881_v50 = vadd.f32 %v880_v47, %v5687_v37  ;;  %v910_v51 = vadd.f32 %v909_v48, %v5687_v37 }
 0x15f   : > { %v1110_v58 = vmax.f32 %v881_v50, 0.0  ;;  %v1111_v59 = vmax.f32 %v910_v51, 0.0 }
 0x160   : > { %v935_v60 = vpop.f32.mrf.mxu2  ;;  %v964_v62 = vpop.f32.mrf.mxu3 }
 0x161   : > { %1171 = vmatpush.msra.mxu0 %v1110_v58  ;;  %1200 = vmatpush.msra.mxu1 %v1111_v59  ;;  %v936_v12 = vadd.f32 %v935_v60, %v5689_v44  ;;  %v965_v13 = vadd.f32 %v964_v62, %v5689_v44 }
 0x163   : > { %1172 = vmatpush.msra.mxu0 %v1102_v56  ;;  %1201 = vmatpush.msra.mxu1 %v1103_v57  ;;  %v1104_v22 = vmax.f32 %v936_v12, 0.0  ;;  %v1105_v23 = vmax.f32 %v965_v13, 0.0 }
 0x165   : > { %v5703_v6 = vpop.f32.mrf.mxu0  ;;  %v5705_v7 = vpop.f32.mrf.mxu1  ;;  %1173 = vmatpush.msra.mxu0 %v1094_v2  ;;  %1202 = vmatpush.msra.mxu1 %v1095_v3 }
 0x166   : > { %v988_v50 = vadd.f32 %v5703_v6, %v5699_v54  ;;  %v1017_v51 = vadd.f32 %v5705_v7, %v5699_v54 }
 0x167   : > { %1174 = vmatpush.msra.mxu0 %v1086_v4  ;;  %1203 = vmatpush.msra.mxu1 %v1087_v5 }
 0x168   : > { %v938_v9 = vpop.f32.mrf.mxu2  ;;  %v967_v11 = vpop.f32.mrf.mxu3  ;;  %4726 = vmatmul.msk.f32.vlgmr.msra.gmra.mxu0 %vm841_vm2, %v5710_v8  ;;  %4730 = vmatmul.msk.f32.vlgmr.msra.gmra.mxu1 %vm841_vm2, %v5710_v8  ;;  %v1090_v58 = vmax.f32 %v988_v50, 0.0  ;;  %v1091_v59 = vmax.f32 %v1017_v51, 0.0  ;;  %v5855_v51 = vld [vmem:[%s7087_s3 + $0x48] sm:$0xff] }
 0x169   : > { %v939_v14 = vadd.f32 %v938_v9, %v5687_v37  ;;  %v968_v15 = vadd.f32 %v967_v11, %v5687_v37 }
 0x16b   : > { %v1112_v18 = vmax.f32 %v939_v14, 0.0  ;;  %v1113_v19 = vmax.f32 %v968_v15, 0.0 }
 0x16d   : > { %v990_v24 = vpop.f32.mrf.mxu0  ;;  %v1019_v25 = vpop.f32.mrf.mxu1  ;;  %1229 = vmatpush.msra.mxu2 %v1112_v18  ;;  %1258 = vmatpush.msra.mxu3 %v1113_v19 }
 0x16e   : > { %v991_v42 = vadd.f32 %v990_v24, %v5693_v49  ;;  %v1020_v43 = vadd.f32 %v1019_v25, %v5693_v49  ;;  %v5823_v19 = vpop.permute.xlu2 %1144  ;;  %v5827_v25 = vpop.permute.xlu1 %1134 }
 0x16f   : > { %1230 = vmatpush.msra.mxu2 %v1104_v22  ;;  %1259 = vmatpush.msra.mxu3 %v1105_v23  ;;  %v5825_v22 = vpop.permute.xlu0 %1139 }
 0x170   : > { %4727 = vmatmul.msk.f32.gmra.mxu0 %vm841_vm2, %v5727_v26  ;;  %4731 = vmatmul.msk.f32.gmra.mxu1 %vm841_vm2, %v5727_v26  ;;  %v1098_v56 = vmax.f32 %v991_v42, 0.0  ;;  %v1099_v57 = vmax.f32 %v1020_v43, 0.0 }
 0x171   : > { %v5733_v29 = vpop.f32.mrf.mxu2  ;;  %v5735_v61 = vpop.f32.mrf.mxu3  ;;  %1231 = vmatpush.msra.mxu2 %v1096_v27  ;;  %1260 = vmatpush.msra.mxu3 %v1097_v55 }
 0x172   : > { %v1046_v9 = vadd.f32 %v5733_v29, %v5699_v54 }
 0x173   : > { %1232 = vmatpush.msra.mxu2 %v1088_v63  ;;  %1261 = vmatpush.msra.mxu3 %v1089_v28 }
 0x174   : > { %4734 = vmatmul.msk.f32.vlgmr.msra.gmra.mxu2 %vm841_vm2, %v5710_v8  ;;  %4738 = vmatmul.msk.f32.vlgmr.msra.gmra.mxu3 %vm841_vm2, %v5710_v8  ;;  %v1092_v13 = vmax.f32 %v1046_v9, 0.0 }
 0x175   : > { %v993_v30 = vpop.f32.mrf.mxu0  ;;  %v1022_v31 = vpop.f32.mrf.mxu1 }
 0x176   : > { %v994_v38 = vadd.f32 %v993_v30, %v5689_v44  ;;  %v1023_v39 = vadd.f32 %v1022_v31, %v5689_v44 }
 0x178   : > { %4728 = vmatmul.msk.f32.gmra.mxu0 %vm841_vm2, %v5744_v10  ;;  %4732 = vmatmul.msk.f32.gmra.mxu1 %vm841_vm2, %v5744_v10  ;;  %v1106_v52 = vmax.f32 %v994_v38, 0.0  ;;  %v1107_v53 = vmax.f32 %v1023_v39, 0.0 }
 0x179   : > { %v1048_v32 = vpop.f32.mrf.mxu2  ;;  %v1077_v33 = vpop.f32.mrf.mxu3 }
 0x17a   : > { %v1049_v4 = vadd.f32 %v1048_v32, %v5693_v49  ;;  %v1078_v5 = vadd.f32 %v1077_v33, %v5693_v49  ;;  %v5835_v32 = vpop.permute.xlu2 %1129 }
 0x17c   : > { %4735 = vmatmul.msk.f32.gmra.mxu2 %vm841_vm2, %v5727_v26  ;;  %4739 = vmatmul.msk.f32.gmra.mxu3 %vm841_vm2, %v5727_v26  ;;  %v1100_v12 = vmax.f32 %v1049_v4, 0.0  ;;  %v1101_v49 = vmax.f32 %v1078_v5, 0.0 }
 0x17d   : > { %v996_v34 = vpop.f32.mrf.mxu0  ;;  %v1025_v35 = vpop.f32.mrf.mxu1 }
 0x17e   : > { %v997_v40 = vadd.f32 %v996_v34, %v5687_v37  ;;  %v1026_v41 = vadd.f32 %v1025_v35, %v5687_v37 }
 0x180   : > { %v1114_v45 = vmax.f32 %v997_v40, 0.0  ;;  %v1115_v46 = vmax.f32 %v1026_v41, 0.0  ;;  %4729 = vmatmul.msk.f32.gmra.mxu0 %vm841_vm2, %v5757_v36  ;;  %4733 = vmatmul.msk.f32.gmra.mxu1 %vm841_vm2, %v5757_v36 }
 0x181   : > { %v1051_v47 = vpop.f32.mrf.mxu2  ;;  %v1080_v48 = vpop.f32.mrf.mxu3 }
 0x182   : > { %1287 = vmatpush.msrb.mxu0 %v1114_v45  ;;  %1316 = vmatpush.msrb.mxu1 %v1115_v46  ;;  %v1052_v0 = vadd.f32 %v1051_v47, %v5689_v44  ;;  %v1081_v1 = vadd.f32 %v1080_v48, %v5689_v44  ;;  %v1075_v44 = vadd.f32 %v5735_v61, %v5699_v54  ;;  %v5846_v45 = vld [vmem:[%s7087_s3 + $0x40] sm:$0xff] }
 0x184   : > { %1288 = vmatpush.msrb.mxu0 %v1106_v52  ;;  %1317 = vmatpush.msrb.mxu1 %v1107_v53  ;;  %v1108_v11 = vmax.f32 %v1052_v0, 0.0  ;;  %v1093_v14 = vmax.f32 %v1075_v44, 0.0 }
 0x185   : > { %4736 = vmatmul.msk.f32.gmra.mxu2 %vm841_vm2, %v5744_v10  ;;  %4740 = vmatmul.msk.f32.gmra.mxu3 %vm841_vm2, %v5744_v10 }
 0x186   : > { %1289 = vmatpush.msrb.mxu0 %v1098_v56  ;;  %1318 = vmatpush.msrb.mxu1 %v1099_v57 }
 0x188   : > { %1290 = vmatpush.msrb.mxu0 %v1090_v58  ;;  %1319 = vmatpush.msrb.mxu1 %v1091_v59 }
 0x189   : > { %v1054_v60 = vpop.f32.mrf.mxu2  ;;  %v1083_v62 = vpop.f32.mrf.mxu3  ;;  %4742 = vmatmul.msk.f32.vlgmr.msrb.gmra.mxu0 %vm841_vm2, %v5710_v8  ;;  %4746 = vmatmul.msk.f32.vlgmr.msrb.gmra.mxu1 %vm841_vm2, %v5710_v8 }
 0x18a   : > { %v1055_v2 = vadd.f32 %v1054_v60, %v5687_v37  ;;  %v1084_v3 = vadd.f32 %v1083_v62, %v5687_v37  ;;  %v1109_v37 = vmax.f32 %v1081_v1, 0.0 }
 0x18c   : > { %v1116_v6 = vmax.f32 %v1055_v2, 0.0  ;;  %v1117_v7 = vmax.f32 %v1084_v3, 0.0 }
 0x18d   : > { %4737 = vmatmul.msk.f32.gmra.mxu2 %vm841_vm2, %v5757_v36  ;;  %4741 = vmatmul.msk.f32.gmra.mxu3 %vm841_vm2, %v5757_v36 }
 0x18e   : > { %1345 = vmatpush.msrb.mxu2 %v1116_v6  ;;  %1374 = vmatpush.msrb.mxu3 %v1117_v7 }
 0x190   : > { %1346 = vmatpush.msrb.mxu2 %v1108_v11  ;;  %1375 = vmatpush.msrb.mxu3 %v1109_v37  ;;  %v5872_v11 = vld [vmem:[%s7087_s3 + $0x50] sm:$0xff] }
 0x191   : > { %4743 = vmatmul.msk.f32.gmra.mxu0 %vm841_vm2, %v5727_v26  ;;  %4747 = vmatmul.msk.f32.gmra.mxu1 %vm841_vm2, %v5727_v26 }
 0x192   : > { %1347 = vmatpush.msrb.mxu2 %v1100_v12  ;;  %1376 = vmatpush.msrb.mxu3 %v1101_v49 }
 0x194   : > { %1348 = vmatpush.msrb.mxu2 %v1092_v13  ;;  %1377 = vmatpush.msrb.mxu3 %v1093_v14 }
 0x195   : > { %4750 = vmatmul.msk.f32.vlgmr.msrb.gmra.mxu2 %vm841_vm2, %v5710_v8  ;;  %4754 = vmatmul.msk.f32.vlgmr.msrb.gmra.mxu3 %vm841_vm2, %v5710_v8 }
 0x199   : > { %4744 = vmatmul.msk.f32.gmra.mxu0 %vm841_vm2, %v5744_v10  ;;  %4748 = vmatmul.msk.f32.gmra.mxu1 %vm841_vm2, %v5744_v10 }
 0x19d   : > { %4751 = vmatmul.msk.f32.gmra.mxu2 %vm841_vm2, %v5727_v26  ;;  %4755 = vmatmul.msk.f32.gmra.mxu3 %vm841_vm2, %v5727_v26 }
 0x1a1   : > { %4745 = vmatmul.msk.f32.gmra.mxu0 %vm841_vm2, %v5757_v36  ;;  %4749 = vmatmul.msk.f32.gmra.mxu1 %vm841_vm2, %v5757_v36 }
 0x1a5   : > { %4752 = vmatmul.msk.f32.gmra.mxu2 %vm841_vm2, %v5744_v10  ;;  %4756 = vmatmul.msk.f32.gmra.mxu3 %vm841_vm2, %v5744_v10 }
 0x1ad   : > { %4753 = vmatmul.msk.f32.gmra.mxu2 %vm841_vm2, %v5757_v36  ;;  %4757 = vmatmul.msk.f32.gmra.mxu3 %vm841_vm2, %v5757_v36 }
 0x1e5   : > { %v1176_v54 = vpop.f32.mrf.mxu0  ;;  %v1205_v8 = vpop.f32.mrf.mxu1 }
 0x1e6   : > { %v1177_v33 = vadd.f32 %v1176_v54, %v5835_v32  ;;  %v1206_v34 = vadd.f32 %v1205_v8, %v5835_v32 }
 0x1e8   : > { %v1391_v40 = vmax.f32 %v1177_v33, 0.0  ;;  %v1392_v41 = vmax.f32 %v1206_v34, 0.0 }
 0x1ed   : > { %v1179_v15 = vpop.f32.mrf.mxu0  ;;  %v1208_v16 = vpop.f32.mrf.mxu1 }
 0x1ee   : > { %v1180_v61 = vadd.f32 %v1179_v15, %v5827_v25  ;;  %v1209_v30 = vadd.f32 %v1208_v16, %v5827_v25 }
 0x1f0   : > { %v1399_v38 = vmax.f32 %v1180_v61, 0.0  ;;  %v1400_v39 = vmax.f32 %v1209_v30, 0.0 }
 0x1f5   : > { %v1182_v17 = vpop.f32.mrf.mxu0  ;;  %v1211_v18 = vpop.f32.mrf.mxu1 }
 0x1f6   : > { %v1183_v26 = vadd.f32 %v1182_v17, %v5825_v22  ;;  %v1212_v27 = vadd.f32 %v1211_v18, %v5825_v22  ;;  %v5893_v18 = vld [vmem:[%s7087_s3 + $0x58] sm:$0xff] }
 0x1f7   : > { %v1234_v20 = vpop.f32.mrf.mxu2  ;;  %v1263_v21 = vpop.f32.mrf.mxu3 }
 0x1f8   : > { %v1407_v35 = vmax.f32 %v1183_v26, 0.0  ;;  %v1408_v36 = vmax.f32 %v1212_v27, 0.0  ;;  %v1235_v2 = vadd.f32 %v1234_v20, %v5835_v32  ;;  %v1264_v3 = vadd.f32 %v1263_v21, %v5835_v32 }
 0x1fa   : > { %v1393_v49 = vmax.f32 %v1235_v2, 0.0  ;;  %v1394_v13 = vmax.f32 %v1264_v3, 0.0 }
 0x1fd   : > { %v1185_v23 = vpop.f32.mrf.mxu0  ;;  %v1214_v24 = vpop.f32.mrf.mxu1 }
 0x1fe   : > { %v1186_v55 = vadd.f32 %v1185_v23, %v5823_v19  ;;  %v1215_v63 = vadd.f32 %v1214_v24, %v5823_v19 }
 0x1ff   : > { %v1237_v28 = vpop.f32.mrf.mxu2  ;;  %v1266_v29 = vpop.f32.mrf.mxu3 }
 0x200   : > { %v1415_v31 = vmax.f32 %v1186_v55, 0.0  ;;  %v1416_v10 = vmax.f32 %v1215_v63, 0.0  ;;  %v1238_v60 = vadd.f32 %v1237_v28, %v5827_v25  ;;  %v1267_v62 = vadd.f32 %v1266_v29, %v5827_v25 }
 0x202   : > { %1476 = vmatpush.msra.mxu0 %v1415_v31  ;;  %1505 = vmatpush.msra.mxu1 %v1416_v10  ;;  %v1401_v9 = vmax.f32 %v1238_v60, 0.0  ;;  %v1402_v44 = vmax.f32 %v1267_v62, 0.0  ;;  %v5959_v62 = vpop.permute.xlu0 %1449 }
 0x204   : > { %1477 = vmatpush.msra.mxu0 %v1407_v35  ;;  %1506 = vmatpush.msra.mxu1 %v1408_v36 }
 0x206   : > { %v5839_v42 = vpop.f32.mrf.mxu0  ;;  %v5841_v43 = vpop.f32.mrf.mxu1  ;;  %1478 = vmatpush.msra.mxu0 %v1399_v38  ;;  %1507 = vmatpush.msra.mxu1 %v1400_v39 }
 0x207   : > { %v1293_v55 = vadd.f32 %v5839_v42, %v5835_v32  ;;  %v1322_v63 = vadd.f32 %v5841_v43, %v5835_v32 }
 0x208   : > { %v1240_v46 = vpop.f32.mrf.mxu2  ;;  %v1269_v47 = vpop.f32.mrf.mxu3  ;;  %1479 = vmatpush.msra.mxu0 %v1391_v40  ;;  %1508 = vmatpush.msra.mxu1 %v1392_v41 }
 0x209   : > { %4762 = vmatmul.msk.f32.vlgmr.msra.gmra.mxu0 %vm841_vm2, %v5846_v45  ;;  %4766 = vmatmul.msk.f32.vlgmr.msra.gmra.mxu1 %vm841_vm2, %v5846_v45  ;;  %v1241_v52 = vadd.f32 %v1240_v46, %v5825_v22  ;;  %v1270_v57 = vadd.f32 %v1269_v47, %v5825_v22  ;;  %v1395_v31 = vmax.f32 %v1293_v55, 0.0  ;;  %v1396_v10 = vmax.f32 %v1322_v63, 0.0 }
 0x20b   : > { %v1409_v4 = vmax.f32 %v1241_v52, 0.0  ;;  %v1410_v5 = vmax.f32 %v1270_v57, 0.0 }
 0x20e   : > { %v1295_v48 = vpop.f32.mrf.mxu0  ;;  %v1324_v50 = vpop.f32.mrf.mxu1 }
 0x20f   : > { %v1296_v23 = vadd.f32 %v1295_v48, %v5827_v25  ;;  %v1325_v24 = vadd.f32 %v1324_v50, %v5827_v25 }
 0x210   : > { %v1243_v53 = vpop.f32.mrf.mxu2  ;;  %v1272_v56 = vpop.f32.mrf.mxu3 }
 0x211   : > { %v1244_v58 = vadd.f32 %v1243_v53, %v5823_v19  ;;  %v1273_v59 = vadd.f32 %v1272_v56, %v5823_v19  ;;  %4763 = vmatmul.msk.f32.gmra.mxu0 %vm841_vm2, %v5855_v51  ;;  %4767 = vmatmul.msk.f32.gmra.mxu1 %vm841_vm2, %v5855_v51  ;;  %v1403_v61 = vmax.f32 %v1296_v23, 0.0  ;;  %v1404_v30 = vmax.f32 %v1325_v24, 0.0 }
 0x213   : > { %v1417_v0 = vmax.f32 %v1244_v58, 0.0  ;;  %v1418_v1 = vmax.f32 %v1273_v59, 0.0 }
 0x215   : > { %1534 = vmatpush.msra.mxu2 %v1417_v0  ;;  %1563 = vmatpush.msra.mxu3 %v1418_v1 }
 0x216   : > { %v1298_v6 = vpop.f32.mrf.mxu0  ;;  %v1327_v7 = vpop.f32.mrf.mxu1 }
 0x217   : > { %1535 = vmatpush.msra.mxu2 %v1409_v4  ;;  %1564 = vmatpush.msra.mxu3 %v1410_v5  ;;  %v1299_v8 = vadd.f32 %v1298_v6, %v5825_v22  ;;  %v1328_v15 = vadd.f32 %v1327_v7, %v5825_v22 }
 0x218   : > { %v5874_v37 = vpop.f32.mrf.mxu2  ;;  %v5876_v12 = vpop.f32.mrf.mxu3 }
 0x219   : > { %1536 = vmatpush.msra.mxu2 %v1401_v9  ;;  %1565 = vmatpush.msra.mxu3 %v1402_v44  ;;  %v1411_v28 = vmax.f32 %v1299_v8, 0.0  ;;  %v1412_v29 = vmax.f32 %v1328_v15, 0.0  ;;  %v5967_v9 = vpop.permute.xlu2 %1439 }
 0x21a   : > { %4764 = vmatmul.msk.f32.gmra.mxu0 %vm841_vm2, %v5872_v11  ;;  %4768 = vmatmul.msk.f32.gmra.mxu1 %vm841_vm2, %v5872_v11 }
 0x21b   : > { %1537 = vmatpush.msra.mxu2 %v1393_v49  ;;  %1566 = vmatpush.msra.mxu3 %v1394_v13  ;;  %v5971_v49 = vpop.permute.xlu0 %1434 }
 0x21c   : > { %4770 = vmatmul.msk.f32.vlgmr.msra.gmra.mxu2 %vm841_vm2, %v5846_v45  ;;  %4774 = vmatmul.msk.f32.vlgmr.msra.gmra.mxu3 %vm841_vm2, %v5846_v45 }
 0x21e   : > { %v1301_v14 = vpop.f32.mrf.mxu0  ;;  %v1330_v54 = vpop.f32.mrf.mxu1 }
 0x21f   : > { %v1302_v16 = vadd.f32 %v1301_v14, %v5823_v19  ;;  %v1331_v17 = vadd.f32 %v1330_v54, %v5823_v19 }
 0x220   : > { %v1353_v20 = vpop.f32.mrf.mxu2  ;;  %v1382_v21 = vpop.f32.mrf.mxu3 }
 0x221   : > { %v1419_v26 = vmax.f32 %v1302_v16, 0.0  ;;  %v1420_v27 = vmax.f32 %v1331_v17, 0.0  ;;  %v1354_v42 = vadd.f32 %v1353_v20, %v5827_v25  ;;  %v1383_v43 = vadd.f32 %v1382_v21, %v5827_v25 }
 0x222   : > { %4765 = vmatmul.msk.f32.gmra.mxu0 %vm841_vm2, %v5893_v18  ;;  %4769 = vmatmul.msk.f32.gmra.mxu1 %vm841_vm2, %v5893_v18 }
 0x223   : > { %1592 = vmatpush.msrb.mxu0 %v1419_v26  ;;  %1621 = vmatpush.msrb.mxu1 %v1420_v27  ;;  %v1405_v52 = vmax.f32 %v1354_v42, 0.0  ;;  %v1406_v25 = vmax.f32 %v1383_v43, 0.0  ;;  %v5982_v26 = vld [vmem:[%s7087_s3 + $0x60] sm:$0xff] }
 0x224   : > { %4771 = vmatmul.msk.f32.gmra.mxu2 %vm841_vm2, %v5855_v51  ;;  %4775 = vmatmul.msk.f32.gmra.mxu3 %vm841_vm2, %v5855_v51 }
 0x225   : > { %1593 = vmatpush.msrb.mxu0 %v1411_v28  ;;  %1622 = vmatpush.msrb.mxu1 %v1412_v29  ;;  %v5991_v29 = vld [vmem:[%s7087_s3 + $0x68] sm:$0xff] }
 0x227   : > { %1594 = vmatpush.msrb.mxu0 %v1403_v61  ;;  %1623 = vmatpush.msrb.mxu1 %v1404_v30 }
 0x228   : > { %v1356_v33 = vpop.f32.mrf.mxu2  ;;  %v1385_v34 = vpop.f32.mrf.mxu3 }
 0x229   : > { %1595 = vmatpush.msrb.mxu0 %v1395_v31  ;;  %1624 = vmatpush.msrb.mxu1 %v1396_v10  ;;  %v1357_v38 = vadd.f32 %v1356_v33, %v5825_v22  ;;  %v1386_v39 = vadd.f32 %v1385_v34, %v5825_v22  ;;  %v1380_v22 = vadd.f32 %v5876_v12, %v5835_v32  ;;  %v6000_v33 = vld [vmem:[%s7087_s3 + $0x70] sm:$0xff] }
 0x22a   : > { %4778 = vmatmul.msk.f32.vlgmr.msrb.gmra.mxu0 %vm841_vm2, %v5846_v45  ;;  %4782 = vmatmul.msk.f32.vlgmr.msrb.gmra.mxu1 %vm841_vm2, %v5846_v45 }
 0x22b   : > { %v1413_v48 = vmax.f32 %v1357_v38, 0.0  ;;  %v1414_v50 = vmax.f32 %v1386_v39, 0.0  ;;  %v1398_v56 = vmax.f32 %v1380_v22, 0.0 }
 0x22c   : > { %4772 = vmatmul.msk.f32.gmra.mxu2 %vm841_vm2, %v5872_v11  ;;  %4776 = vmatmul.msk.f32.gmra.mxu3 %vm841_vm2, %v5872_v11 }
 0x230   : > { %v1359_v35 = vpop.f32.mrf.mxu2  ;;  %v1388_v36 = vpop.f32.mrf.mxu3 }
 0x231   : > { %v1360_v40 = vadd.f32 %v1359_v35, %v5823_v19  ;;  %v1389_v41 = vadd.f32 %v1388_v36, %v5823_v19  ;;  %v1351_v19 = vadd.f32 %v5874_v37, %v5835_v32 }
 0x232   : > { %4779 = vmatmul.msk.f32.gmra.mxu0 %vm841_vm2, %v5855_v51  ;;  %4783 = vmatmul.msk.f32.gmra.mxu1 %vm841_vm2, %v5855_v51 }
 0x233   : > { %v1421_v46 = vmax.f32 %v1360_v40, 0.0  ;;  %v1422_v47 = vmax.f32 %v1389_v41, 0.0  ;;  %v1397_v53 = vmax.f32 %v1351_v19, 0.0 }
 0x234   : > { %4773 = vmatmul.msk.f32.gmra.mxu2 %vm841_vm2, %v5893_v18  ;;  %4777 = vmatmul.msk.f32.gmra.mxu3 %vm841_vm2, %v5893_v18 }
 0x235   : > { %1650 = vmatpush.msrb.mxu2 %v1421_v46  ;;  %1679 = vmatpush.msrb.mxu3 %v1422_v47 }
 0x237   : > { %1651 = vmatpush.msrb.mxu2 %v1413_v48  ;;  %1680 = vmatpush.msrb.mxu3 %v1414_v50 }
 0x239   : > { %1652 = vmatpush.msrb.mxu2 %v1405_v52  ;;  %1681 = vmatpush.msrb.mxu3 %v1406_v25 }
 0x23a   : > { %4780 = vmatmul.msk.f32.gmra.mxu0 %vm841_vm2, %v5872_v11  ;;  %4784 = vmatmul.msk.f32.gmra.mxu1 %vm841_vm2, %v5872_v11 }
 0x23b   : > { %1653 = vmatpush.msrb.mxu2 %v1397_v53  ;;  %1682 = vmatpush.msrb.mxu3 %v1398_v56 }
 0x23c   : > { %4786 = vmatmul.msk.f32.vlgmr.msrb.gmra.mxu2 %vm841_vm2, %v5846_v45  ;;  %4790 = vmatmul.msk.f32.vlgmr.msrb.gmra.mxu3 %vm841_vm2, %v5846_v45 }
 0x242   : > { %4781 = vmatmul.msk.f32.gmra.mxu0 %vm841_vm2, %v5893_v18  ;;  %4785 = vmatmul.msk.f32.gmra.mxu1 %vm841_vm2, %v5893_v18 }
 0x244   : > { %4787 = vmatmul.msk.f32.gmra.mxu2 %vm841_vm2, %v5855_v51  ;;  %4791 = vmatmul.msk.f32.gmra.mxu3 %vm841_vm2, %v5855_v51  ;;  %v5961_v51 = vpop.permute.xlu1 %1444 }
 0x24c   : > { %4788 = vmatmul.msk.f32.gmra.mxu2 %vm841_vm2, %v5872_v11  ;;  %4792 = vmatmul.msk.f32.gmra.mxu3 %vm841_vm2, %v5872_v11 }
 0x254   : > { %4789 = vmatmul.msk.f32.gmra.mxu2 %vm841_vm2, %v5893_v18  ;;  %4793 = vmatmul.msk.f32.gmra.mxu3 %vm841_vm2, %v5893_v18 }
 0x286   : > { %v1481_v32 = vpop.f32.mrf.mxu0  ;;  %v1510_v45 = vpop.f32.mrf.mxu1 }
 0x287   : > { %v1482_v13 = vadd.f32 %v1481_v32, %v5971_v49  ;;  %v1511_v14 = vadd.f32 %v1510_v45, %v5971_v49 }
 0x289   : > { %v1696_v20 = vmax.f32 %v1482_v13, 0.0  ;;  %v1697_v21 = vmax.f32 %v1511_v14, 0.0 }
 0x28e   : > { %v1484_v57 = vpop.f32.mrf.mxu0  ;;  %v1513_v58 = vpop.f32.mrf.mxu1 }
 0x28f   : > { %v1485_v44 = vadd.f32 %v1484_v57, %v5967_v9  ;;  %v1514_v11 = vadd.f32 %v1513_v58, %v5967_v9  ;;  %v6023_v58 = vld [vmem:[%s7087_s3 + $0x78] sm:$0xff] }
 0x291   : > { %v1704_v15 = vmax.f32 %v1485_v44, 0.0  ;;  %v1705_v16 = vmax.f32 %v1514_v11, 0.0 }
 0x297   : > { %v1487_v59 = vpop.f32.mrf.mxu0  ;;  %v1516_v60 = vpop.f32.mrf.mxu1 }
 0x298   : > { %v1488_v2 = vadd.f32 %v1487_v59, %v5961_v51  ;;  %v1517_v3 = vadd.f32 %v1516_v60, %v5961_v51 }
 0x29a   : > { %v1712_v54 = vmax.f32 %v1488_v2, 0.0  ;;  %v1713_v8 = vmax.f32 %v1517_v3, 0.0 }
 0x29f   : > { %v1490_v0 = vpop.f32.mrf.mxu0  ;;  %v1519_v1 = vpop.f32.mrf.mxu1 }
 0x2a0   : > { %v1491_v4 = vadd.f32 %v1490_v0, %v5959_v62  ;;  %v1520_v5 = vadd.f32 %v1519_v1, %v5959_v62  ;;  %v1539_v6 = vpop.f32.mrf.mxu2  ;;  %v1568_v7 = vpop.f32.mrf.mxu3 }
 0x2a1   : > { %v1540_v43 = vadd.f32 %v1539_v6, %v5971_v49  ;;  %v1569_v46 = vadd.f32 %v1568_v7, %v5971_v49 }
 0x2a2   : > { %v1720_v37 = vmax.f32 %v1491_v4, 0.0  ;;  %v1721_v12 = vmax.f32 %v1520_v5, 0.0 }
 0x2a3   : > { %v1698_v45 = vmax.f32 %v1540_v43, 0.0  ;;  %v1699_v57 = vmax.f32 %v1569_v46, 0.0  ;;  %v2056_v43 = vld.sshfl [vmem:[#allocation1 + $0x38] sm:$0xff pattern:$0x75316420] }
 0x2a4   : > { %1781 = vmatpush.msra.mxu0 %v1720_v37  ;;  %1810 = vmatpush.msra.mxu1 %v1721_v12  ;;  %v471_v46 = vld [vmem:[%s6066_s17 + $0x18] sm:$0x77] }
 0x2a6   : > { %1782 = vmatpush.msra.mxu0 %v1712_v54  ;;  %1811 = vmatpush.msra.mxu1 %v1713_v8 }
 0x2a7   : > { %v5975_v17 = vpop.f32.mrf.mxu0  ;;  %v5977_v18 = vpop.f32.mrf.mxu1 }
 0x2a8   : > { %v1542_v23 = vpop.f32.mrf.mxu2  ;;  %v1571_v24 = vpop.f32.mrf.mxu3  ;;  %1783 = vmatpush.msra.mxu0 %v1704_v15  ;;  %1812 = vmatpush.msra.mxu1 %v1705_v16  ;;  %v1598_v4 = vadd.f32 %v5975_v17, %v5971_v49  ;;  %v1627_v5 = vadd.f32 %v5977_v18, %v5971_v49 }
 0x2a9   : > { %v1543_v39 = vadd.f32 %v1542_v23, %v5967_v9  ;;  %v1572_v40 = vadd.f32 %v1571_v24, %v5967_v9 }
 0x2aa   : > { %1784 = vmatpush.msra.mxu0 %v1696_v20  ;;  %1813 = vmatpush.msra.mxu1 %v1697_v21  ;;  %v1700_v13 = vmax.f32 %v1598_v4, 0.0  ;;  %v1701_v14 = vmax.f32 %v1627_v5, 0.0 }
 0x2ab   : > { %4798 = vmatmul.msk.f32.vlgmr.msra.gmra.mxu0 %vm841_vm2, %v5982_v26  ;;  %4802 = vmatmul.msk.f32.vlgmr.msra.gmra.mxu1 %vm841_vm2, %v5982_v26  ;;  %v1706_v22 = vmax.f32 %v1543_v39, 0.0  ;;  %v1707_v48 = vmax.f32 %v1572_v40, 0.0  ;;  %v2038_v39 = vld [vmem:[%s7088_s4] sm:$0xff]  ;;  %v2040_v40 = vld [vmem:[%s7088_s4 + $0x10] sm:$0xff] }
 0x2af   : > { %v1600_v27 = vpop.f32.mrf.mxu0  ;;  %v1629_v55 = vpop.f32.mrf.mxu1 }
 0x2b0   : > { %v1545_v63 = vpop.f32.mrf.mxu2  ;;  %v1574_v28 = vpop.f32.mrf.mxu3  ;;  %v1601_v2 = vadd.f32 %v1600_v27, %v5967_v9  ;;  %v1630_v3 = vadd.f32 %v1629_v55, %v5967_v9 }
 0x2b1   : > { %v1546_v34 = vadd.f32 %v1545_v63, %v5961_v51  ;;  %v1575_v35 = vadd.f32 %v1574_v28, %v5961_v51  ;;  %v2049_v28 = vld.sshfl [vmem:[#allocation1] sm:$0xff pattern:$0x75316420] }
 0x2b2   : > { %v1708_v44 = vmax.f32 %v1601_v2, 0.0  ;;  %v1709_v11 = vmax.f32 %v1630_v3, 0.0 }
 0x2b3   : > { %4799 = vmatmul.msk.f32.gmra.mxu0 %vm841_vm2, %v5991_v29  ;;  %4803 = vmatmul.msk.f32.gmra.mxu1 %vm841_vm2, %v5991_v29  ;;  %v1714_v47 = vmax.f32 %v1546_v34, 0.0  ;;  %v1715_v19 = vmax.f32 %v1575_v35, 0.0 }
 0x2b7   : > { %v1603_v61 = vpop.f32.mrf.mxu0  ;;  %v1632_v30 = vpop.f32.mrf.mxu1 }
 0x2b8   : > { %v1548_v31 = vpop.f32.mrf.mxu2  ;;  %v1577_v10 = vpop.f32.mrf.mxu3  ;;  %v1604_v59 = vadd.f32 %v1603_v61, %v5961_v51  ;;  %v1633_v60 = vadd.f32 %v1632_v30, %v5961_v51  ;;  %v468_v61 = vld [vmem:[%s6066_s17] sm:$0x77]  ;;  %v2050_v30 = vld.sshfl [vmem:[#allocation1 + $0x8] sm:$0xff pattern:$0x75316420] }
 0x2b9   : > { %v1549_v36 = vadd.f32 %v1548_v31, %v5959_v62  ;;  %v1578_v38 = vadd.f32 %v1577_v10, %v5959_v62  ;;  %3701 = vst [vmem:[#allocation1] ss:$2 sm:$0xff] %v468_v61 }
 0x2ba   : > { %v1716_v6 = vmax.f32 %v1604_v59, 0.0  ;;  %v1717_v7 = vmax.f32 %v1633_v60, 0.0 }
 0x2bb   : > { %v1722_v41 = vmax.f32 %v1549_v36, 0.0  ;;  %v1723_v42 = vmax.f32 %v1578_v38, 0.0  ;;  %4800 = vmatmul.msk.f32.gmra.mxu0 %vm841_vm2, %v6000_v33  ;;  %4804 = vmatmul.msk.f32.gmra.mxu1 %vm841_vm2, %v6000_v33  ;;  %v469_v36 = vld [vmem:[%s6066_s17 + $0x8] sm:$0x77] }
 0x2bc   : > { %v2051_v38 = vld.sshfl [vmem:[#allocation1 + $0x10] sm:$0xff pattern:$0x75316420] }
 0x2bd   : > { %1839 = vmatpush.msra.mxu2 %v1722_v41  ;;  %1868 = vmatpush.msra.mxu3 %v1723_v42  ;;  %v470_v41 = vld [vmem:[%s6066_s17 + $0x10] sm:$0x77]  ;;  %v2054_v42 = vld.sshfl [vmem:[#allocation1 + $0x28] sm:$0xff pattern:$0x75316420]  ;;  %s6985_s17 = scalar_lea.vmem [#allocation2], %s4645_s16 }
 0x2be   : > { %s4567_s29 = sshll.u32 %s6985_s17, 4  ;;  %s4568_s29 = int_to_ptr.vmem [resolvable:$true] %s4567_s29 }
 0x2bf   : > { %1840 = vmatpush.msra.mxu2 %v1714_v47  ;;  %1869 = vmatpush.msra.mxu3 %v1715_v19  ;;  %v1606_v50 = vpop.f32.mrf.mxu0  ;;  %v1635_v52 = vpop.f32.mrf.mxu1  ;;  %v2055_v47 = vld.sshfl [vmem:[#allocation1 + $0x30] sm:$0xff pattern:$0x75316420] }
 0x2c0   : > { %v1607_v25 = vadd.f32 %v1606_v50, %v5959_v62  ;;  %v1636_v53 = vadd.f32 %v1635_v52, %v5959_v62  ;;  %v6016_v56 = vpop.f32.mrf.mxu2  ;;  %v6018_v32 = vpop.f32.mrf.mxu3  ;;  %3707 = vst [vmem:[#allocation1 + $0x30] ss:$2 sm:$0xff] %v471_v46 }
 0x2c1   : > { %1841 = vmatpush.msra.mxu2 %v1706_v22  ;;  %1870 = vmatpush.msra.mxu3 %v1707_v48  ;;  %v1685_v63 = vadd.f32 %v6018_v32, %v5971_v49 }
 0x2c2   : > { %v1724_v0 = vmax.f32 %v1607_v25, 0.0  ;;  %v1725_v1 = vmax.f32 %v1636_v53, 0.0  ;;  %v6156_v53 = vpop.permute.xlu1 %1754 }
 0x2c3   : > { %1842 = vmatpush.msra.mxu2 %v1698_v45  ;;  %1871 = vmatpush.msra.mxu3 %v1699_v57  ;;  %v1703_v35 = vmax.f32 %v1685_v63, 0.0 }
 0x2c4   : > { %4801 = vmatmul.msk.f32.gmra.mxu0 %vm841_vm2, %v6023_v58  ;;  %4805 = vmatmul.msk.f32.gmra.mxu1 %vm841_vm2, %v6023_v58 }
 0x2c5   : > { %4806 = vmatmul.msk.f32.vlgmr.msra.gmra.mxu2 %vm841_vm2, %v5982_v26  ;;  %4810 = vmatmul.msk.f32.vlgmr.msra.gmra.mxu3 %vm841_vm2, %v5982_v26 }
 0x2c6   : > { %1897 = vmatpush.msrb.mxu0 %v1724_v0  ;;  %1926 = vmatpush.msrb.mxu1 %v1725_v1  ;;  %v6166_v0 = vpop.permute.xlu0 %1744 }
 0x2c8   : > { %1898 = vmatpush.msrb.mxu0 %v1716_v6  ;;  %1927 = vmatpush.msrb.mxu1 %v1717_v7  ;;  %v1658_v37 = vpop.f32.mrf.mxu2  ;;  %v1687_v12 = vpop.f32.mrf.mxu3 }
 0x2c9   : > { %v1659_v27 = vadd.f32 %v1658_v37, %v5967_v9  ;;  %v1688_v55 = vadd.f32 %v1687_v12, %v5967_v9 }
 0x2ca   : > { %1899 = vmatpush.msrb.mxu0 %v1708_v44  ;;  %1928 = vmatpush.msrb.mxu1 %v1709_v11  ;;  %v6170_v5 = vpop.permute.xlu1 %1739 }
 0x2cb   : > { %v1710_v31 = vmax.f32 %v1659_v27, 0.0  ;;  %v1711_v10 = vmax.f32 %v1688_v55, 0.0 }
 0x2cc   : > { %1900 = vmatpush.msrb.mxu0 %v1700_v13  ;;  %1929 = vmatpush.msrb.mxu1 %v1701_v14 }
 0x2cd   : > { %4807 = vmatmul.msk.f32.gmra.mxu2 %vm841_vm2, %v5991_v29  ;;  %4811 = vmatmul.msk.f32.gmra.mxu3 %vm841_vm2, %v5991_v29 }
 0x2ce   : > { %4814 = vmatmul.msk.f32.vlgmr.msrb.gmra.mxu0 %vm841_vm2, %v5982_v26  ;;  %4818 = vmatmul.msk.f32.vlgmr.msrb.gmra.mxu1 %vm841_vm2, %v5982_v26 }
 0x2cf   : > { %4834 = vmatpush.msk.msra.mxu0 %vm532_vm0, %v2049_v28  ;;  %4839 = vmatpush.msk.msra.mxu1 %vm532_vm0, %v2050_v30 }
 0x2d0   : > { %v1661_v54 = vpop.f32.mrf.mxu2  ;;  %v1690_v8 = vpop.f32.mrf.mxu3 }
 0x2d1   : > { %v1662_v20 = vadd.f32 %v1661_v54, %v5961_v51  ;;  %v1691_v21 = vadd.f32 %v1690_v8, %v5961_v51  ;;  %v1656_v51 = vadd.f32 %v6016_v56, %v5971_v49  ;;  %v2052_v49 = vld.sshfl [vmem:[#allocation1 + $0x18] sm:$0xff pattern:$0x75316420]  ;;  %4859 = vmatpush.msk.msrb.mxu1 %vm532_vm0, %v2054_v42  ;;  %v6159_v56 = vpop.permute.xlu2 %1749 }
 0x2d2   : > { %3703 = vst [vmem:[#allocation1 + $0x10] ss:$2 sm:$0xff] %v469_v36 }
 0x2d3   : > { %v1719_v9 = vmax.f32 %v1691_v21, 0.0  ;;  %v1702_v34 = vmax.f32 %v1656_v51, 0.0  ;;  %v6186_v21 = vld [vmem:[%s7087_s3 + $0x88] sm:$0xff] }
 0x2d5   : > { %4808 = vmatmul.msk.f32.gmra.mxu2 %vm841_vm2, %v6000_v33  ;;  %4812 = vmatmul.msk.f32.gmra.mxu3 %vm841_vm2, %v6000_v33 }
 0x2d6   : > { %4815 = vmatmul.msk.f32.gmra.mxu0 %vm841_vm2, %v5991_v29  ;;  %4819 = vmatmul.msk.f32.gmra.mxu1 %vm841_vm2, %v5991_v29 }
 0x2d8   : > { %v1664_v15 = vpop.f32.mrf.mxu2  ;;  %v1693_v16 = vpop.f32.mrf.mxu3 }
 0x2d9   : > { %v1665_v17 = vadd.f32 %v1664_v15, %v5959_v62  ;;  %v1694_v18 = vadd.f32 %v1693_v16, %v5959_v62  ;;  %v1718_v62 = vmax.f32 %v1662_v20, 0.0  ;;  %v6177_v15 = vld [vmem:[%s7087_s3 + $0x80] sm:$0xff] }
 0x2db   : > { %v1726_v23 = vmax.f32 %v1665_v17, 0.0  ;;  %v1727_v24 = vmax.f32 %v1694_v18, 0.0 }
 0x2dd   : > { %4809 = vmatmul.msk.f32.gmra.mxu2 %vm841_vm2, %v6023_v58  ;;  %4813 = vmatmul.msk.f32.gmra.mxu3 %vm841_vm2, %v6023_v58 }
 0x2de   : > { %4816 = vmatmul.msk.f32.gmra.mxu0 %vm841_vm2, %v6000_v33  ;;  %4820 = vmatmul.msk.f32.gmra.mxu1 %vm841_vm2, %v6000_v33 }
 0x2df   : > { %1955 = vmatpush.msrb.mxu2 %v1726_v23  ;;  %1984 = vmatpush.msrb.mxu3 %v1727_v24 }
 0x2e1   : > { %1956 = vmatpush.msrb.mxu2 %v1718_v62  ;;  %1985 = vmatpush.msrb.mxu3 %v1719_v9  ;;  %v6195_v62 = vld [vmem:[%s7087_s3 + $0x90] sm:$0xff] }
 0x2e3   : > { %1957 = vmatpush.msrb.mxu2 %v1710_v31  ;;  %1986 = vmatpush.msrb.mxu3 %v1711_v10 }
 0x2e5   : > { %1958 = vmatpush.msrb.mxu2 %v1702_v34  ;;  %1987 = vmatpush.msrb.mxu3 %v1703_v35 }
 0x2e6   : > { %4817 = vmatmul.msk.f32.gmra.mxu0 %vm841_vm2, %v6023_v58  ;;  %4821 = vmatmul.msk.f32.gmra.mxu1 %vm841_vm2, %v6023_v58 }
 0x2e7   : > { %4822 = vmatmul.msk.f32.vlgmr.msrb.gmra.mxu2 %vm841_vm2, %v5982_v26  ;;  %4826 = vmatmul.msk.f32.vlgmr.msrb.gmra.mxu3 %vm841_vm2, %v5982_v26  ;;  %v2039_v26 = vld [vmem:[%s7088_s4 + $0x8] sm:$0xff] }
 0x2e8   : > { %4849 = vmatpush.msk.msra.mxu3 %vm532_vm0, %v2052_v49  ;;  %4844 = vmatpush.msk.msra.mxu2 %vm532_vm0, %v2051_v38 }
 0x2ea   : > { %4869 = vmatpush.msk.msrb.mxu3 %vm532_vm0, %v2056_v43  ;;  %4864 = vmatpush.msk.msrb.mxu2 %vm532_vm0, %v2055_v47 }
 0x2ee   : > { %4835 = vmatmul.msk.f32.vlgmr.msra.gmra.mxu0 %vm519_vm1, %v2038_v39  ;;  %4840 = vmatmul.msk.f32.vlgmr.msra.gmra.mxu1 %vm519_vm1, %v2038_v39 }
 0x2ef   : > { %4823 = vmatmul.msk.f32.gmra.mxu2 %vm841_vm2, %v5991_v29  ;;  %4827 = vmatmul.msk.f32.gmra.mxu3 %vm841_vm2, %v5991_v29  ;;  %v2041_v29 = vld [vmem:[%s7088_s4 + $0x18] sm:$0xff] }
 0x2f6   : > { %4836 = vmatmul.msk.f32.gmra.mxu0 %vm519_vm1, %v2039_v26  ;;  %4841 = vmatmul.msk.f32.gmra.mxu1 %vm519_vm1, %v2039_v26 }
 0x2f7   : > { %4824 = vmatmul.msk.f32.gmra.mxu2 %vm841_vm2, %v6000_v33  ;;  %4828 = vmatmul.msk.f32.gmra.mxu3 %vm841_vm2, %v6000_v33  ;;  %v2053_v33 = vld.sshfl [vmem:[#allocation1 + $0x20] sm:$0xff pattern:$0x75316420] }
 0x2f8   : > { %4854 = vmatpush.msk.msrb.mxu0 %vm532_vm0, %v2053_v33  ;;  %3705 = vst [vmem:[#allocation1 + $0x20] ss:$2 sm:$0xff] %v470_v41 }
 0x2fe   : > { %4837 = vmatmul.msk.f32.gmra.mxu0 %vm519_vm1, %v2040_v40  ;;  %4842 = vmatmul.msk.f32.gmra.mxu1 %vm519_vm1, %v2040_v40 }
 0x2ff   : > { %4825 = vmatmul.msk.f32.gmra.mxu2 %vm841_vm2, %v6023_v58  ;;  %4829 = vmatmul.msk.f32.gmra.mxu3 %vm841_vm2, %v6023_v58 }
 0x306   : > { %4838 = vmatmul.msk.f32.gmra.mxu0 %vm519_vm1, %v2041_v29  ;;  %4843 = vmatmul.msk.f32.gmra.mxu1 %vm519_vm1, %v2041_v29 }
 0x307   : > { %4845 = vmatmul.msk.f32.vlgmr.msra.gmra.mxu2 %vm519_vm1, %v2038_v39  ;;  %4850 = vmatmul.msk.f32.vlgmr.msra.gmra.mxu3 %vm519_vm1, %v2038_v39 }
 0x30e   : > { %4855 = vmatmul.msk.f32.vlgmr.msrb.gmra.mxu0 %vm519_vm1, %v2038_v39  ;;  %4860 = vmatmul.msk.f32.vlgmr.msrb.gmra.mxu1 %vm519_vm1, %v2038_v39 }
 0x30f   : > { %4846 = vmatmul.msk.f32.gmra.mxu2 %vm519_vm1, %v2039_v26  ;;  %4851 = vmatmul.msk.f32.gmra.mxu3 %vm519_vm1, %v2039_v26 }
 0x316   : > { %4856 = vmatmul.msk.f32.gmra.mxu0 %vm519_vm1, %v2039_v26  ;;  %4861 = vmatmul.msk.f32.gmra.mxu1 %vm519_vm1, %v2039_v26 }
 0x317   : > { %4847 = vmatmul.msk.f32.gmra.mxu2 %vm519_vm1, %v2040_v40  ;;  %4852 = vmatmul.msk.f32.gmra.mxu3 %vm519_vm1, %v2040_v40 }
 0x31e   : > { %4857 = vmatmul.msk.f32.gmra.mxu0 %vm519_vm1, %v2040_v40  ;;  %4862 = vmatmul.msk.f32.gmra.mxu1 %vm519_vm1, %v2040_v40 }
 0x31f   : > { %4848 = vmatmul.msk.f32.gmra.mxu2 %vm519_vm1, %v2041_v29  ;;  %4853 = vmatmul.msk.f32.gmra.mxu3 %vm519_vm1, %v2041_v29 }
 0x326   : > { %4858 = vmatmul.msk.f32.gmra.mxu0 %vm519_vm1, %v2041_v29  ;;  %4863 = vmatmul.msk.f32.gmra.mxu1 %vm519_vm1, %v2041_v29 }
 0x327   : > { %4870 = vmatmul.msk.f32.vlgmr.msrb.gmra.mxu3 %vm519_vm1, %v2038_v39  ;;  %4865 = vmatmul.msk.f32.vlgmr.msrb.gmra.mxu2 %vm519_vm1, %v2038_v39 }
 0x328   : > { %v1786_v19 = vpop.f32.mrf.mxu0  ;;  %v1815_v22 = vpop.f32.mrf.mxu1 }
 0x329   : > { %v1787_v6 = vadd.f32 %v1786_v19, %v6170_v5  ;;  %v1816_v7 = vadd.f32 %v1815_v22, %v6170_v5 }
 0x32b   : > { %v2001_v54 = vmax.f32 %v1787_v6, 0.0  ;;  %v2002_v8 = vmax.f32 %v1816_v7, 0.0 }
 0x32f   : > { %4871 = vmatmul.msk.f32.gmra.mxu3 %vm519_vm1, %v2039_v26  ;;  %4866 = vmatmul.msk.f32.gmra.mxu2 %vm519_vm1, %v2039_v26  ;;  %v6210_v26 = vld [vmem:[%s7087_s3 + $0x98] sm:$0xff] }
 0x330   : > { %v1789_v48 = vpop.f32.mrf.mxu0  ;;  %v1818_v50 = vpop.f32.mrf.mxu1 }
 0x331   : > { %v1790_v1 = vadd.f32 %v1789_v48, %v6166_v0  ;;  %v1819_v2 = vadd.f32 %v1818_v50, %v6166_v0 }
 0x333   : > { %v2009_v37 = vmax.f32 %v1790_v1, 0.0  ;;  %v2010_v12 = vmax.f32 %v1819_v2, 0.0 }
 0x337   : > { %4872 = vmatmul.msk.f32.gmra.mxu3 %vm519_vm1, %v2040_v40  ;;  %4867 = vmatmul.msk.f32.gmra.mxu2 %vm519_vm1, %v2040_v40 }
 0x338   : > { %v1792_v52 = vpop.f32.mrf.mxu0  ;;  %v1821_v25 = vpop.f32.mrf.mxu1 }
 0x339   : > { %v1793_v57 = vadd.f32 %v1792_v52, %v6159_v56  ;;  %v1822_v58 = vadd.f32 %v1821_v25, %v6159_v56 }
 0x33b   : > { %v2017_v44 = vmax.f32 %v1793_v57, 0.0  ;;  %v2018_v11 = vmax.f32 %v1822_v58, 0.0 }
 0x33f   : > { %4873 = vmatmul.msk.f32.gmra.mxu3 %vm519_vm1, %v2041_v29  ;;  %4868 = vmatmul.msk.f32.gmra.mxu2 %vm519_vm1, %v2041_v29 }
 0x341   : > { %v1795_v32 = vpop.f32.mrf.mxu0  ;;  %v1824_v45 = vpop.f32.mrf.mxu1 }
 0x342   : > { %v1796_v59 = vadd.f32 %v1795_v32, %v6156_v53  ;;  %v1825_v60 = vadd.f32 %v1824_v45, %v6156_v53 }
 0x344   : > { %v2025_v3 = vmax.f32 %v1796_v59, 0.0  ;;  %v2026_v4 = vmax.f32 %v1825_v60, 0.0 }
 0x346   : > { %2341 = vmatpush.msra.mxu0 %v2025_v3  ;;  %2370 = vmatpush.msra.mxu1 %v2026_v4 }
 0x348   : > { %v1844_v13 = vpop.f32.mrf.mxu2  ;;  %v1873_v14 = vpop.f32.mrf.mxu3  ;;  %2342 = vmatpush.msra.mxu0 %v2017_v44  ;;  %2371 = vmatpush.msra.mxu1 %v2018_v11 }
 0x349   : > { %v1845_v42 = vadd.f32 %v1844_v13, %v6170_v5  ;;  %v1874_v43 = vadd.f32 %v1873_v14, %v6170_v5 }
 0x34a   : > { %2343 = vmatpush.msra.mxu0 %v2009_v37  ;;  %2372 = vmatpush.msra.mxu1 %v2010_v12 }
 0x34b   : > { %v1902_v16 = vpop.f32.mrf.mxu0  ;;  %v1931_v17 = vpop.f32.mrf.mxu1  ;;  %v2003_v59 = vmax.f32 %v1845_v42, 0.0  ;;  %v2004_v60 = vmax.f32 %v1874_v43, 0.0 }
 0x34c   : > { %2344 = vmatpush.msra.mxu0 %v2001_v54  ;;  %2373 = vmatpush.msra.mxu1 %v2002_v8  ;;  %v1903_v32 = vadd.f32 %v1902_v16, %v6170_v5  ;;  %v1932_v45 = vadd.f32 %v1931_v17, %v6170_v5 }
 0x34d   : > { %4874 = vmatmul.msk.f32.vlgmr.msra.gmra.mxu0 %vm841_vm2, %v6177_v15  ;;  %4878 = vmatmul.msk.f32.vlgmr.msra.gmra.mxu1 %vm841_vm2, %v6177_v15 }
 0x34e   : > { %v2005_v6 = vmax.f32 %v1903_v32, 0.0  ;;  %v2006_v7 = vmax.f32 %v1932_v45, 0.0 }
 0x350   : > { %v1847_v18 = vpop.f32.mrf.mxu2  ;;  %v1876_v20 = vpop.f32.mrf.mxu3 }
 0x351   : > { %v1848_v34 = vadd.f32 %v1847_v18, %v6166_v0  ;;  %v1877_v35 = vadd.f32 %v1876_v20, %v6166_v0 }
 0x353   : > { %v1905_v23 = vpop.f32.mrf.mxu0  ;;  %v1934_v24 = vpop.f32.mrf.mxu1  ;;  %v2011_v52 = vmax.f32 %v1848_v34, 0.0  ;;  %v2012_v25 = vmax.f32 %v1877_v35, 0.0 }
 0x354   : > { %v1906_v19 = vadd.f32 %v1905_v23, %v6166_v0  ;;  %v1935_v22 = vadd.f32 %v1934_v24, %v6166_v0 }
 0x355   : > { %4875 = vmatmul.msk.f32.gmra.mxu0 %vm841_vm2, %v6186_v21  ;;  %4879 = vmatmul.msk.f32.gmra.mxu1 %vm841_vm2, %v6186_v21 }
 0x356   : > { %v2013_v1 = vmax.f32 %v1906_v19, 0.0  ;;  %v2014_v2 = vmax.f32 %v1935_v22, 0.0 }
 0x358   : > { %v1850_v27 = vpop.f32.mrf.mxu2  ;;  %v1879_v55 = vpop.f32.mrf.mxu3 }
 0x359   : > { %v1851_v61 = vadd.f32 %v1850_v27, %v6159_v56  ;;  %v1880_v30 = vadd.f32 %v1879_v55, %v6159_v56 }
 0x35b   : > { %v1908_v51 = vpop.f32.mrf.mxu0  ;;  %v1937_v63 = vpop.f32.mrf.mxu1  ;;  %v2019_v46 = vmax.f32 %v1851_v61, 0.0  ;;  %v2020_v47 = vmax.f32 %v1880_v30, 0.0 }
 0x35c   : > { %v1909_v40 = vadd.f32 %v1908_v51, %v6159_v56  ;;  %v1938_v29 = vadd.f32 %v1937_v63, %v6159_v56 }
 0x35d   : > { %4876 = vmatmul.msk.f32.gmra.mxu0 %vm841_vm2, %v6195_v62  ;;  %4880 = vmatmul.msk.f32.gmra.mxu1 %vm841_vm2, %v6195_v62 }
 0x35e   : > { %v2021_v57 = vmax.f32 %v1909_v40, 0.0  ;;  %v2022_v58 = vmax.f32 %v1938_v29, 0.0 }
 0x360   : > { %v1853_v9 = vpop.f32.mrf.mxu2  ;;  %v1882_v28 = vpop.f32.mrf.mxu3 }
 0x361   : > { %v1854_v31 = vadd.f32 %v1853_v9, %v6156_v53  ;;  %v1883_v10 = vadd.f32 %v1882_v28, %v6156_v53 }
 0x363   : > { %v2027_v49 = vmax.f32 %v1854_v31, 0.0  ;;  %v2028_v36 = vmax.f32 %v1883_v10, 0.0  ;;  %v1911_v38 = vpop.f32.mrf.mxu0  ;;  %v1940_v39 = vpop.f32.mrf.mxu1 }
 0x364   : > { %v1912_v33 = vadd.f32 %v1911_v38, %v6156_v53  ;;  %v1941_v41 = vadd.f32 %v1940_v39, %v6156_v53 }
 0x365   : > { %2399 = vmatpush.msra.mxu2 %v2027_v49  ;;  %2428 = vmatpush.msra.mxu3 %v2028_v36 }
 0x366   : > { %v2029_v48 = vmax.f32 %v1912_v33, 0.0  ;;  %v2030_v50 = vmax.f32 %v1941_v41, 0.0  ;;  %4877 = vmatmul.msk.f32.gmra.mxu0 %vm841_vm2, %v6210_v26  ;;  %4881 = vmatmul.msk.f32.gmra.mxu1 %vm841_vm2, %v6210_v26 }
 0x367   : > { %2400 = vmatpush.msra.mxu2 %v2019_v46  ;;  %2429 = vmatpush.msra.mxu3 %v2020_v47 }
 0x368   : > { %2457 = vmatpush.msrb.mxu0 %v2029_v48  ;;  %2486 = vmatpush.msrb.mxu1 %v2030_v50 }
 0x369   : > { %2401 = vmatpush.msra.mxu2 %v2011_v52  ;;  %2430 = vmatpush.msra.mxu3 %v2012_v25 }
 0x36a   : > { %v1960_v3 = vpop.f32.mrf.mxu2  ;;  %v1989_v4 = vpop.f32.mrf.mxu3  ;;  %2458 = vmatpush.msrb.mxu0 %v2021_v57  ;;  %2487 = vmatpush.msrb.mxu1 %v2022_v58 }
 0x36b   : > { %2402 = vmatpush.msra.mxu2 %v2003_v59  ;;  %2431 = vmatpush.msra.mxu3 %v2004_v60  ;;  %v6242_v37 = vpop.f32.mrf.mxu0  ;;  %v6244_v12 = vpop.f32.mrf.mxu1 }
 0x36c   : > { %2459 = vmatpush.msrb.mxu0 %v2013_v1  ;;  %2488 = vmatpush.msrb.mxu1 %v2014_v2  ;;  %v6334_v1 = vpop.permute.xlu2 %2582 }
 0x36d   : > { %4882 = vmatmul.msk.f32.vlgmr.msra.gmra.mxu2 %vm841_vm2, %v6177_v15  ;;  %4886 = vmatmul.msk.f32.vlgmr.msra.gmra.mxu3 %vm841_vm2, %v6177_v15 }
 0x36e   : > { %2460 = vmatpush.msrb.mxu0 %v2005_v6  ;;  %2489 = vmatpush.msrb.mxu1 %v2006_v7 }
 0x36f   : > { %4890 = vmatmul.msk.f32.vlgmr.msrb.gmra.mxu0 %vm841_vm2, %v6177_v15  ;;  %4894 = vmatmul.msk.f32.vlgmr.msrb.gmra.mxu1 %vm841_vm2, %v6177_v15 }
 0x372   : > { %v1963_v44 = vpop.f32.mrf.mxu2  ;;  %v1992_v11 = vpop.f32.mrf.mxu3 }
 0x373   : > { %v6258_v23 = vpop.f32.mrf.mxu0  ;;  %v6260_v24 = vpop.f32.mrf.mxu1  ;;  %v1964_v27 = vadd.f32 %v1963_v44, %v6166_v0  ;;  %v1993_v55 = vadd.f32 %v1992_v11, %v6166_v0 }
 0x375   : > { %4883 = vmatmul.msk.f32.gmra.mxu2 %vm841_vm2, %v6186_v21  ;;  %4887 = vmatmul.msk.f32.gmra.mxu3 %vm841_vm2, %v6186_v21  ;;  %v2015_v0 = vmax.f32 %v1964_v27, 0.0  ;;  %v2016_v61 = vmax.f32 %v1993_v55, 0.0 }
 0x377   : > { %4891 = vmatmul.msk.f32.gmra.mxu0 %vm841_vm2, %v6186_v21  ;;  %4895 = vmatmul.msk.f32.gmra.mxu1 %vm841_vm2, %v6186_v21 }
 0x37a   : > { %v1966_v13 = vpop.f32.mrf.mxu2  ;;  %v1995_v14 = vpop.f32.mrf.mxu3 }
 0x37b   : > { %v1967_v16 = vadd.f32 %v1966_v13, %v6159_v56  ;;  %v1996_v17 = vadd.f32 %v1995_v14, %v6159_v56  ;;  %v1961_v56 = vadd.f32 %v1960_v3, %v6170_v5  ;;  %v2137_v10 = vpop.f32.mrf.mxu1  ;;  %v6338_v14 = vpop.permute.xlu0 %2577 }
 0x37d   : > { %4884 = vmatmul.msk.f32.gmra.mxu2 %vm841_vm2, %v6195_v62  ;;  %4888 = vmatmul.msk.f32.gmra.mxu3 %vm841_vm2, %v6195_v62  ;;  %v2023_v9 = vmax.f32 %v1967_v16, 0.0  ;;  %v2024_v28 = vmax.f32 %v1996_v17, 0.0  ;;  %v2007_v30 = vmax.f32 %v1961_v56, 0.0 }
 0x37f   : > { %4892 = vmatmul.msk.f32.gmra.mxu0 %vm841_vm2, %v6195_v62  ;;  %4896 = vmatmul.msk.f32.gmra.mxu1 %vm841_vm2, %v6195_v62 }
 0x382   : > { %v1969_v54 = vpop.f32.mrf.mxu2  ;;  %v1998_v8 = vpop.f32.mrf.mxu3 }
 0x383   : > { %v1970_v18 = vadd.f32 %v1969_v54, %v6156_v53  ;;  %v1999_v20 = vadd.f32 %v1998_v8, %v6156_v53  ;;  %v1990_v53 = vadd.f32 %v1989_v4, %v6170_v5  ;;  %v2108_v5 = vpop.f32.mrf.mxu0  ;;  %v2140_v35 = vpop.f32.mrf.mxu1 }
 0x385   : > { %v2031_v51 = vmax.f32 %v1970_v18, 0.0  ;;  %v2032_v63 = vmax.f32 %v1999_v20, 0.0  ;;  %4885 = vmatmul.msk.f32.gmra.mxu2 %vm841_vm2, %v6210_v26  ;;  %4889 = vmatmul.msk.f32.gmra.mxu3 %vm841_vm2, %v6210_v26  ;;  %v2008_v31 = vmax.f32 %v1990_v53, 0.0 }
 0x387   : > { %2515 = vmatpush.msrb.mxu2 %v2031_v51  ;;  %2544 = vmatpush.msrb.mxu3 %v2032_v63  ;;  %v6354_v63 = vpop.permute.xlu2 %2567 }
 0x388   : > { %4893 = vmatmul.msk.f32.gmra.mxu0 %vm841_vm2, %v6210_v26  ;;  %4897 = vmatmul.msk.f32.gmra.mxu1 %vm841_vm2, %v6210_v26 }
 0x389   : > { %2516 = vmatpush.msrb.mxu2 %v2023_v9  ;;  %2545 = vmatpush.msrb.mxu3 %v2024_v28 }
 0x38a   : > { %v6286_v49 = vpop.f32.mrf.mxu2  ;;  %v6288_v36 = vpop.f32.mrf.mxu3 }
 0x38b   : > { %2517 = vmatpush.msrb.mxu2 %v2015_v0  ;;  %2546 = vmatpush.msrb.mxu3 %v2016_v61  ;;  %v2111_v34 = vpop.f32.mrf.mxu0  ;;  %v6292_v38 = vpop.f32.mrf.mxu1 }
 0x38d   : > { %2518 = vmatpush.msrb.mxu2 %v2007_v30  ;;  %2547 = vmatpush.msrb.mxu3 %v2008_v31 }
 0x38e   : > { %4898 = vmatmul.msk.f32.vlgmr.msrb.gmra.mxu2 %vm841_vm2, %v6177_v15  ;;  %4902 = vmatmul.msk.f32.vlgmr.msrb.gmra.mxu3 %vm841_vm2, %v6177_v15 }
 0x392   : > { %v6300_v39 = vpop.f32.mrf.mxu3 }
 0x393   : > { %v6290_v15 = vpop.f32.mrf.mxu0 }
 0x396   : > { %4899 = vmatmul.msk.f32.gmra.mxu2 %vm841_vm2, %v6186_v21  ;;  %4903 = vmatmul.msk.f32.gmra.mxu3 %vm841_vm2, %v6186_v21  ;;  %v6298_v21 = vpop.f32.mrf.mxu2 }
 0x39a   : > { %v6308_v33 = vpop.f32.mrf.mxu3 }
 0x39b   : > { %v6302_v40 = vpop.f32.mrf.mxu0 }
 0x39e   : > { %4900 = vmatmul.msk.f32.gmra.mxu2 %vm841_vm2, %v6195_v62  ;;  %4904 = vmatmul.msk.f32.gmra.mxu3 %vm841_vm2, %v6195_v62  ;;  %v6304_v62 = vpop.f32.mrf.mxu1  ;;  %v6306_v29 = vpop.f32.mrf.mxu2 }
 0x3a2   : > { %v6316_v46 = vpop.f32.mrf.mxu3 }
 0x3a3   : > { %v6310_v41 = vpop.f32.mrf.mxu0 }
 0x3a6   : > { %4901 = vmatmul.msk.f32.gmra.mxu2 %vm841_vm2, %v6210_v26  ;;  %4905 = vmatmul.msk.f32.gmra.mxu3 %vm841_vm2, %v6210_v26  ;;  %v6312_v42 = vpop.f32.mrf.mxu1  ;;  %v6314_v43 = vpop.f32.mrf.mxu2 }
 0x3aa   : > { %v6324_v22 = vpop.f32.mrf.mxu3 }
 0x3ab   : > { %v6318_v26 = vpop.f32.mrf.mxu0 }
 0x3ae   : > { %v6320_v47 = vpop.f32.mrf.mxu1  ;;  %v6322_v19 = vpop.f32.mrf.mxu2 }
 0x3b2   : > { %v6328_v25 = vpop.f32.mrf.mxu3 }
 0x3b6   : > { %v6326_v52 = vpop.f32.mrf.mxu2 }
 0x3ba   : > { %v6332_v60 = vpop.f32.mrf.mxu3 }
 0x3be   : > { %v6330_v59 = vpop.f32.mrf.mxu2 }
 0x3c6   : > { %v6346_v27 = vpop.f32.mrf.mxu2 }
 0x3ca   : > { %v2346_v48 = vpop.f32.mrf.mxu0  ;;  %v2375_v50 = vpop.f32.mrf.mxu1 }
 0x3cb   : > { %v2347_v54 = vadd.f32 %v2346_v48, %v6242_v37  ;;  %v2376_v8 = vadd.f32 %v2375_v50, %v6244_v12 }
 0x3cd   : > { %v2585_v56 = vadd.f32 %v6354_v63, %v2347_v54  ;;  %v2586_v53 = vadd.f32 %v6354_v63, %v2376_v8 }
 0x3d2   : > { %v2349_v32 = vpop.f32.mrf.mxu0  ;;  %v2378_v45 = vpop.f32.mrf.mxu1 }
 0x3d3   : > { %v2350_v7 = vadd.f32 %v2349_v32, %v6258_v23  ;;  %v2379_v44 = vadd.f32 %v2378_v45, %v6260_v24  ;;  %v6348_v23 = vpop.f32.mrf.mxu3  ;;  %v6350_v24 = vpop.permute.xlu1 %2572  ;;  %v6370_v45 = vld [vmem:[%s7087_s3 + $0xa8] sm:$0xff] }
 0x3d5   : > { %v2593_v55 = vadd.f32 %v6350_v24, %v2350_v7  ;;  %v2594_v37 = vadd.f32 %v6350_v24, %v2379_v44 }
 0x3d7   : > { %v2625_v30 = vmax.f32 %v2593_v55, 0.0  ;;  %v2626_v31 = vmax.f32 %v2594_v37, 0.0 }
 0x3da   : > { %v2352_v57 = vpop.f32.mrf.mxu0  ;;  %v2381_v58 = vpop.f32.mrf.mxu1 }
 0x3db   : > { %v2353_v2 = vadd.f32 %v2352_v57, %v2108_v5  ;;  %v2382_v3 = vadd.f32 %v2381_v58, %v2137_v10  ;;  %v2617_v5 = vmax.f32 %v2585_v56, 0.0  ;;  %v2618_v10 = vmax.f32 %v2586_v53, 0.0 }
 0x3dd   : > { %v2601_v16 = vadd.f32 %v6338_v14, %v2353_v2  ;;  %v2602_v17 = vadd.f32 %v6338_v14, %v2382_v3 }
 0x3df   : > { %v2633_v9 = vmax.f32 %v2601_v16, 0.0  ;;  %v2634_v28 = vmax.f32 %v2602_v17, 0.0 }
 0x3e3   : > { %v2355_v4 = vpop.f32.mrf.mxu0  ;;  %v2384_v6 = vpop.f32.mrf.mxu1 }
 0x3e4   : > { %v2356_v11 = vadd.f32 %v2355_v4, %v2111_v34  ;;  %v2385_v13 = vadd.f32 %v2384_v6, %v2140_v35  ;;  %v6361_v34 = vld [vmem:[%s7087_s3 + $0xa0] sm:$0xff]  ;;  %v6379_v4 = vld [vmem:[%s7087_s3 + $0xb0] sm:$0xff] }
 0x3e6   : > { %v2609_v18 = vadd.f32 %v6334_v1, %v2356_v11  ;;  %v2610_v20 = vadd.f32 %v6334_v1, %v2385_v13 }
 0x3e8   : > { %v2641_v51 = vmax.f32 %v2609_v18, 0.0  ;;  %v2642_v12 = vmax.f32 %v2610_v20, 0.0 }
 0x3ea   : > { %2702 = vmatpush.msra.mxu0 %v2641_v51  ;;  %2731 = vmatpush.msra.mxu1 %v2642_v12 }
 0x3ec   : > { %v2462_v0 = vpop.f32.mrf.mxu0  ;;  %v2491_v61 = vpop.f32.mrf.mxu1  ;;  %2703 = vmatpush.msra.mxu0 %v2633_v9  ;;  %2732 = vmatpush.msra.mxu1 %v2634_v28 }
 0x3ed   : > { %v2463_v44 = vadd.f32 %v2462_v0, %v6290_v15  ;;  %v2492_v11 = vadd.f32 %v2491_v61, %v6292_v38  ;;  %v6397_v15 = vld [vmem:[%s7087_s3 + $0xb8] sm:$0xff] }
 0x3ee   : > { %2704 = vmatpush.msra.mxu0 %v2625_v30  ;;  %2733 = vmatpush.msra.mxu1 %v2626_v31 }
 0x3ef   : > { %v2589_v20 = vadd.f32 %v6354_v63, %v2463_v44  ;;  %v2590_v38 = vadd.f32 %v6354_v63, %v2492_v11 }
 0x3f0   : > { %v2404_v35 = vpop.f32.mrf.mxu2  ;;  %v2433_v48 = vpop.f32.mrf.mxu3  ;;  %2705 = vmatpush.msra.mxu0 %v2617_v5  ;;  %2734 = vmatpush.msra.mxu1 %v2618_v10 }
 0x3f1   : > { %4910 = vmatmul.msk.f32.vlgmr.msra.gmra.mxu0 %vm841_vm2, %v6361_v34  ;;  %4914 = vmatmul.msk.f32.vlgmr.msra.gmra.mxu1 %vm841_vm2, %v6361_v34  ;;  %v2405_v5 = vadd.f32 %v2404_v35, %v6286_v49  ;;  %v2434_v10 = vadd.f32 %v2433_v48, %v6288_v36  ;;  %v2621_v48 = vmax.f32 %v2589_v20, 0.0 }
 0x3f3   : > { %v2587_v36 = vadd.f32 %v6354_v63, %v2405_v5  ;;  %v2588_v35 = vadd.f32 %v6354_v63, %v2434_v10 }
 0x3f4   : > { %v2465_v50 = vpop.f32.mrf.mxu0  ;;  %v2494_v32 = vpop.f32.mrf.mxu1 }
 0x3f5   : > { %v2466_v13 = vadd.f32 %v2465_v50, %v6302_v40  ;;  %v2495_v16 = vadd.f32 %v2494_v32, %v6304_v62 }
 0x3f7   : > { %v2597_v40 = vadd.f32 %v6350_v24, %v2466_v13  ;;  %v2598_v53 = vadd.f32 %v6350_v24, %v2495_v16  ;;  %v2620_v16 = vmax.f32 %v2588_v35, 0.0 }
 0x3f8   : > { %v2407_v57 = vpop.f32.mrf.mxu2  ;;  %v2436_v58 = vpop.f32.mrf.mxu3 }
 0x3f9   : > { %4911 = vmatmul.msk.f32.gmra.mxu0 %vm841_vm2, %v6370_v45  ;;  %4915 = vmatmul.msk.f32.gmra.mxu1 %vm841_vm2, %v6370_v45 }
 0x3fc   : > { %v2468_v2 = vpop.f32.mrf.mxu0  ;;  %v2497_v3 = vpop.f32.mrf.mxu1 }
 0x3fd   : > { %v2469_v54 = vadd.f32 %v2468_v2, %v6310_v41  ;;  %v2498_v8 = vadd.f32 %v2497_v3, %v6312_v42  ;;  %v2629_v2 = vmax.f32 %v2597_v40, 0.0  ;;  %v2630_v3 = vmax.f32 %v2598_v53, 0.0 }
 0x3ff   : > { %v2605_v42 = vadd.f32 %v6338_v14, %v2469_v54  ;;  %v2606_v51 = vadd.f32 %v6338_v14, %v2498_v8  ;;  %v2619_v8 = vmax.f32 %v2587_v36, 0.0 }
 0x400   : > { %v2410_v6 = vpop.f32.mrf.mxu2  ;;  %v2439_v7 = vpop.f32.mrf.mxu3 }
 0x401   : > { %4912 = vmatmul.msk.f32.gmra.mxu0 %vm841_vm2, %v6379_v4  ;;  %4916 = vmatmul.msk.f32.gmra.mxu1 %vm841_vm2, %v6379_v4  ;;  %v2411_v41 = vadd.f32 %v2410_v6, %v6306_v29  ;;  %v2440_v62 = vadd.f32 %v2439_v7, %v6308_v33  ;;  %v2408_v29 = vadd.f32 %v2407_v57, %v6298_v21  ;;  %v2637_v50 = vmax.f32 %v2605_v42, 0.0 }
 0x402   : > { %v2437_v33 = vadd.f32 %v2436_v58, %v6300_v39  ;;  %v2638_v21 = vmax.f32 %v2606_v51, 0.0  ;;  %v2622_v7 = vmax.f32 %v2590_v38, 0.0 }
 0x403   : > { %v2603_v30 = vadd.f32 %v6338_v14, %v2411_v41  ;;  %v2604_v31 = vadd.f32 %v6338_v14, %v2440_v62  ;;  %v2595_v57 = vadd.f32 %v6350_v24, %v2408_v29 }
 0x404   : > { %v2596_v58 = vadd.f32 %v6350_v24, %v2437_v33 }
 0x405   : > { %v2471_v17 = vpop.f32.mrf.mxu0  ;;  %v2500_v18 = vpop.f32.mrf.mxu1  ;;  %v2635_v6 = vmax.f32 %v2603_v30, 0.0  ;;  %v2636_v49 = vmax.f32 %v2604_v31, 0.0  ;;  %v2627_v13 = vmax.f32 %v2595_v57, 0.0 }
 0x406   : > { %v2472_v55 = vadd.f32 %v2471_v17, %v6318_v26  ;;  %v2501_v37 = vadd.f32 %v2500_v18, %v6320_v47  ;;  %v2628_v54 = vmax.f32 %v2596_v58, 0.0  ;;  %v6490_v31 = vpop.permute.xlu0 %2675 }
 0x408   : > { %v2613_v26 = vadd.f32 %v6334_v1, %v2472_v55  ;;  %v2614_v47 = vadd.f32 %v6334_v1, %v2501_v37  ;;  %v2413_v12 = vpop.f32.mrf.mxu2  ;;  %v2442_v56 = vpop.f32.mrf.mxu3 }
 0x409   : > { %v2414_v9 = vadd.f32 %v2413_v12, %v6314_v43  ;;  %v2443_v28 = vadd.f32 %v2442_v56, %v6316_v46  ;;  %4913 = vmatmul.msk.f32.gmra.mxu0 %vm841_vm2, %v6397_v15  ;;  %4917 = vmatmul.msk.f32.gmra.mxu1 %vm841_vm2, %v6397_v15 }
 0x40a   : > { %v2645_v0 = vmax.f32 %v2613_v26, 0.0  ;;  %v2646_v61 = vmax.f32 %v2614_v47, 0.0 }
 0x40b   : > { %v2611_v43 = vadd.f32 %v6334_v1, %v2414_v9  ;;  %v2612_v46 = vadd.f32 %v6334_v1, %v2443_v28 }
 0x40c   : > { %2818 = vmatpush.msrb.mxu0 %v2645_v0  ;;  %2847 = vmatpush.msrb.mxu1 %v2646_v61 }
 0x40d   : > { %v2643_v32 = vmax.f32 %v2611_v43, 0.0  ;;  %v2644_v39 = vmax.f32 %v2612_v46, 0.0 }
 0x40e   : > { %2819 = vmatpush.msrb.mxu0 %v2637_v50  ;;  %2848 = vmatpush.msrb.mxu1 %v2638_v21  ;;  %v6498_v50 = vpop.permute.xlu2 %2665  ;;  %v6502_v58 = vpop.permute.xlu0 %2660 }
 0x40f   : > { %2760 = vmatpush.msra.mxu2 %v2643_v32  ;;  %2789 = vmatpush.msra.mxu3 %v2644_v39 }
 0x410   : > { %2820 = vmatpush.msrb.mxu0 %v2629_v2  ;;  %2849 = vmatpush.msrb.mxu1 %v2630_v3 }
 0x411   : > { %v2520_v44 = vpop.f32.mrf.mxu2  ;;  %v2549_v11 = vpop.f32.mrf.mxu3  ;;  %2761 = vmatpush.msra.mxu2 %v2635_v6  ;;  %2790 = vmatpush.msra.mxu3 %v2636_v49 }
 0x412   : > { %2821 = vmatpush.msrb.mxu0 %v2621_v48  ;;  %2850 = vmatpush.msrb.mxu1 %v2622_v7  ;;  %v2521_v47 = vadd.f32 %v2520_v44, %v6322_v19  ;;  %v2550_v12 = vadd.f32 %v2549_v11, %v6324_v22  ;;  %v6509_v44 = vld [vmem:[%s7087_s3 + $0xc0] sm:$0xff] }
 0x413   : > { %4926 = vmatmul.msk.f32.vlgmr.msrb.gmra.mxu0 %vm841_vm2, %v6361_v34  ;;  %4930 = vmatmul.msk.f32.vlgmr.msrb.gmra.mxu1 %vm841_vm2, %v6361_v34 }
 0x414   : > { %2762 = vmatpush.msra.mxu2 %v2627_v13  ;;  %2791 = vmatpush.msra.mxu3 %v2628_v54  ;;  %v2591_v56 = vadd.f32 %v6354_v63, %v2521_v47  ;;  %v6518_v54 = vld [vmem:[%s7087_s3 + $0xc8] sm:$0xff] }
 0x416   : > { %2763 = vmatpush.msra.mxu2 %v2619_v8  ;;  %2792 = vmatpush.msra.mxu3 %v2620_v16  ;;  %v2623_v28 = vmax.f32 %v2591_v56, 0.0 }
 0x417   : > { %4918 = vmatmul.msk.f32.vlgmr.msra.gmra.mxu2 %vm841_vm2, %v6361_v34  ;;  %4922 = vmatmul.msk.f32.vlgmr.msra.gmra.mxu3 %vm841_vm2, %v6361_v34 }
 0x419   : > { %v2523_v17 = vpop.f32.mrf.mxu2  ;;  %v2552_v18 = vpop.f32.mrf.mxu3 }
 0x41a   : > { %v2524_v62 = vadd.f32 %v2523_v17, %v6326_v52  ;;  %v2553_v42 = vadd.f32 %v2552_v18, %v6328_v25 }
 0x41b   : > { %4927 = vmatmul.msk.f32.gmra.mxu0 %vm841_vm2, %v6370_v45  ;;  %4931 = vmatmul.msk.f32.gmra.mxu1 %vm841_vm2, %v6370_v45 }
 0x41c   : > { %v2600_v19 = vadd.f32 %v6350_v24, %v2553_v42 }
 0x41f   : > { %4919 = vmatmul.msk.f32.gmra.mxu2 %vm841_vm2, %v6370_v45  ;;  %4923 = vmatmul.msk.f32.gmra.mxu3 %vm841_vm2, %v6370_v45 }
 0x421   : > { %v2526_v20 = vpop.f32.mrf.mxu2  ;;  %v2555_v55 = vpop.f32.mrf.mxu3 }
 0x422   : > { %v2527_v37 = vadd.f32 %v2526_v20, %v6330_v59  ;;  %v2556_v38 = vadd.f32 %v2555_v55, %v6332_v60  ;;  %v6527_v20 = vld [vmem:[%s7087_s3 + $0xd0] sm:$0xff] }
 0x423   : > { %4928 = vmatmul.msk.f32.gmra.mxu0 %vm841_vm2, %v6379_v4  ;;  %4932 = vmatmul.msk.f32.gmra.mxu1 %vm841_vm2, %v6379_v4 }
 0x424   : > { %v2607_v59 = vadd.f32 %v6338_v14, %v2527_v37  ;;  %v2608_v52 = vadd.f32 %v6338_v14, %v2556_v38  ;;  %v2592_v14 = vadd.f32 %v6354_v63, %v2550_v12 }
 0x426   : > { %v2639_v53 = vmax.f32 %v2607_v59, 0.0  ;;  %v2624_v29 = vmax.f32 %v2592_v14, 0.0 }
 0x427   : > { %4920 = vmatmul.msk.f32.gmra.mxu2 %vm841_vm2, %v6379_v4  ;;  %4924 = vmatmul.msk.f32.gmra.mxu3 %vm841_vm2, %v6379_v4 }
 0x429   : > { %v2529_v40 = vpop.f32.mrf.mxu2  ;;  %v2558_v41 = vpop.f32.mrf.mxu3 }
 0x42a   : > { %v2530_v51 = vadd.f32 %v2529_v40, %v6346_v27  ;;  %v2559_v26 = vadd.f32 %v2558_v41, %v6348_v23  ;;  %v2599_v27 = vadd.f32 %v6350_v24, %v2524_v62  ;;  %v2632_v24 = vmax.f32 %v2600_v19, 0.0  ;;  %v6536_v41 = vld [vmem:[%s7087_s3 + $0xd8] sm:$0xff] }
 0x42b   : > { %4929 = vmatmul.msk.f32.gmra.mxu0 %vm841_vm2, %v6397_v15  ;;  %4933 = vmatmul.msk.f32.gmra.mxu1 %vm841_vm2, %v6397_v15 }
 0x42c   : > { %v2615_v25 = vadd.f32 %v6334_v1, %v2530_v51  ;;  %v2616_v60 = vadd.f32 %v6334_v1, %v2559_v26  ;;  %v2640_v1 = vmax.f32 %v2608_v52, 0.0  ;;  %v2631_v9 = vmax.f32 %v2599_v27, 0.0 }
 0x42e   : > { %v2647_v23 = vmax.f32 %v2615_v25, 0.0  ;;  %v2648_v22 = vmax.f32 %v2616_v60, 0.0 }
 0x42f   : > { %4921 = vmatmul.msk.f32.gmra.mxu2 %vm841_vm2, %v6397_v15  ;;  %4925 = vmatmul.msk.f32.gmra.mxu3 %vm841_vm2, %v6397_v15 }
 0x430   : > { %2876 = vmatpush.msrb.mxu2 %v2647_v23  ;;  %2905 = vmatpush.msrb.mxu3 %v2648_v22 }
 0x432   : > { %2877 = vmatpush.msrb.mxu2 %v2639_v53  ;;  %2906 = vmatpush.msrb.mxu3 %v2640_v1 }
 0x434   : > { %2878 = vmatpush.msrb.mxu2 %v2631_v9  ;;  %2907 = vmatpush.msrb.mxu3 %v2632_v24 }
 0x436   : > { %2879 = vmatpush.msrb.mxu2 %v2623_v28  ;;  %2908 = vmatpush.msrb.mxu3 %v2624_v29 }
 0x437   : > { %4934 = vmatmul.msk.f32.vlgmr.msrb.gmra.mxu2 %vm841_vm2, %v6361_v34  ;;  %4938 = vmatmul.msk.f32.vlgmr.msrb.gmra.mxu3 %vm841_vm2, %v6361_v34 }
 0x43f   : > { %4935 = vmatmul.msk.f32.gmra.mxu2 %vm841_vm2, %v6370_v45  ;;  %4939 = vmatmul.msk.f32.gmra.mxu3 %vm841_vm2, %v6370_v45  ;;  %v6492_v45 = vpop.permute.xlu1 %2670 }
 0x447   : > { %4936 = vmatmul.msk.f32.gmra.mxu2 %vm841_vm2, %v6379_v4  ;;  %4940 = vmatmul.msk.f32.gmra.mxu3 %vm841_vm2, %v6379_v4 }
 0x44f   : > { %4937 = vmatmul.msk.f32.gmra.mxu2 %vm841_vm2, %v6397_v15  ;;  %4941 = vmatmul.msk.f32.gmra.mxu3 %vm841_vm2, %v6397_v15 }
 0x46e   : > { %v2707_v63 = vpop.f32.mrf.mxu0  ;;  %v2736_v34 = vpop.f32.mrf.mxu1 }
 0x46f   : > { %v2708_v2 = vadd.f32 %v2707_v63, %v6502_v58  ;;  %v2737_v3 = vadd.f32 %v2736_v34, %v6502_v58 }
 0x471   : > { %v2922_v48 = vmax.f32 %v2708_v2, 0.0  ;;  %v2923_v7 = vmax.f32 %v2737_v3, 0.0 }
 0x476   : > { %v2710_v33 = vpop.f32.mrf.mxu0  ;;  %v2739_v0 = vpop.f32.mrf.mxu1 }
 0x477   : > { %v2711_v21 = vadd.f32 %v2710_v33, %v6498_v50  ;;  %v2740_v32 = vadd.f32 %v2739_v0, %v6498_v50 }
 0x479   : > { %v2930_v36 = vmax.f32 %v2711_v21, 0.0  ;;  %v2931_v35 = vmax.f32 %v2740_v32, 0.0 }
 0x47e   : > { %v2713_v61 = vpop.f32.mrf.mxu0  ;;  %v2742_v30 = vpop.f32.mrf.mxu1 }
 0x47f   : > { %v2714_v4 = vadd.f32 %v2713_v61, %v6492_v45  ;;  %v2743_v5 = vadd.f32 %v2742_v30, %v6492_v45 }
 0x481   : > { %v2938_v6 = vmax.f32 %v2714_v4, 0.0  ;;  %v2939_v49 = vmax.f32 %v2743_v5, 0.0 }
 0x486   : > { %v2716_v43 = vpop.f32.mrf.mxu0  ;;  %v2745_v46 = vpop.f32.mrf.mxu1 }
 0x487   : > { %v2717_v10 = vadd.f32 %v2716_v43, %v6490_v31  ;;  %v2746_v15 = vadd.f32 %v2745_v46, %v6490_v31 }
 0x489   : > { %v2946_v39 = vmax.f32 %v2717_v10, 0.0  ;;  %v2947_v57 = vmax.f32 %v2746_v15, 0.0 }
 0x48b   : > { %3007 = vmatpush.msra.mxu0 %v2946_v39  ;;  %3036 = vmatpush.msra.mxu1 %v2947_v57 }
 0x48d   : > { %3008 = vmatpush.msra.mxu0 %v2938_v6  ;;  %3037 = vmatpush.msra.mxu1 %v2939_v49 }
 0x48f   : > { %3009 = vmatpush.msra.mxu0 %v2930_v36  ;;  %3038 = vmatpush.msra.mxu1 %v2931_v35 }
 0x490   : > { %v2823_v11 = vpop.f32.mrf.mxu0  ;;  %v2852_v13 = vpop.f32.mrf.mxu1 }
 0x491   : > { %3010 = vmatpush.msra.mxu0 %v2922_v48  ;;  %3039 = vmatpush.msra.mxu1 %v2923_v7  ;;  %v2824_v23 = vadd.f32 %v2823_v11, %v6502_v58  ;;  %v2853_v22 = vadd.f32 %v2852_v13, %v6502_v58 }
 0x492   : > { %4946 = vmatmul.msk.f32.vlgmr.msra.gmra.mxu0 %vm841_vm2, %v6509_v44  ;;  %4950 = vmatmul.msk.f32.vlgmr.msra.gmra.mxu1 %vm841_vm2, %v6509_v44 }
 0x493   : > { %v2926_v9 = vmax.f32 %v2824_v23, 0.0  ;;  %v2927_v24 = vmax.f32 %v2853_v22, 0.0  ;;  %v6622_v23 = vpop.permute.xlu0 %2970 }
 0x498   : > { %v2826_v8 = vpop.f32.mrf.mxu0  ;;  %v2855_v16 = vpop.f32.mrf.mxu1 }
 0x499   : > { %v2827_v25 = vadd.f32 %v2826_v8, %v6498_v50  ;;  %v2856_v60 = vadd.f32 %v2855_v16, %v6498_v50 }
 0x49a   : > { %v2765_v17 = vpop.f32.mrf.mxu2  ;;  %v2794_v18 = vpop.f32.mrf.mxu3  ;;  %4947 = vmatmul.msk.f32.gmra.mxu0 %vm841_vm2, %v6518_v54  ;;  %4951 = vmatmul.msk.f32.gmra.mxu1 %vm841_vm2, %v6518_v54 }
 0x49b   : > { %v2934_v53 = vmax.f32 %v2827_v25, 0.0  ;;  %v2935_v1 = vmax.f32 %v2856_v60, 0.0  ;;  %v2766_v4 = vadd.f32 %v2765_v17, %v6502_v58  ;;  %v2795_v5 = vadd.f32 %v2794_v18, %v6502_v58 }
 0x49d   : > { %v2924_v2 = vmax.f32 %v2766_v4, 0.0  ;;  %v2925_v3 = vmax.f32 %v2795_v5, 0.0 }
 0x4a0   : > { %v2829_v55 = vpop.f32.mrf.mxu0  ;;  %v2858_v37 = vpop.f32.mrf.mxu1 }
 0x4a1   : > { %v2830_v51 = vadd.f32 %v2829_v55, %v6492_v45  ;;  %v2859_v26 = vadd.f32 %v2858_v37, %v6492_v45 }
 0x4a2   : > { %v2768_v38 = vpop.f32.mrf.mxu2  ;;  %v2797_v40 = vpop.f32.mrf.mxu3  ;;  %4948 = vmatmul.msk.f32.gmra.mxu0 %vm841_vm2, %v6527_v20  ;;  %4952 = vmatmul.msk.f32.gmra.mxu1 %vm841_vm2, %v6527_v20 }
 0x4a3   : > { %v2942_v56 = vmax.f32 %v2830_v51, 0.0  ;;  %v2943_v14 = vmax.f32 %v2859_v26, 0.0  ;;  %v2769_v61 = vadd.f32 %v2768_v38, %v6498_v50  ;;  %v2798_v30 = vadd.f32 %v2797_v40, %v6498_v50 }
 0x4a5   : > { %v2932_v21 = vmax.f32 %v2769_v61, 0.0  ;;  %v2933_v32 = vmax.f32 %v2798_v30, 0.0  ;;  %v6633_v61 = vld [vmem:[%s7090_s6] sm:$0xff] }
 0x4a8   : > { %v2832_v62 = vpop.f32.mrf.mxu0  ;;  %v2861_v42 = vpop.f32.mrf.mxu1 }
 0x4a9   : > { %v2833_v47 = vadd.f32 %v2832_v62, %v6490_v31  ;;  %v2862_v12 = vadd.f32 %v2861_v42, %v6490_v31 }
 0x4aa   : > { %v2771_v59 = vpop.f32.mrf.mxu2  ;;  %v2800_v52 = vpop.f32.mrf.mxu3  ;;  %4949 = vmatmul.msk.f32.gmra.mxu0 %vm841_vm2, %v6536_v41  ;;  %4953 = vmatmul.msk.f32.gmra.mxu1 %vm841_vm2, %v6536_v41 }
 0x4ab   : > { %v2950_v27 = vmax.f32 %v2833_v47, 0.0  ;;  %v2951_v19 = vmax.f32 %v2862_v12, 0.0  ;;  %v2772_v28 = vadd.f32 %v2771_v59, %v6492_v45  ;;  %v2801_v34 = vadd.f32 %v2800_v52, %v6492_v45  ;;  %v6614_v52 = vpop.permute.xlu1 %2980 }
 0x4ad   : > { %3123 = vmatpush.msrb.mxu0 %v2950_v27  ;;  %3152 = vmatpush.msrb.mxu1 %v2951_v19  ;;  %v2940_v10 = vmax.f32 %v2772_v28, 0.0  ;;  %v2941_v15 = vmax.f32 %v2801_v34, 0.0 }
 0x4af   : > { %3124 = vmatpush.msrb.mxu0 %v2942_v56  ;;  %3153 = vmatpush.msrb.mxu1 %v2943_v14 }
 0x4b1   : > { %3125 = vmatpush.msrb.mxu0 %v2934_v53  ;;  %3154 = vmatpush.msrb.mxu1 %v2935_v1 }
 0x4b2   : > { %v2774_v29 = vpop.f32.mrf.mxu2  ;;  %v2803_v63 = vpop.f32.mrf.mxu3 }
 0x4b3   : > { %v2775_v33 = vadd.f32 %v2774_v29, %v6490_v31  ;;  %v2804_v0 = vadd.f32 %v2803_v63, %v6490_v31  ;;  %3126 = vmatpush.msrb.mxu0 %v2926_v9  ;;  %3155 = vmatpush.msrb.mxu1 %v2927_v24  ;;  %v6626_v1 = vpop.permute.xlu1 %2965 }
 0x4b4   : > { %4962 = vmatmul.msk.f32.vlgmr.msrb.gmra.mxu0 %vm841_vm2, %v6509_v44  ;;  %4966 = vmatmul.msk.f32.vlgmr.msrb.gmra.mxu1 %vm841_vm2, %v6509_v44 }
 0x4b5   : > { %v2948_v43 = vmax.f32 %v2775_v33, 0.0  ;;  %v2949_v46 = vmax.f32 %v2804_v0, 0.0 }
 0x4b7   : > { %3065 = vmatpush.msra.mxu2 %v2948_v43  ;;  %3094 = vmatpush.msra.mxu3 %v2949_v46  ;;  %v6642_v46 = vld [vmem:[%s7090_s6 + $0x8] sm:$0xff] }
 0x4b9   : > { %3066 = vmatpush.msra.mxu2 %v2940_v10  ;;  %3095 = vmatpush.msra.mxu3 %v2941_v15  ;;  %v6651_v10 = vld [vmem:[%s7090_s6 + $0x10] sm:$0xff] }
 0x4ba   : > { %v2881_v39 = vpop.f32.mrf.mxu2  ;;  %v2910_v57 = vpop.f32.mrf.mxu3 }
 0x4bb   : > { %3067 = vmatpush.msra.mxu2 %v2932_v21  ;;  %3096 = vmatpush.msra.mxu3 %v2933_v32  ;;  %v2882_v38 = vadd.f32 %v2881_v39, %v6502_v58 }
 0x4bc   : > { %4963 = vmatmul.msk.f32.gmra.mxu0 %vm841_vm2, %v6518_v54  ;;  %4967 = vmatmul.msk.f32.gmra.mxu1 %vm841_vm2, %v6518_v54 }
 0x4bd   : > { %3068 = vmatpush.msra.mxu2 %v2924_v2  ;;  %3097 = vmatpush.msra.mxu3 %v2925_v3 }
 0x4be   : > { %4954 = vmatmul.msk.f32.vlgmr.msra.gmra.mxu2 %vm841_vm2, %v6509_v44  ;;  %4958 = vmatmul.msk.f32.vlgmr.msra.gmra.mxu3 %vm841_vm2, %v6509_v44 }
 0x4c2   : > { %v2884_v6 = vpop.f32.mrf.mxu2  ;;  %v2913_v49 = vpop.f32.mrf.mxu3 }
 0x4c3   : > { %v2885_v17 = vadd.f32 %v2884_v6, %v6498_v50  ;;  %v2914_v18 = vadd.f32 %v2913_v49, %v6498_v50  ;;  %v2928_v50 = vmax.f32 %v2882_v38, 0.0 }
 0x4c4   : > { %4964 = vmatmul.msk.f32.gmra.mxu0 %vm841_vm2, %v6527_v20  ;;  %4968 = vmatmul.msk.f32.gmra.mxu1 %vm841_vm2, %v6527_v20 }
 0x4c5   : > { %v2937_v42 = vmax.f32 %v2914_v18, 0.0 }
 0x4c6   : > { %4955 = vmatmul.msk.f32.gmra.mxu2 %vm841_vm2, %v6518_v54  ;;  %4959 = vmatmul.msk.f32.gmra.mxu3 %vm841_vm2, %v6518_v54 }
 0x4ca   : > { %v2887_v36 = vpop.f32.mrf.mxu2  ;;  %v2916_v35 = vpop.f32.mrf.mxu3 }
 0x4cb   : > { %v2888_v11 = vadd.f32 %v2887_v36, %v6492_v45  ;;  %v2917_v13 = vadd.f32 %v2916_v35, %v6492_v45  ;;  %v2911_v45 = vadd.f32 %v2910_v57, %v6502_v58  ;;  %v6660_v57 = vld [vmem:[%s7090_s6 + $0x18] sm:$0xff] }
 0x4cc   : > { %4965 = vmatmul.msk.f32.gmra.mxu0 %vm841_vm2, %v6536_v41  ;;  %4969 = vmatmul.msk.f32.gmra.mxu1 %vm841_vm2, %v6536_v41 }
 0x4cd   : > { %v2944_v40 = vmax.f32 %v2888_v11, 0.0  ;;  %v2945_v62 = vmax.f32 %v2917_v13, 0.0  ;;  %v2929_v51 = vmax.f32 %v2911_v45, 0.0 }
 0x4ce   : > { %4956 = vmatmul.msk.f32.gmra.mxu2 %vm841_vm2, %v6527_v20  ;;  %4960 = vmatmul.msk.f32.gmra.mxu3 %vm841_vm2, %v6527_v20 }
 0x4d2   : > { %v2890_v48 = vpop.f32.mrf.mxu2  ;;  %v2919_v7 = vpop.f32.mrf.mxu3 }
 0x4d3   : > { %v2891_v8 = vadd.f32 %v2890_v48, %v6490_v31  ;;  %v2920_v16 = vadd.f32 %v2919_v7, %v6490_v31  ;;  %v2936_v31 = vmax.f32 %v2885_v17, 0.0 }
 0x4d5   : > { %v2952_v55 = vmax.f32 %v2891_v8, 0.0  ;;  %v2953_v37 = vmax.f32 %v2920_v16, 0.0 }
 0x4d6   : > { %4957 = vmatmul.msk.f32.gmra.mxu2 %vm841_vm2, %v6536_v41  ;;  %4961 = vmatmul.msk.f32.gmra.mxu3 %vm841_vm2, %v6536_v41 }
 0x4d7   : > { %3181 = vmatpush.msrb.mxu2 %v2952_v55  ;;  %3210 = vmatpush.msrb.mxu3 %v2953_v37 }
 0x4d9   : > { %3182 = vmatpush.msrb.mxu2 %v2944_v40  ;;  %3211 = vmatpush.msrb.mxu3 %v2945_v62 }
 0x4db   : > { %3183 = vmatpush.msrb.mxu2 %v2936_v31  ;;  %3212 = vmatpush.msrb.mxu3 %v2937_v42  ;;  %v6677_v31 = vld [vmem:[%s7090_s6 + $0x20] sm:$0x1] }
 0x4dd   : > { %3184 = vmatpush.msrb.mxu2 %v2928_v50  ;;  %3213 = vmatpush.msrb.mxu3 %v2929_v51 }
 0x4de   : > { %4970 = vmatmul.msk.f32.vlgmr.msrb.gmra.mxu2 %vm841_vm2, %v6509_v44  ;;  %4974 = vmatmul.msk.f32.vlgmr.msrb.gmra.mxu3 %vm841_vm2, %v6509_v44 }
 0x4e6   : > { %4971 = vmatmul.msk.f32.gmra.mxu2 %vm841_vm2, %v6518_v54  ;;  %4975 = vmatmul.msk.f32.gmra.mxu3 %vm841_vm2, %v6518_v54  ;;  %v6616_v54 = vpop.permute.xlu2 %2975 }
 0x4ee   : > { %4972 = vmatmul.msk.f32.gmra.mxu2 %vm841_vm2, %v6527_v20  ;;  %4976 = vmatmul.msk.f32.gmra.mxu3 %vm841_vm2, %v6527_v20 }
 0x4f6   : > { %4973 = vmatmul.msk.f32.gmra.mxu2 %vm841_vm2, %v6536_v41  ;;  %4977 = vmatmul.msk.f32.gmra.mxu3 %vm841_vm2, %v6536_v41 }
 0x50f   : > { %v3012_v58 = vpop.f32.mrf.mxu0  ;;  %v3041_v44 = vpop.f32.mrf.mxu1 }
 0x510   : > { %v3013_v9 = vadd.f32 %v3012_v58, %v6626_v1  ;;  %v3042_v24 = vadd.f32 %v3041_v44, %v6626_v1 }
 0x512   : > { %v3227_v33 = vmax.f32 %v3013_v9, 0.0  ;;  %v3228_v0 = vmax.f32 %v3042_v24, 0.0 }
 0x517   : > { %v3015_v26 = vpop.f32.mrf.mxu0  ;;  %v3044_v47 = vpop.f32.mrf.mxu1 }
 0x518   : > { %v3016_v22 = vadd.f32 %v3015_v26, %v6622_v23  ;;  %v3045_v56 = vadd.f32 %v3044_v47, %v6622_v23 }
 0x51a   : > { %v3235_v63 = vmax.f32 %v3016_v22, 0.0  ;;  %v3236_v34 = vmax.f32 %v3045_v56, 0.0 }
 0x51f   : > { %v3018_v12 = vpop.f32.mrf.mxu0  ;;  %v3047_v59 = vpop.f32.mrf.mxu1 }
 0x520   : > { %v3019_v20 = vadd.f32 %v3018_v12, %v6616_v54  ;;  %v3048_v27 = vadd.f32 %v3047_v59, %v6616_v54 }
 0x522   : > { %v3243_v28 = vmax.f32 %v3019_v20, 0.0  ;;  %v3244_v29 = vmax.f32 %v3048_v27, 0.0 }
 0x527   : > { %v3021_v25 = vpop.f32.mrf.mxu0  ;;  %v3050_v60 = vpop.f32.mrf.mxu1 }
 0x528   : > { %v3022_v19 = vadd.f32 %v3021_v25, %v6614_v52  ;;  %v3051_v41 = vadd.f32 %v3050_v60, %v6614_v52 }
 0x52a   : > { %v3251_v14 = vmax.f32 %v3022_v19, 0.0  ;;  %v3252_v53 = vmax.f32 %v3051_v41, 0.0 }
 0x52c   : > { %3321 = vmatpush.msra.mxu0 %v3251_v14  ;;  %3353 = vmatpush.msra.mxu1 %v3252_v53 }
 0x52e   : > { %3322 = vmatpush.msra.mxu0 %v3243_v28  ;;  %3354 = vmatpush.msra.mxu1 %v3244_v29 }
 0x530   : > { %3323 = vmatpush.msra.mxu0 %v3235_v63  ;;  %3355 = vmatpush.msra.mxu1 %v3236_v34 }
 0x531   : > { %v3128_v30 = vpop.f32.mrf.mxu0  ;;  %v3157_v43 = vpop.f32.mrf.mxu1 }
 0x532   : > { %3324 = vmatpush.msra.mxu0 %v3227_v33  ;;  %3356 = vmatpush.msra.mxu1 %v3228_v0  ;;  %v3129_v17 = vadd.f32 %v3128_v30, %v6626_v1  ;;  %v3158_v18 = vadd.f32 %v3157_v43, %v6626_v1 }
 0x533   : > { %4978 = vmatmul.msk.f32.vlgmr.msra.gmra.mxu0 %vm841_vm2, %v6633_v61  ;;  %4983 = vmatmul.msk.f32.vlgmr.msra.gmra.mxu1 %vm841_vm2, %v6633_v61 }
 0x534   : > { %v3231_v42 = vmax.f32 %v3129_v17, 0.0  ;;  %v3232_v50 = vmax.f32 %v3158_v18, 0.0 }
 0x539   : > { %v3131_v4 = vpop.f32.mrf.mxu0  ;;  %v3160_v5 = vpop.f32.mrf.mxu1 }
 0x53a   : > { %v3132_v11 = vadd.f32 %v3131_v4, %v6622_v23  ;;  %v3161_v13 = vadd.f32 %v3160_v5, %v6622_v23 }
 0x53b   : > { %4979 = vmatmul.msk.f32.gmra.mxu0 %vm841_vm2, %v6642_v46  ;;  %4984 = vmatmul.msk.f32.gmra.mxu1 %vm841_vm2, %v6642_v46 }
 0x53c   : > { %v3239_v38 = vmax.f32 %v3132_v11, 0.0  ;;  %v3240_v45 = vmax.f32 %v3161_v13, 0.0  ;;  %v3712_v11 = vld.sshfl [vmem:[#allocation1 + $0x20] sm:$0xff pattern:$0x75316420] }
 0x53d   : > { %v3713_v13 = vld.sshfl [vmem:[#allocation1 + $0x28] sm:$0xff pattern:$0x75316420] }
 0x541   : > { %v3070_v15 = vpop.f32.mrf.mxu2  ;;  %v3099_v21 = vpop.f32.mrf.mxu3 }
 0x542   : > { %v3134_v32 = vpop.f32.mrf.mxu0  ;;  %v3163_v39 = vpop.f32.mrf.mxu1  ;;  %v3071_v27 = vadd.f32 %v3070_v15, %v6626_v1  ;;  %v3100_v19 = vadd.f32 %v3099_v21, %v6626_v1 }
 0x543   : > { %4980 = vmatmul.msk.f32.gmra.mxu0 %vm841_vm2, %v6651_v10  ;;  %4985 = vmatmul.msk.f32.gmra.mxu1 %vm841_vm2, %v6651_v10  ;;  %v3135_v6 = vadd.f32 %v3134_v32, %v6616_v54  ;;  %v3164_v35 = vadd.f32 %v3163_v39, %v6616_v54 }
 0x544   : > { %v3229_v24 = vmax.f32 %v3071_v27, 0.0  ;;  %v3230_v28 = vmax.f32 %v3100_v19, 0.0 }
 0x545   : > { %v3247_v55 = vmax.f32 %v3135_v6, 0.0  ;;  %v3248_v37 = vmax.f32 %v3164_v35, 0.0 }
 0x549   : > { %v3073_v2 = vpop.f32.mrf.mxu2  ;;  %v3102_v3 = vpop.f32.mrf.mxu3 }
 0x54a   : > { %v3137_v49 = vpop.f32.mrf.mxu0  ;;  %v3166_v36 = vpop.f32.mrf.mxu1  ;;  %v3074_v59 = vadd.f32 %v3073_v2, %v6622_v23  ;;  %v3103_v25 = vadd.f32 %v3102_v3, %v6622_v23 }
 0x54b   : > { %v3138_v48 = vadd.f32 %v3137_v49, %v6614_v52  ;;  %v3167_v7 = vadd.f32 %v3166_v36, %v6614_v52  ;;  %4981 = vmatmul.msk.f32.gmra.mxu0 %vm841_vm2, %v6660_v57  ;;  %4986 = vmatmul.msk.f32.gmra.mxu1 %vm841_vm2, %v6660_v57 }
 0x54c   : > { %v3237_v56 = vmax.f32 %v3074_v59, 0.0  ;;  %v3238_v14 = vmax.f32 %v3103_v25, 0.0  ;;  %v6814_v59 = vld [vmem:[%s7092_s8] sm:$0xff] }
 0x54d   : > { %v3255_v8 = vmax.f32 %v3138_v48, 0.0  ;;  %v3256_v16 = vmax.f32 %v3167_v7, 0.0  ;;  %v3709_v48 = vld.sshfl [vmem:[#allocation1 + $0x8] sm:$0xff pattern:$0x75316420]  ;;  %v6748_v7 = vld [vmem:[%s7093_s9] sm:$0xff] }
 0x54f   : > { %3449 = vmatpush.msrb.mxu0 %v3255_v8  ;;  %3481 = vmatpush.msrb.mxu1 %v3256_v16 }
 0x551   : > { %3450 = vmatpush.msrb.mxu0 %v3247_v55  ;;  %3482 = vmatpush.msrb.mxu1 %v3248_v37  ;;  %v3076_v40 = vpop.f32.mrf.mxu2  ;;  %v3105_v62 = vpop.f32.mrf.mxu3 }
 0x552   : > { %v3077_v44 = vadd.f32 %v3076_v40, %v6616_v54  ;;  %v3106_v26 = vadd.f32 %v3105_v62, %v6616_v54  ;;  %v6789_v55 = vpop.permute.xlu2 %3286  ;;  %v6793_v40 = vpop.permute.xlu0 %3281  ;;  %v3710_v62 = vld.sshfl [vmem:[#allocation1 + $0x10] sm:$0xff pattern:$0x75316420] }
 0x553   : > { %3451 = vmatpush.msrb.mxu0 %v3239_v38  ;;  %3483 = vmatpush.msrb.mxu1 %v3240_v45 }
 0x554   : > { %4982 = vmatmul.msk.f32.gmra.mxu0 %vm841_vm2, %v6677_v31  ;;  %4987 = vmatmul.msk.f32.gmra.mxu1 %vm841_vm2, %v6677_v31  ;;  %v3245_v41 = vmax.f32 %v3077_v44, 0.0  ;;  %v3246_v22 = vmax.f32 %v3106_v26, 0.0 }
 0x555   : > { %3452 = vmatpush.msrb.mxu0 %v3231_v42  ;;  %3484 = vmatpush.msrb.mxu1 %v3232_v50  ;;  %v3711_v42 = vld.sshfl [vmem:[#allocation1 + $0x18] sm:$0xff pattern:$0x75316420] }
 0x557   : > { %5021 = vmatpush.msk.msra.mxu1 %vm532_vm0, %v3709_v48 }
 0x559   : > { %v3079_v51 = vpop.f32.mrf.mxu2  ;;  %v3108_v58 = vpop.f32.mrf.mxu3 }
 0x55a   : > { %v3080_v47 = vadd.f32 %v3079_v51, %v6614_v52  ;;  %v3109_v12 = vadd.f32 %v3108_v58, %v6614_v52  ;;  %v6797_v51 = vpop.permute.xlu1 %3276  ;;  %v6803_v26 = vpop.permute.xlu2 %3271 }
 0x55c   : > { %v3253_v60 = vmax.f32 %v3080_v47, 0.0  ;;  %v3254_v20 = vmax.f32 %v3109_v12, 0.0  ;;  %4998 = vmatmul.msk.f32.vlgmr.msrb.gmra.mxu0 %vm841_vm2, %v6633_v61  ;;  %5003 = vmatmul.msk.f32.vlgmr.msrb.gmra.mxu1 %vm841_vm2, %v6633_v61 }
 0x55d   : > { %5033 = vmatpush.msk.msrb.mxu1 %vm532_vm0, %v3713_v13 }
 0x55e   : > { %3385 = vmatpush.msra.mxu2 %v3253_v60  ;;  %3417 = vmatpush.msra.mxu3 %v3254_v20  ;;  %v6831_v20 = vld [vmem:[%s7092_s8 + $0x8] sm:$0xff] }
 0x560   : > { %3386 = vmatpush.msra.mxu2 %v3245_v41  ;;  %3418 = vmatpush.msra.mxu3 %v3246_v22  ;;  %v3714_v41 = vld.sshfl [vmem:[#allocation1 + $0x30] sm:$0xff pattern:$0x75316420]  ;;  %v3715_v22 = vld.sshfl [vmem:[#allocation1 + $0x38] sm:$0xff pattern:$0x75316420] }
 0x561   : > { %v3186_v53 = vpop.f32.mrf.mxu2  ;;  %v3215_v9 = vpop.f32.mrf.mxu3 }
 0x562   : > { %3387 = vmatpush.msra.mxu2 %v3237_v56  ;;  %3419 = vmatpush.msra.mxu3 %v3238_v14 }
 0x564   : > { %3388 = vmatpush.msra.mxu2 %v3229_v24  ;;  %3420 = vmatpush.msra.mxu3 %v3230_v28 }
 0x565   : > { %4988 = vmatmul.msk.f32.vlgmr.msra.gmra.mxu2 %vm841_vm2, %v6633_v61  ;;  %4993 = vmatmul.msk.f32.vlgmr.msra.gmra.mxu3 %vm841_vm2, %v6633_v61 }
 0x566   : > { %4999 = vmatmul.msk.f32.gmra.mxu0 %vm841_vm2, %v6642_v46  ;;  %5004 = vmatmul.msk.f32.gmra.mxu1 %vm841_vm2, %v6642_v46 }
 0x569   : > { %v3189_v29 = vpop.f32.mrf.mxu2  ;;  %v3218_v63 = vpop.f32.mrf.mxu3 }
 0x56a   : > { %v3190_v39 = vadd.f32 %v3189_v29, %v6622_v23  ;;  %v3219_v2 = vadd.f32 %v3218_v63, %v6622_v23 }
 0x56c   : > { %v3241_v23 = vmax.f32 %v3190_v39, 0.0  ;;  %v3242_v49 = vmax.f32 %v3219_v2, 0.0 }
 0x56d   : > { %4989 = vmatmul.msk.f32.gmra.mxu2 %vm841_vm2, %v6642_v46  ;;  %4994 = vmatmul.msk.f32.gmra.mxu3 %vm841_vm2, %v6642_v46 }
 0x56e   : > { %5000 = vmatmul.msk.f32.gmra.mxu0 %vm841_vm2, %v6651_v10  ;;  %5005 = vmatmul.msk.f32.gmra.mxu1 %vm841_vm2, %v6651_v10 }
 0x571   : > { %v3192_v34 = vpop.f32.mrf.mxu2  ;;  %v3221_v33 = vpop.f32.mrf.mxu3 }
 0x572   : > { %v3193_v5 = vadd.f32 %v3192_v34, %v6616_v54  ;;  %v3222_v15 = vadd.f32 %v3221_v33, %v6616_v54  ;;  %v3216_v54 = vadd.f32 %v3215_v9, %v6626_v1 }
 0x574   : > { %v3249_v3 = vmax.f32 %v3193_v5, 0.0  ;;  %v3250_v6 = vmax.f32 %v3222_v15, 0.0  ;;  %v3234_v35 = vmax.f32 %v3216_v54, 0.0 }
 0x575   : > { %4990 = vmatmul.msk.f32.gmra.mxu2 %vm841_vm2, %v6651_v10  ;;  %4995 = vmatmul.msk.f32.gmra.mxu3 %vm841_vm2, %v6651_v10 }
 0x576   : > { %5001 = vmatmul.msk.f32.gmra.mxu0 %vm841_vm2, %v6660_v57  ;;  %5006 = vmatmul.msk.f32.gmra.mxu1 %vm841_vm2, %v6660_v57 }
 0x579   : > { %v3195_v0 = vpop.f32.mrf.mxu2  ;;  %v3224_v30 = vpop.f32.mrf.mxu3 }
 0x57a   : > { %v3196_v43 = vadd.f32 %v3195_v0, %v6614_v52  ;;  %v3225_v4 = vadd.f32 %v3224_v30, %v6614_v52  ;;  %v3187_v52 = vadd.f32 %v3186_v53, %v6626_v1  ;;  %v3708_v1 = vld.sshfl [vmem:[#allocation1] sm:$0xff pattern:$0x75316420] }
 0x57b   : > { %5018 = vmatpush.msk.msra.mxu0 %vm532_vm0, %v3708_v1 }
 0x57c   : > { %v3257_v21 = vmax.f32 %v3196_v43, 0.0  ;;  %v3258_v32 = vmax.f32 %v3225_v4, 0.0  ;;  %v3233_v36 = vmax.f32 %v3187_v52, 0.0 }
 0x57d   : > { %4991 = vmatmul.msk.f32.gmra.mxu2 %vm841_vm2, %v6660_v57  ;;  %4996 = vmatmul.msk.f32.gmra.mxu3 %vm841_vm2, %v6660_v57 }
 0x57e   : > { %5002 = vmatmul.msk.f32.gmra.mxu0 %vm841_vm2, %v6677_v31  ;;  %5007 = vmatmul.msk.f32.gmra.mxu1 %vm841_vm2, %v6677_v31 }
 0x57f   : > { %3513 = vmatpush.msrb.mxu2 %v3257_v21  ;;  %3545 = vmatpush.msrb.mxu3 %v3258_v32 }
 0x580   : > { %5030 = vmatpush.msk.msrb.mxu0 %vm532_vm0, %v3712_v11 }
 0x581   : > { %3514 = vmatpush.msrb.mxu2 %v3249_v3  ;;  %3546 = vmatpush.msrb.mxu3 %v3250_v6 }
 0x583   : > { %3515 = vmatpush.msrb.mxu2 %v3241_v23  ;;  %3547 = vmatpush.msrb.mxu3 %v3242_v49 }
 0x585   : > { %3516 = vmatpush.msrb.mxu2 %v3233_v36  ;;  %3548 = vmatpush.msrb.mxu3 %v3234_v35 }
 0x586   : > { %4992 = vmatmul.msk.f32.gmra.mxu2 %vm841_vm2, %v6677_v31  ;;  %4997 = vmatmul.msk.f32.gmra.mxu3 %vm841_vm2, %v6677_v31 }
 0x587   : > { %5019 = vmatmul.msk.f32.vlgmr.msra.gmra.mxu0 %vm519_vm1, %v6748_v7  ;;  %5022 = vmatmul.msk.f32.vlgmr.msra.gmra.mxu1 %vm519_vm1, %v6748_v7 }
 0x588   : > { %5024 = vmatpush.msk.msra.mxu2 %vm532_vm0, %v3710_v62  ;;  %5027 = vmatpush.msk.msra.mxu3 %vm532_vm0, %v3711_v42 }
 0x58e   : > { %5008 = vmatmul.msk.f32.vlgmr.msrb.gmra.mxu2 %vm841_vm2, %v6633_v61  ;;  %5013 = vmatmul.msk.f32.vlgmr.msrb.gmra.mxu3 %vm841_vm2, %v6633_v61  ;;  %v6761_v61 = vld [vmem:[%s7093_s9 + $0x8] sm:$0xff] }
 0x58f   : > { %5020 = vmatmul.msk.f32.gmra.mxu0 %vm519_vm1, %v6761_v61  ;;  %5023 = vmatmul.msk.f32.gmra.mxu1 %vm519_vm1, %v6761_v61 }
 0x590   : > { %5036 = vmatpush.msk.msrb.mxu2 %vm532_vm0, %v3714_v41  ;;  %5039 = vmatpush.msk.msrb.mxu3 %vm532_vm0, %v3715_v22 }
 0x596   : > { %5009 = vmatmul.msk.f32.gmra.mxu2 %vm841_vm2, %v6642_v46  ;;  %5014 = vmatmul.msk.f32.gmra.mxu3 %vm841_vm2, %v6642_v46 }
 0x597   : > { %5031 = vmatmul.msk.f32.vlgmr.msrb.gmra.mxu0 %vm519_vm1, %v6748_v7  ;;  %5034 = vmatmul.msk.f32.vlgmr.msrb.gmra.mxu1 %vm519_vm1, %v6748_v7 }
 0x59e   : > { %5010 = vmatmul.msk.f32.gmra.mxu2 %vm841_vm2, %v6651_v10  ;;  %5015 = vmatmul.msk.f32.gmra.mxu3 %vm841_vm2, %v6651_v10 }
 0x59f   : > { %5032 = vmatmul.msk.f32.gmra.mxu0 %vm519_vm1, %v6761_v61  ;;  %5035 = vmatmul.msk.f32.gmra.mxu1 %vm519_vm1, %v6761_v61 }
 0x5a6   : > { %5011 = vmatmul.msk.f32.gmra.mxu2 %vm841_vm2, %v6660_v57  ;;  %5016 = vmatmul.msk.f32.gmra.mxu3 %vm841_vm2, %v6660_v57 }
 0x5ae   : > { %5012 = vmatmul.msk.f32.gmra.mxu2 %vm841_vm2, %v6677_v31  ;;  %5017 = vmatmul.msk.f32.gmra.mxu3 %vm841_vm2, %v6677_v31 }
 0x5b0   : > { %v3326_v46 = vpop.f32.mrf.mxu0  ;;  %v3358_v10 = vpop.f32.mrf.mxu1 }
 0x5b1   : > { %v3327_v47 = vadd.f32 %v3326_v46, %v6803_v26  ;;  %v3359_v12 = vadd.f32 %v3358_v10, %v6803_v26 }
 0x5b6   : > { %5025 = vmatmul.msk.f32.vlgmr.msra.gmra.mxu2 %vm519_vm1, %v6748_v7  ;;  %5028 = vmatmul.msk.f32.vlgmr.msra.gmra.mxu3 %vm519_vm1, %v6748_v7 }
 0x5b8   : > { %v3329_v8 = vpop.f32.mrf.mxu0  ;;  %v3361_v16 = vpop.f32.mrf.mxu1 }
 0x5b9   : > { %v3330_v58 = vadd.f32 %v3329_v8, %v6797_v51  ;;  %v3362_v44 = vadd.f32 %v3361_v16, %v6797_v51 }
 0x5be   : > { %5026 = vmatmul.msk.f32.gmra.mxu2 %vm519_vm1, %v6761_v61  ;;  %5029 = vmatmul.msk.f32.gmra.mxu3 %vm519_vm1, %v6761_v61 }
 0x5c0   : > { %v3332_v17 = vpop.f32.mrf.mxu0  ;;  %v3364_v18 = vpop.f32.mrf.mxu1 }
 0x5c1   : > { %v3333_v31 = vadd.f32 %v3332_v17, %v6793_v40  ;;  %v3365_v50 = vadd.f32 %v3364_v18, %v6793_v40 }
 0x5c6   : > { %5037 = vmatmul.msk.f32.vlgmr.msrb.gmra.mxu2 %vm519_vm1, %v6748_v7  ;;  %5040 = vmatmul.msk.f32.vlgmr.msrb.gmra.mxu3 %vm519_vm1, %v6748_v7 }
 0x5c8   : > { %v3335_v57 = vpop.f32.mrf.mxu0  ;;  %v3367_v37 = vpop.f32.mrf.mxu1 }
 0x5c9   : > { %v3336_v38 = vadd.f32 %v3335_v57, %v6789_v55  ;;  %v3368_v45 = vadd.f32 %v3367_v37, %v6789_v55 }
 0x5cb   : > { %3940 = vmatpush.msra.mxu0 %v3336_v38  ;;  %3963 = vmatpush.msra.mxu1 %v3368_v45 }
 0x5cd   : > { %3941 = vmatpush.msra.mxu0 %v3333_v31  ;;  %3964 = vmatpush.msra.mxu1 %v3365_v50 }
 0x5ce   : > { %5038 = vmatmul.msk.f32.gmra.mxu2 %vm519_vm1, %v6761_v61  ;;  %5041 = vmatmul.msk.f32.gmra.mxu3 %vm519_vm1, %v6761_v61 }
 0x5cf   : > { %3942 = vmatpush.msra.mxu0 %v3330_v58  ;;  %3965 = vmatpush.msra.mxu1 %v3362_v44 }
 0x5d1   : > { %v6816_v25 = vpop.f32.mrf.mxu0  ;;  %v6818_v60 = vpop.f32.mrf.mxu1  ;;  %3943 = vmatpush.msra.mxu0 %v3327_v47  ;;  %3966 = vmatpush.msra.mxu1 %v3359_v12 }
 0x5d2   : > { %5042 = vmatmul.msk.f32.vlgmr.msra.gmra.mxu0 %vm841_vm2, %v6814_v59  ;;  %5044 = vmatmul.msk.f32.vlgmr.msra.gmra.mxu1 %vm841_vm2, %v6814_v59 }
 0x5d9   : > { %v3454_v27 = vpop.f32.mrf.mxu0  ;;  %v3486_v19 = vpop.f32.mrf.mxu1 }
 0x5da   : > { %5043 = vmatmul.msk.f32.gmra.mxu0 %vm841_vm2, %v6831_v20  ;;  %5045 = vmatmul.msk.f32.gmra.mxu1 %vm841_vm2, %v6831_v20  ;;  %v3455_v39 = vadd.f32 %v3454_v27, %v6803_v26  ;;  %v3487_v2 = vadd.f32 %v3486_v19, %v6803_v26 }
 0x5e3   : > { %v3457_v56 = vpop.f32.mrf.mxu0  ;;  %v3489_v14 = vpop.f32.mrf.mxu1 }
 0x5e4   : > { %v3458_v5 = vadd.f32 %v3457_v56, %v6797_v51  ;;  %v3490_v15 = vadd.f32 %v3489_v14, %v6797_v51 }
 0x5e8   : > { %v3390_v53 = vpop.f32.mrf.mxu2  ;;  %v3422_v9 = vpop.f32.mrf.mxu3 }
 0x5e9   : > { %v3391_v1 = vadd.f32 %v3390_v53, %v6803_v26  ;;  %v3423_v48 = vadd.f32 %v3422_v9, %v6803_v26 }
 0x5eb   : > { %v3460_v24 = vpop.f32.mrf.mxu0  ;;  %v3492_v28 = vpop.f32.mrf.mxu1 }
 0x5ec   : > { %v3461_v43 = vadd.f32 %v3460_v24, %v6793_v40  ;;  %v3493_v4 = vadd.f32 %v3492_v28, %v6793_v40 }
 0x5f0   : > { %v3393_v29 = vpop.f32.mrf.mxu2  ;;  %v3425_v63 = vpop.f32.mrf.mxu3 }
 0x5f1   : > { %v3394_v36 = vadd.f32 %v3393_v29, %v6797_v51  ;;  %v3426_v35 = vadd.f32 %v3425_v63, %v6797_v51  ;;  %v6903_v29 = vpop.permute.xlu0 %4121 }
 0x5f3   : > { %v3463_v34 = vpop.f32.mrf.mxu0  ;;  %v3495_v33 = vpop.f32.mrf.mxu1 }
 0x5f4   : > { %v3464_v0 = vadd.f32 %v3463_v34, %v6789_v55  ;;  %v3496_v30 = vadd.f32 %v3495_v33, %v6789_v55 }
 0x5f6   : > { %4032 = vmatpush.msrb.mxu0 %v3464_v0  ;;  %4055 = vmatpush.msrb.mxu1 %v3496_v30 }
 0x5f8   : > { %4033 = vmatpush.msrb.mxu0 %v3461_v43  ;;  %4056 = vmatpush.msrb.mxu1 %v3493_v4  ;;  %v3396_v21 = vpop.f32.mrf.mxu2  ;;  %v3428_v32 = vpop.f32.mrf.mxu3 }
 0x5f9   : > { %v3397_v23 = vadd.f32 %v3396_v21, %v6793_v40  ;;  %v3429_v49 = vadd.f32 %v3428_v32, %v6793_v40  ;;  %v6918_v21 = vld [vmem:[%s7095_s11] sm:$0x7] }
 0x5fa   : > { %4034 = vmatpush.msrb.mxu0 %v3458_v5  ;;  %4057 = vmatpush.msrb.mxu1 %v3490_v15 }
 0x5fb   : > { %v6883_v8 = vpop.f32.mrf.mxu0  ;;  %v6885_v16 = vpop.f32.mrf.mxu1 }
 0x5fc   : > { %4035 = vmatpush.msrb.mxu0 %v3455_v39  ;;  %4058 = vmatpush.msrb.mxu1 %v3487_v2 }
 0x5fd   : > { %5050 = vmatmul.msk.f32.vlgmr.msrb.gmra.mxu0 %vm841_vm2, %v6814_v59  ;;  %5052 = vmatmul.msk.f32.vlgmr.msrb.gmra.mxu1 %vm841_vm2, %v6814_v59 }
 0x600   : > { %v3399_v52 = vpop.f32.mrf.mxu2  ;;  %v3431_v54 = vpop.f32.mrf.mxu3 }
 0x601   : > { %v3400_v3 = vadd.f32 %v3399_v52, %v6789_v55  ;;  %v3432_v6 = vadd.f32 %v3431_v54, %v6789_v55 }
 0x603   : > { %3986 = vmatpush.msra.mxu2 %v3400_v3  ;;  %4009 = vmatpush.msra.mxu3 %v3432_v6 }
 0x604   : > { %v3755_v57 = vpop.f32.mrf.mxu0  ;;  %v3778_v37 = vpop.f32.mrf.mxu1 }
 0x605   : > { %5051 = vmatmul.msk.f32.gmra.mxu0 %vm841_vm2, %v6831_v20  ;;  %5053 = vmatmul.msk.f32.gmra.mxu1 %vm841_vm2, %v6831_v20 }
 0x606   : > { %3987 = vmatpush.msra.mxu2 %v3397_v23  ;;  %4010 = vmatpush.msra.mxu3 %v3429_v49 }
 0x608   : > { %3988 = vmatpush.msra.mxu2 %v3394_v36  ;;  %4011 = vmatpush.msra.mxu3 %v3426_v35 }
 0x609   : > { %v6871_v7 = vpop.f32.mrf.mxu2  ;;  %v6873_v61 = vpop.f32.mrf.mxu3 }
 0x60a   : > { %3989 = vmatpush.msra.mxu2 %v3391_v1  ;;  %4012 = vmatpush.msra.mxu3 %v3423_v48 }
 0x60b   : > { %5046 = vmatmul.msk.f32.vlgmr.msra.gmra.mxu2 %vm841_vm2, %v6814_v59  ;;  %5048 = vmatmul.msk.f32.vlgmr.msra.gmra.mxu3 %vm841_vm2, %v6814_v59 }
 0x60c   : > { %v3758_v27 = vpop.f32.mrf.mxu0 }
 0x611   : > { %v3518_v11 = vpop.f32.mrf.mxu2  ;;  %v3550_v13 = vpop.f32.mrf.mxu3 }
 0x612   : > { %v3519_v47 = vadd.f32 %v3518_v11, %v6803_v26  ;;  %v3551_v12 = vadd.f32 %v3550_v13, %v6803_v26 }
 0x613   : > { %5047 = vmatmul.msk.f32.gmra.mxu2 %vm841_vm2, %v6831_v20  ;;  %5049 = vmatmul.msk.f32.gmra.mxu3 %vm841_vm2, %v6831_v20 }
 0x619   : > { %v3521_v46 = vpop.f32.mrf.mxu2  ;;  %v3553_v10 = vpop.f32.mrf.mxu3 }
 0x61a   : > { %v3522_v58 = vadd.f32 %v3521_v46, %v6797_v51  ;;  %v3554_v44 = vadd.f32 %v3553_v10, %v6797_v51 }
 0x621   : > { %v3524_v17 = vpop.f32.mrf.mxu2  ;;  %v3556_v18 = vpop.f32.mrf.mxu3 }
 0x622   : > { %v3525_v31 = vadd.f32 %v3524_v17, %v6793_v40  ;;  %v3557_v50 = vadd.f32 %v3556_v18, %v6793_v40  ;;  %v3847_v40 = vpop.f32.mrf.mxu0 }
 0x629   : > { %v3527_v38 = vpop.f32.mrf.mxu2  ;;  %v3559_v45 = vpop.f32.mrf.mxu3 }
 0x62a   : > { %v3528_v62 = vadd.f32 %v3527_v38, %v6789_v55  ;;  %v3560_v42 = vadd.f32 %v3559_v45, %v6789_v55  ;;  %v3781_v55 = vpop.f32.mrf.mxu1  ;;  %v3850_v26 = vpop.f32.mrf.mxu0 }
 0x62c   : > { %4078 = vmatpush.msrb.mxu2 %v3528_v62  ;;  %4101 = vmatpush.msrb.mxu3 %v3560_v42 }
 0x62e   : > { %4079 = vmatpush.msrb.mxu2 %v3525_v31  ;;  %4102 = vmatpush.msrb.mxu3 %v3557_v50 }
 0x630   : > { %4080 = vmatpush.msrb.mxu2 %v3522_v58  ;;  %4103 = vmatpush.msrb.mxu3 %v3554_v44 }
 0x631   : > { %v6911_v43 = vpop.f32.mrf.mxu2  ;;  %v6913_v4 = vpop.f32.mrf.mxu3 }
 0x632   : > { %4081 = vmatpush.msrb.mxu2 %v3519_v47  ;;  %4104 = vmatpush.msrb.mxu3 %v3551_v12  ;;  %v3870_v51 = vpop.f32.mrf.mxu1 }
 0x633   : > { %5054 = vmatmul.msk.f32.vlgmr.msrb.gmra.mxu2 %vm841_vm2, %v6814_v59  ;;  %5056 = vmatmul.msk.f32.vlgmr.msrb.gmra.mxu3 %vm841_vm2, %v6814_v59  ;;  %v6905_v59 = vpop.permute.xlu1 %4116 }
 0x639   : > { %v3801_v32 = vpop.f32.mrf.mxu2  ;;  %v3824_v39 = vpop.f32.mrf.mxu3 }
 0x63a   : > { %v3873_v19 = vpop.f32.mrf.mxu1 }
 0x63b   : > { %5055 = vmatmul.msk.f32.gmra.mxu2 %vm841_vm2, %v6831_v20  ;;  %5057 = vmatmul.msk.f32.gmra.mxu3 %vm841_vm2, %v6831_v20 }
 0x641   : > { %v3804_v2 = vpop.f32.mrf.mxu2  ;;  %v3827_v52 = vpop.f32.mrf.mxu3 }
 0x649   : > { %v3893_v54 = vpop.f32.mrf.mxu2  ;;  %v3916_v3 = vpop.f32.mrf.mxu3 }
 0x64f   : > { %v3945_v41 = vpop.f32.mrf.mxu0  ;;  %v3968_v22 = vpop.f32.mrf.mxu1 }
 0x650   : > { %v3946_v56 = vadd.f32 %v3945_v41, %v3755_v57  ;;  %v3969_v14 = vadd.f32 %v3968_v22, %v3778_v37 }
 0x651   : > { %v3896_v13 = vpop.f32.mrf.mxu2  ;;  %v3919_v46 = vpop.f32.mrf.mxu3 }
 0x652   : > { %v4124_v63 = vadd.f32 %v6905_v59, %v3946_v56  ;;  %v4125_v20 = vadd.f32 %v6905_v59, %v3969_v14 }
 0x654   : > { %v4140_v5 = vmax.f32 %v4124_v63, 0.0  ;;  %v4141_v15 = vmax.f32 %v4125_v20, 0.0 }
 0x657   : > { %v3948_v53 = vpop.f32.mrf.mxu0  ;;  %v3971_v9 = vpop.f32.mrf.mxu1 }
 0x658   : > { %v3949_v24 = vadd.f32 %v3948_v53, %v3758_v27  ;;  %v3972_v28 = vadd.f32 %v3971_v9, %v3781_v55 }
 0x65a   : > { %v4132_v34 = vadd.f32 %v6903_v29, %v3949_v24  ;;  %v4133_v33 = vadd.f32 %v6903_v29, %v3972_v28 }
 0x65c   : > { %v4148_v0 = vmax.f32 %v4132_v34, 0.0  ;;  %v4149_v30 = vmax.f32 %v4133_v33, 0.0 }
 0x65e   : > { %4181 = vmatpush.msra.mxu0 %v4148_v0  ;;  %4201 = vmatpush.msra.mxu1 %v4149_v30 }
 0x660   : > { %4182 = vmatpush.msra.mxu0 %v4140_v5  ;;  %4202 = vmatpush.msra.mxu1 %v4141_v15 }
 0x661   : > { %5058 = vmatmul.msk.f32.vlgmr.msra.gmra.mxu0 %vm4163_vm3, %v6918_v21  ;;  %5059 = vmatmul.msk.f32.vlgmr.msra.gmra.mxu1 %vm4163_vm3, %v6918_v21 }
 0x67a   : > { %v4037_v6 = vpop.f32.mrf.mxu0  ;;  %v4060_v23 = vpop.f32.mrf.mxu1 }
 0x67b   : > { %v4038_v49 = vadd.f32 %v4037_v6, %v3847_v40  ;;  %v4061_v36 = vadd.f32 %v4060_v23, %v3870_v51  ;;  %v6959_v23 = vpop.permute.xlu2 %4160 }
 0x67d   : > { %v4128_v10 = vadd.f32 %v6905_v59, %v4038_v49  ;;  %v4129_v17 = vadd.f32 %v6905_v59, %v4061_v36 }
 0x67f   : > { %v4144_v45 = vmax.f32 %v4128_v10, 0.0  ;;  %v4145_v62 = vmax.f32 %v4129_v17, 0.0 }
 0x682   : > { %v4040_v35 = vpop.f32.mrf.mxu0  ;;  %v4063_v1 = vpop.f32.mrf.mxu1 }
 0x683   : > { %v4041_v48 = vadd.f32 %v4040_v35, %v3850_v26  ;;  %v4064_v11 = vadd.f32 %v4063_v1, %v3873_v19 }
 0x685   : > { %v4136_v18 = vadd.f32 %v6903_v29, %v4041_v48  ;;  %v4137_v57 = vadd.f32 %v6903_v29, %v4064_v11 }
 0x687   : > { %v4152_v37 = vmax.f32 %v4136_v18, 0.0  ;;  %v4153_v38 = vmax.f32 %v4137_v57, 0.0 }
 0x689   : > { %4261 = vmatpush.msrb.mxu0 %v4152_v37  ;;  %4281 = vmatpush.msrb.mxu1 %v4153_v38 }
 0x68b   : > { %4262 = vmatpush.msrb.mxu0 %v4144_v45  ;;  %4282 = vmatpush.msrb.mxu1 %v4145_v62 }
 0x68c   : > { %5062 = vmatmul.msk.f32.vlgmr.msrb.gmra.mxu0 %vm4163_vm3, %v6918_v21  ;;  %5063 = vmatmul.msk.f32.vlgmr.msrb.gmra.mxu1 %vm4163_vm3, %v6918_v21 }
 0x68e   : > { %v3991_v42 = vpop.f32.mrf.mxu2  ;;  %v4014_v31 = vpop.f32.mrf.mxu3 }
 0x68f   : > { %v3992_v50 = vadd.f32 %v3991_v42, %v3801_v32  ;;  %v4015_v58 = vadd.f32 %v4014_v31, %v3824_v39 }
 0x691   : > { %v4126_v55 = vadd.f32 %v6905_v59, %v3992_v50  ;;  %v4127_v40 = vadd.f32 %v6905_v59, %v4015_v58 }
 0x693   : > { %v4142_v22 = vmax.f32 %v4126_v55, 0.0  ;;  %v4143_v56 = vmax.f32 %v4127_v40, 0.0 }
 0x696   : > { %v3994_v44 = vpop.f32.mrf.mxu2  ;;  %v4017_v47 = vpop.f32.mrf.mxu3 }
 0x697   : > { %v3995_v12 = vadd.f32 %v3994_v44, %v3804_v2  ;;  %v4018_v27 = vadd.f32 %v4017_v47, %v3827_v52  ;;  %v6948_v52 = vpop.permute.xlu0 %3291 }
 0x699   : > { %v4134_v51 = vadd.f32 %v6903_v29, %v3995_v12  ;;  %v4135_v26 = vadd.f32 %v6903_v29, %v4018_v27 }
 0x69b   : > { %v4150_v19 = vmax.f32 %v4134_v51, 0.0  ;;  %v4151_v41 = vmax.f32 %v4135_v26, 0.0 }
 0x69d   : > { %4221 = vmatpush.msra.mxu2 %v4150_v19  ;;  %4241 = vmatpush.msra.mxu3 %v4151_v41 }
 0x69f   : > { %4222 = vmatpush.msra.mxu2 %v4142_v22  ;;  %4242 = vmatpush.msra.mxu3 %v4143_v56 }
 0x6a0   : > { %5060 = vmatmul.msk.f32.vlgmr.msra.gmra.mxu2 %vm4163_vm3, %v6918_v21  ;;  %5061 = vmatmul.msk.f32.vlgmr.msra.gmra.mxu3 %vm4163_vm3, %v6918_v21 }
 0x6b6   : > { %v4083_v14 = vpop.f32.mrf.mxu2  ;;  %v4106_v53 = vpop.f32.mrf.mxu3 }
 0x6b7   : > { %v4084_v9 = vadd.f32 %v4083_v14, %v3893_v54  ;;  %v4107_v24 = vadd.f32 %v4106_v53, %v3916_v3 }
 0x6b9   : > { %v4130_v33 = vadd.f32 %v6905_v59, %v4084_v9  ;;  %v4131_v0 = vadd.f32 %v6905_v59, %v4107_v24  ;;  %v3371_v59 = vadd.f32 %v6818_v60, %v6948_v52 }
 0x6bb   : > { %v4146_v39 = vmax.f32 %v4130_v33, 0.0  ;;  %v4147_v2 = vmax.f32 %v4131_v0, 0.0  ;;  %v6954_v54 = vadd.f32 0.5, %v3371_v59 }
 0x6bd   : > { %v3582_v6 = vand.u32 2147483647, %v6954_v54 }
 0x6be   : > { %v4086_v28 = vpop.f32.mrf.mxu2  ;;  %v4109_v63 = vpop.f32.mrf.mxu3 }
 0x6bf   : > { %v4087_v20 = vadd.f32 %v4086_v28, %v3896_v13  ;;  %v4110_v34 = vadd.f32 %v4109_v63, %v3919_v46  ;;  %v3590_v35 = vsub.f32 0.0, %v3582_v6  ;;  %v3499_v28 = vadd.f32 %v6885_v16, %v6948_v52 }
 0x6c1   : > { %v4138_v30 = vadd.f32 %v6903_v29, %v4087_v20  ;;  %v4139_v5 = vadd.f32 %v6903_v29, %v4110_v34  ;;  %v3339_v29 = vadd.f32 %v6816_v25, %v6948_v52  ;;  %v3599_v13 = vmul.f32 1.442695, %v3590_v35 }
 0x6c2   : > { %v6967_v59 = vadd.f32 0.5, %v3499_v28 }
 0x6c3   : > { %v4154_v15 = vmax.f32 %v4138_v30, 0.0  ;;  %v4155_v32 = vmax.f32 %v4139_v5, 0.0  ;;  %v6956_v3 = vadd.f32 0.5, %v3339_v29 }
 0x6c5   : > { %4301 = vmatpush.msrb.mxu2 %v4154_v15  ;;  %4321 = vmatpush.msrb.mxu3 %v4155_v32  ;;  %v3581_v49 = vand.u32 2147483647, %v6956_v3 }
 0x6c7   : > { %4302 = vmatpush.msrb.mxu2 %v4146_v39  ;;  %4322 = vmatpush.msrb.mxu3 %v4147_v2  ;;  %v3589_v48 = vsub.f32 0.0, %v3581_v49  ;;  %v3467_v49 = vadd.f32 %v6883_v8, %v6948_v52 }
 0x6c8   : > { %5064 = vmatmul.msk.f32.vlgmr.msrb.gmra.mxu2 %vm4163_vm3, %v6918_v21  ;;  %5065 = vmatmul.msk.f32.vlgmr.msrb.gmra.mxu3 %vm4163_vm3, %v6918_v21 }
 0x6c9   : > { %v3597_v17 = vmul.f32 1.442695, %v3589_v48 }
 0x6de   : > { %v4184_v36 = vpop.f32.mrf.mxu0  ;;  %v4204_v21 = vpop.f32.mrf.mxu1 }
 0x6df   : > { %v4185_v1 = vadd.f32 %v4184_v36, %v6959_v23  ;;  %v4205_v60 = vadd.f32 %v4204_v21, %v6959_v23 }
 0x6e1   : > { %v4327_v11 = vsub.f32 0.0, %v4185_v1  ;;  %v4328_v25 = vsub.f32 0.0, %v4205_v60  ;;  %v3574_v60 = vmax.f32 %v6954_v54, 0.0 }
 0x6e3   : > { %v4335_v46 = vmul.f32 1.442695, %v4327_v11  ;;  %v4337_v10 = vmul.f32 1.442695, %v4328_v25  ;;  %v3573_v11 = vmax.f32 %v6956_v3, 0.0 }
 0x6e5   : > { %5123 = vpow2.f32 %v4335_v46 }
 0x6e6   : > { %5125 = vpow2.f32 %v4337_v10  ;;  %v6975_v10 = vadd.f32 0.5, %v3467_v49 }
 0x6e7   : > { %5127 = vpow2.f32 %v3599_v13  ;;  %v3586_v13 = vand.u32 2147483647, %v6967_v59 }
 0x6e8   : > { %5129 = vpow2.f32 %v3597_v17 }
 0x6eb   : > { %v5124_v18 = vpop.eup %5123 }
 0x6ec   : > { %v5126_v57 = vpop.eup %5125  ;;  %v4351_v37 = vadd.f32 1.0, %v5124_v18 }
 0x6ed   : > { %v5128_v38 = vpop.eup %5127  ;;  %v4352_v45 = vadd.f32 1.0, %v5126_v57 }
 0x6ee   : > { %5131 = vrcp.f32 %v4351_v37  ;;  %v5130_v62 = vpop.eup %5129  ;;  %v3622_v42 = vadd.f32 1.0, %v5128_v38  ;;  %v3625_v47 = vmul.f32 -0.5, %v5128_v38  ;;  %v4370_v51 = vand.u32 2147483648, %v4351_v37 }
 0x6ef   : > { %5133 = vrcp.f32 %v4352_v45  ;;  %v3613_v31 = vadd.f32 1.0, %v5130_v62  ;;  %v3616_v55 = vmul.f32 -0.5, %v5130_v62  ;;  %v3619_v40 = vand.u32 2147483647, %v5130_v62 }
 0x6f0   : > { %5135 = vlog2.f32 %v3622_v42  ;;  %v4368_v41 = vand.u32 2147483647, %v4351_v37  ;;  %v4385_v22 = vand.u32 2147483648, %v4352_v45  ;;  %v3626_v14 = vadd.f32 1.0, %v3625_v47 }
 0x6f1   : > { %5137 = vlog2.f32 %v3613_v31  ;;  %v4383_v9 = vand.u32 2147483647, %v4352_v45  ;;  %v3628_v24 = vand.u32 2147483647, %v5128_v38  ;;  %vm4364_vm6 = vweird.f32 %v4351_v37 }
 0x6f2   : > { %v3617_v34 = vadd.f32 1.0, %v3616_v55  ;;  %v4371_v33 = vor.u32 1.1754944e-38, %v4370_v51  ;;  %vm4379_vm8 = vweird.f32 %v4352_v45  ;;  %vm4369_vm9 = vcmp.eq.f32.partialorder %v4368_v41, 8.507059e+37 }
 0x6f3   : > { %v4386_v15 = vor.u32 1.1754944e-38, %v4385_v22  ;;  %v3627_v32 = vmul.f32 %v5128_v38, %v3626_v14  ;;  %vm4384_vm11 = vcmp.eq.f32.partialorder %v4383_v9, 8.507059e+37  ;;  %vm3629_vm12 = vcmp.lt.f32.partialorder %v3628_v24, 0.0004427343 }
 0x6f4   : > { %v5132_v50 = vpop.eup %5131  ;;  %v3618_v21 = vmul.f32 %v5130_v62, %v3617_v34  ;;  %vm3620_vm13 = vcmp.lt.f32.partialorder %v3619_v40, 0.0004427343  ;;  %v3585_v38 = vand.u32 2147483647, %v6975_v10  ;;  %v3435_v51 = vadd.f32 %v6873_v61, %v6948_v52 }
 0x6f5   : > { %v5134_v58 = vpop.eup %5133  ;;  %v4360_v44 = vmul.f32 %v5132_v50, %v4351_v37  ;;  %vm4365_vm4 = vweird.f32 %v5132_v50  ;;  %v3594_v37 = vsub.f32 0.0, %v3586_v13  ;;  %v3403_v41 = vadd.f32 %v6871_v7, %v6948_v52 }
 0x6f6   : > { %v4375_v12 = vmul.f32 %v5134_v58, %v4352_v45  ;;  %v5136_v56 = vpop.eup %5135  ;;  %vm4380_vm5 = vweird.f32 %v5134_v58  ;;  %vm4366_vm7 = vmor %vm4364_vm6, %vm4365_vm4  ;;  %v6994_v22 = vadd.f32 0.5, %v3435_v51 }
 0x6f7   : > { %v4361_v27 = vsub.f32 1.0, %v4360_v44  ;;  %v5138_v20 = vpop.eup %5137  ;;  %v3624_v30 = vmul.f32 0.6931472, %v5136_v56  ;;  %vm4381_vm10 = vmor %vm4379_vm8, %vm4380_vm5  ;;  %v3593_v44 = vsub.f32 0.0, %v3585_v38  ;;  %v7000_v61 = vadd.f32 0.5, %v3403_v41 }
 0x6f8   : > { %v4376_v26 = vsub.f32 1.0, %v4375_v12  ;;  %v3615_v16 = vmul.f32 0.6931472, %v5138_v20 }
 0x6f9   : > { %v4362_v19 = vmul.f32 %v5132_v50, %v4361_v27  ;;  %v3630_v35 = vsel %vm3629_vm12, %v3627_v32, %v3624_v30  ;;  %v3605_v40 = vmul.f32 1.442695, %v3593_v44 }
 0x6fa   : > { %v4377_v53 = vmul.f32 %v5134_v58, %v4376_v26  ;;  %v3621_v25 = vsel %vm3620_vm13, %v3618_v21, %v3615_v16  ;;  %v3686_v46 = vadd.f32 %v3630_v35, %v3574_v60 }
 0x6fb   : > { %v4363_v63 = vadd.f32 %v5132_v50, %v4362_v19  ;;  %v3685_v18 = vadd.f32 %v3621_v25, %v3573_v11 }
 0x6fc   : > { %v4378_v0 = vadd.f32 %v5134_v58, %v4377_v53 }
 0x6fd   : > { %v4367_v5 = vsel %vm4366_vm7, %v5132_v50, %v4363_v63  ;;  %v3584_v63 = vand.u32 2147483647, %v6994_v22 }
 0x6fe   : > { %v4372_v39 = vsel %vm4369_vm9, %v4371_v33, %v4367_v5  ;;  %v4382_v2 = vsel %vm4381_vm10, %v5134_v58, %v4378_v0  ;;  %v3607_v58 = vmul.f32 1.442695, %v3594_v37  ;;  %v3583_v33 = vand.u32 2147483647, %v7000_v61 }
 0x6ff   : > { %v4479_v29 = vmul.f32 1.002, %v4372_v39  ;;  %v4387_v6 = vsel %vm4384_vm11, %v4386_v15, %v4382_v2  ;;  %v3592_v0 = vsub.f32 0.0, %v3584_v63 }
 0x700   : > { %v4480_v36 = vmul.f32 1.002, %v4387_v6  ;;  %5139 = vpow2.f32 %v3607_v58  ;;  %v3591_v49 = vsub.f32 0.0, %v3583_v33 }
 0x701   : > { %v5066_v1 = vadd.f32 -0.001, %v4479_v29 }
 0x702   : > { %v5067_v48 = vadd.f32 -0.001, %v4480_v36  ;;  %v3603_v36 = vmul.f32 1.442695, %v3592_v0 }
 0x703   : > { %v4503_v17 = vrot.slane %v5066_v1, 7 }
 0x704   : > { %v4504_v8 = vrot.slane %v5067_v48, 7 }
 0x705   : > { %v4520_v3 = vsel %vm4519_vm14, %v3685_v18, %v4503_v17 }
 0x706   : > { %v4521_v57 = vsel %vm4519_vm14, %v3686_v46, %v4504_v8  ;;  %v6990_v26 = vpop.eup %5139 }
 0x707   : > { %v4536_v54 = vrot.slane %v4521_v57, 4  ;;  %v3658_v53 = vadd.f32 1.0, %v6990_v26  ;;  %v3661_v28 = vmul.f32 -0.5, %v6990_v26  ;;  %v3664_v2 = vand.u32 2147483647, %v6990_v26 }
 0x709   : > { %v4264_v45 = vpop.f32.mrf.mxu0  ;;  %v4284_v62 = vpop.f32.mrf.mxu1  ;;  %v4541_v42 = vsel %vm4540_vm15, %v4520_v3, %v4536_v54  ;;  %v3662_v34 = vadd.f32 1.0, %v3661_v28  ;;  %vm3665_vm8 = vcmp.lt.f32.partialorder %v3664_v2, 0.0004427343 }
 0x70a   : > { %v4265_v31 = vadd.f32 %v4264_v45, %v6959_v23  ;;  %v4285_v50 = vadd.f32 %v4284_v62, %v6959_v23  ;;  %4549 = vst [vmem:[%s6985_s17] sm:$0xff] %v4541_v42 }
 0x70b   : > { %v3663_v6 = vmul.f32 %v6990_v26, %v3662_v34 }
 0x70c   : > { %v4331_v47 = vsub.f32 0.0, %v4265_v31  ;;  %v4332_v12 = vsub.f32 0.0, %v4285_v50 }
 0x70e   : > { %v4343_v27 = vmul.f32 1.442695, %v4331_v47  ;;  %v4345_v55 = vmul.f32 1.442695, %v4332_v12  ;;  %v3601_v12 = vmul.f32 1.442695, %v3591_v49 }
 0x710   : > { %5141 = vpow2.f32 %v4343_v27 }
 0x711   : > { %5143 = vpow2.f32 %v4345_v55 }
 0x712   : > { %5145 = vpow2.f32 %v3605_v40 }
 0x716   : > { %v5142_v19 = vpop.eup %5141 }
 0x717   : > { %v5144_v56 = vpop.eup %5143  ;;  %v4355_v14 = vadd.f32 1.0, %v5142_v19 }
 0x718   : > { %v4356_v9 = vadd.f32 1.0, %v5144_v56  ;;  %v6997_v24 = vpop.eup %5145  ;;  %v3578_v56 = vmax.f32 %v6967_v59, 0.0 }
 0x719   : > { %5147 = vrcp.f32 %v4355_v14  ;;  %v3649_v7 = vadd.f32 1.0, %v6997_v24  ;;  %v3652_v20 = vmul.f32 -0.5, %v6997_v24  ;;  %v3655_v15 = vand.u32 2147483647, %v6997_v24 }
 0x71a   : > { %5149 = vrcp.f32 %v4356_v9  ;;  %v4428_v35 = vand.u32 2147483647, %v4355_v14  ;;  %v4430_v1 = vand.u32 2147483648, %v4355_v14  ;;  %v4445_v48 = vand.u32 2147483648, %v4356_v9 }
 0x71b   : > { %5151 = vlog2.f32 %v3658_v53  ;;  %v3653_v39 = vadd.f32 1.0, %v3652_v20  ;;  %v4443_v57 = vand.u32 2147483647, %v4356_v9  ;;  %vm4424_vm2 = vweird.f32 %v4355_v14 }
 0x71c   : > { %5153 = vlog2.f32 %v3649_v7  ;;  %vm4429_vm4 = vcmp.eq.f32.partialorder %v4428_v35, 8.507059e+37  ;;  %v4431_v45 = vor.u32 1.1754944e-38, %v4430_v1  ;;  %vm4439_vm5 = vweird.f32 %v4356_v9 }
 0x71d   : > { %v4446_v31 = vor.u32 1.1754944e-38, %v4445_v48  ;;  %5155 = vpow2.f32 %v3603_v36  ;;  %vm4444_vm7 = vcmp.eq.f32.partialorder %v4443_v57, 8.507059e+37  ;;  %v3654_v41 = vmul.f32 %v6997_v24, %v3653_v39 }
 0x71e   : > { %vm3656_vm9 = vcmp.lt.f32.partialorder %v3655_v15, 0.0004427343  ;;  %v3577_v20 = vmax.f32 %v6975_v10, 0.0 }
 0x71f   : > { %v5148_v30 = vpop.eup %5147 }
 0x720   : > { %v5150_v5 = vpop.eup %5149  ;;  %v4420_v32 = vmul.f32 %v5148_v30, %v4355_v14  ;;  %vm4425_vm0 = vweird.f32 %v5148_v30 }
 0x721   : > { %v4435_v16 = vmul.f32 %v5150_v5, %v4356_v9  ;;  %v5152_v29 = vpop.eup %5151  ;;  %vm4440_vm1 = vweird.f32 %v5150_v5  ;;  %vm4426_vm3 = vmor %vm4424_vm2, %vm4425_vm0 }
 0x722   : > { %v4421_v21 = vsub.f32 1.0, %v4420_v32  ;;  %v3660_v17 = vmul.f32 0.6931472, %v5152_v29  ;;  %v5154_v3 = vpop.eup %5153  ;;  %vm4441_vm6 = vmor %vm4439_vm5, %vm4440_vm1 }
 0x723   : > { %v4436_v60 = vsub.f32 1.0, %v4435_v16  ;;  %v4224_v11 = vpop.f32.mrf.mxu2  ;;  %v4244_v25 = vpop.f32.mrf.mxu3  ;;  %v3651_v40 = vmul.f32 0.6931472, %v5154_v3 }
 0x724   : > { %v4422_v13 = vmul.f32 %v5148_v30, %v4421_v21  ;;  %v4225_v46 = vadd.f32 %v4224_v11, %v6959_v23  ;;  %v4245_v8 = vadd.f32 %v4244_v25, %v6959_v23  ;;  %v3666_v26 = vsel %vm3665_vm8, %v3663_v6, %v3660_v17  ;;  %v7013_v53 = vpop.eup %5155 }
 0x725   : > { %v4437_v18 = vmul.f32 %v5150_v5, %v4436_v60  ;;  %v3657_v9 = vsel %vm3656_vm9, %v3654_v41, %v3651_v40  ;;  %v3690_v28 = vadd.f32 %v3666_v26, %v3578_v56  ;;  %v3640_v32 = vadd.f32 1.0, %v7013_v53 }
 0x726   : > { %v4423_v37 = vadd.f32 %v5148_v30, %v4422_v13  ;;  %v4329_v54 = vsub.f32 0.0, %v4225_v46  ;;  %v4330_v38 = vsub.f32 0.0, %v4245_v8  ;;  %v3689_v24 = vadd.f32 %v3657_v9, %v3577_v20 }
 0x727   : > { %v4438_v62 = vadd.f32 %v5150_v5, %v4437_v18  ;;  %v3643_v36 = vmul.f32 -0.5, %v7013_v53  ;;  %v3576_v41 = vmax.f32 %v6994_v22, 0.0  ;;  %v3575_v9 = vmax.f32 %v7000_v61, 0.0 }
 0x728   : > { %v4427_v42 = vsel %vm4426_vm3, %v5148_v30, %v4423_v37  ;;  %v4339_v50 = vmul.f32 1.442695, %v4329_v54  ;;  %v4341_v58 = vmul.f32 1.442695, %v4330_v38  ;;  %v3646_v37 = vand.u32 2147483647, %v7013_v53 }
 0x729   : > { %v4432_v44 = vsel %vm4429_vm4, %v4431_v45, %v4427_v42  ;;  %v4442_v47 = vsel %vm4441_vm6, %v5150_v5, %v4438_v62  ;;  %v3644_v17 = vadd.f32 1.0, %v3643_v36  ;;  %v3563_v54 = vadd.f32 %v6913_v4, %v6948_v52 }
 0x72a   : > { %v4483_v27 = vmul.f32 1.002, %v4432_v44  ;;  %v4447_v55 = vsel %vm4444_vm7, %v4446_v31, %v4442_v47  ;;  %5157 = vpow2.f32 %v4339_v50  ;;  %v3531_v31 = vadd.f32 %v6911_v43, %v6948_v52 }
 0x72b   : > { %v4484_v51 = vmul.f32 1.002, %v4447_v55  ;;  %5159 = vpow2.f32 %v4341_v58  ;;  %v3645_v44 = vmul.f32 %v7013_v53, %v3644_v17  ;;  %vm3647_vm4 = vcmp.lt.f32.partialorder %v3646_v37, 0.0004427343 }
 0x72c   : > { %v5070_v19 = vadd.f32 -0.001, %v4483_v27  ;;  %5161 = vpow2.f32 %v3601_v12  ;;  %v7029_v27 = vadd.f32 0.5, %v3563_v54  ;;  %v7031_v43 = vadd.f32 0.5, %v3531_v31 }
 0x72d   : > { %v5071_v14 = vadd.f32 -0.001, %v4484_v51 }
 0x72e   : > { %v4507_v34 = vrot.slane %v5070_v19, 7  ;;  %v3588_v53 = vand.u32 2147483647, %v7029_v27  ;;  %v3587_v20 = vand.u32 2147483647, %v7031_v43 }
 0x72f   : > { %v4508_v63 = vrot.slane %v5071_v14, 7 }
 0x730   : > { %v5158_v7 = vpop.eup %5157  ;;  %v4524_v39 = vsel %vm4519_vm14, %v3689_v24, %v4507_v34  ;;  %v3596_v24 = vsub.f32 0.0, %v3588_v53  ;;  %v3595_v61 = vsub.f32 0.0, %v3587_v20  ;;  %v3580_v20 = vmax.f32 %v7029_v27, 0.0 }
 0x731   : > { %v5160_v33 = vpop.eup %5159  ;;  %v4353_v0 = vadd.f32 1.0, %v5158_v7  ;;  %v4525_v30 = vsel %vm4519_vm14, %v3690_v28, %v4508_v63 }
 0x732   : > { %v4354_v5 = vadd.f32 1.0, %v5160_v33  ;;  %v4538_v59 = vrot.slane %v4525_v30, 4  ;;  %v5162_v15 = vpop.eup %5161 }
 0x733   : > { %5163 = vrcp.f32 %v4353_v0  ;;  %v3631_v16 = vadd.f32 1.0, %v5162_v15  ;;  %v3634_v29 = vmul.f32 -0.5, %v5162_v15  ;;  %v3637_v60 = vand.u32 2147483647, %v5162_v15 }
 0x734   : > { %5165 = vrcp.f32 %v4354_v5  ;;  %v4543_v2 = vsel %vm4540_vm15, %v4524_v39, %v4538_v59  ;;  %v4400_v48 = vand.u32 2147483648, %v4353_v0  ;;  %v4398_v46 = vand.u32 2147483647, %v4353_v0 }
 0x735   : > { %4551 = vst [vmem:[%s6985_s17 + $0x10] sm:$0xff] %v4543_v2  ;;  %5167 = vlog2.f32 %v3640_v32  ;;  %v3635_v1 = vadd.f32 1.0, %v3634_v29  ;;  %v4415_v8 = vand.u32 2147483648, %v4354_v5  ;;  %v4413_v57 = vand.u32 2147483647, %v4354_v5 }
 0x736   : > { %5169 = vlog2.f32 %v3631_v16  ;;  %vm4394_vm12 = vweird.f32 %v4353_v0  ;;  %v4401_v62 = vor.u32 1.1754944e-38, %v4400_v48  ;;  %vm4409_vm0 = vweird.f32 %v4354_v5 }
 0x737   : > { %vm4399_vm1 = vcmp.eq.f32.partialorder %v4398_v46, 8.507059e+37  ;;  %v4416_v58 = vor.u32 1.1754944e-38, %v4415_v8  ;;  %vm4414_vm3 = vcmp.eq.f32.partialorder %v4413_v57, 8.507059e+37  ;;  %v3636_v26 = vmul.f32 %v5162_v15, %v3635_v1 }
 0x738   : > { %vm3638_vm5 = vcmp.lt.f32.partialorder %v3637_v60, 0.0004427343  ;;  %v3611_v16 = vmul.f32 1.442695, %v3596_v24 }
 0x739   : > { %v5164_v10 = vpop.eup %5163 }
 0x73a   : > { %v5166_v6 = vpop.eup %5165  ;;  %v4390_v49 = vmul.f32 %v5164_v10, %v4353_v0  ;;  %vm4395_vm10 = vweird.f32 %v5164_v10 }
 0x73b   : > { %v4405_v21 = vmul.f32 %v5166_v6, %v4354_v5  ;;  %v5168_v25 = vpop.eup %5167  ;;  %vm4410_vm11 = vweird.f32 %v5166_v6  ;;  %vm4396_vm13 = vmor %vm4394_vm12, %vm4395_vm10 }
 0x73c   : > { %v4391_v35 = vsub.f32 1.0, %v4390_v49  ;;  %v5170_v3 = vpop.eup %5169  ;;  %v3642_v45 = vmul.f32 0.6931472, %v5168_v25  ;;  %vm4411_vm2 = vmor %vm4409_vm0, %vm4410_vm11 }
 0x73d   : > { %v4406_v11 = vsub.f32 1.0, %v4405_v21  ;;  %v3633_v12 = vmul.f32 0.6931472, %v5170_v3 }
 0x73e   : > { %v4392_v13 = vmul.f32 %v5164_v10, %v4391_v35  ;;  %v3648_v19 = vsel %vm3647_vm4, %v3645_v44, %v3642_v45 }
 0x73f   : > { %v4407_v18 = vmul.f32 %v5166_v6, %v4406_v11  ;;  %v3639_v14 = vsel %vm3638_vm5, %v3636_v26, %v3633_v12  ;;  %v3688_v28 = vadd.f32 %v3648_v19, %v3576_v41 }
 0x740   : > { %v4393_v38 = vadd.f32 %v5164_v10, %v4392_v13  ;;  %v3687_v34 = vadd.f32 %v3639_v14, %v3575_v9 }
 0x741   : > { %v4408_v42 = vadd.f32 %v5166_v6, %v4407_v18 }
 0x742   : > { %v4397_v50 = vsel %vm4396_vm13, %v5164_v10, %v4393_v38 }
 0x743   : > { %v4402_v47 = vsel %vm4399_vm1, %v4401_v62, %v4397_v50  ;;  %v4412_v4 = vsel %vm4411_vm2, %v5166_v6, %v4408_v42  ;;  %v3609_v6 = vmul.f32 1.442695, %v3595_v61 }
 0x744   : > { %v4481_v55 = vmul.f32 1.002, %v4402_v47  ;;  %v4417_v40 = vsel %vm4414_vm3, %v4416_v58, %v4412_v4 }
 0x745   : > { %v4482_v51 = vmul.f32 1.002, %v4417_v40 }
 0x746   : > { %v5068_v52 = vadd.f32 -0.001, %v4481_v55 }
 0x747   : > { %v5069_v56 = vadd.f32 -0.001, %v4482_v51 }
 0x748   : > { %v4505_v7 = vrot.slane %v5068_v52, 7 }
 0x749   : > { %v4506_v63 = vrot.slane %v5069_v56, 7 }
 0x74a   : > { %v4522_v15 = vsel %vm4519_vm14, %v3687_v34, %v4505_v7 }
 0x74b   : > { %v4304_v33 = vpop.f32.mrf.mxu2  ;;  %v4324_v0 = vpop.f32.mrf.mxu3  ;;  %v4523_v30 = vsel %vm4519_vm14, %v3688_v28, %v4506_v63 }
 0x74c   : > { %v4305_v22 = vadd.f32 %v4304_v33, %v6959_v23  ;;  %v4325_v5 = vadd.f32 %v4324_v0, %v6959_v23  ;;  %v4537_v59 = vrot.slane %v4523_v30, 4  ;;  %v3579_v0 = vmax.f32 %v7031_v43, 0.0 }
 0x74e   : > { %v4333_v32 = vsub.f32 0.0, %v4305_v22  ;;  %v4334_v39 = vsub.f32 0.0, %v4325_v5  ;;  %v4542_v2 = vsel %vm4540_vm15, %v4522_v15, %v4537_v59 }
 0x74f   : > { %4550 = vst [vmem:[%s6985_s17 + $0x8] sm:$0xff] %v4542_v2 }
 0x750   : > { %v4347_v10 = vmul.f32 1.442695, %v4333_v32  ;;  %v4349_v29 = vmul.f32 1.442695, %v4334_v39 }
 0x752   : > { %5171 = vpow2.f32 %v4347_v10 }
 0x753   : > { %5173 = vpow2.f32 %v4349_v29 }
 0x754   : > { %5175 = vpow2.f32 %v3611_v16 }
 0x755   : > { %5177 = vpow2.f32 %v3609_v6 }
 0x758   : > { %v5172_v49 = vpop.eup %5171 }
 0x759   : > { %v5174_v36 = vpop.eup %5173  ;;  %v4357_v23 = vadd.f32 1.0, %v5172_v49 }
 0x75a   : > { %v5176_v21 = vpop.eup %5175  ;;  %v4358_v35 = vadd.f32 1.0, %v5174_v36 }
 0x75b   : > { %5179 = vrcp.f32 %v4357_v23  ;;  %v5178_v1 = vpop.eup %5177  ;;  %v3676_v60 = vadd.f32 1.0, %v5176_v21  ;;  %v3679_v8 = vmul.f32 -0.5, %v5176_v21  ;;  %v4460_v57 = vand.u32 2147483648, %v4357_v23 }
 0x75c   : > { %5181 = vrcp.f32 %v4358_v35  ;;  %v3667_v48 = vadd.f32 1.0, %v5178_v1  ;;  %v3670_v18 = vmul.f32 -0.5, %v5178_v1  ;;  %v4458_v38 = vand.u32 2147483647, %v4357_v23 }
 0x75d   : > { %5183 = vlog2.f32 %v3676_v60  ;;  %v4475_v3 = vand.u32 2147483648, %v4358_v35  ;;  %v4473_v42 = vand.u32 2147483647, %v4358_v35  ;;  %v3680_v31 = vadd.f32 1.0, %v3679_v8 }
 0x75e   : > { %5185 = vlog2.f32 %v3667_v48  ;;  %v3682_v50 = vand.u32 2147483647, %v5176_v21  ;;  %vm4454_vm8 = vweird.f32 %v4357_v23  ;;  %v3671_v47 = vadd.f32 1.0, %v3670_v18 }
 0x75f   : > { %v4461_v4 = vor.u32 1.1754944e-38, %v4460_v57  ;;  %vm4469_vm10 = vweird.f32 %v4358_v35  ;;  %vm4459_vm11 = vcmp.eq.f32.partialorder %v4458_v38, 8.507059e+37  ;;  %v4476_v51 = vor.u32 1.1754944e-38, %v4475_v3 }
 0x760   : > { %v3673_v26 = vand.u32 2147483647, %v5178_v1  ;;  %vm4474_vm13 = vcmp.eq.f32.partialorder %v4473_v42, 8.507059e+37  ;;  %v3681_v56 = vmul.f32 %v5176_v21, %v3680_v31  ;;  %vm3683_vm0 = vcmp.lt.f32.partialorder %v3682_v50, 0.0004427343 }
 0x761   : > { %v5180_v11 = vpop.eup %5179  ;;  %v3672_v28 = vmul.f32 %v5178_v1, %v3671_v47 }
 0x762   : > { %v5182_v25 = vpop.eup %5181  ;;  %v4450_v13 = vmul.f32 %v5180_v11, %v4357_v23  ;;  %vm4455_vm6 = vweird.f32 %v5180_v11  ;;  %vm3674_vm1 = vcmp.lt.f32.partialorder %v3673_v26, 0.0004427343 }
 0x763   : > { %v4465_v46 = vmul.f32 %v5182_v25, %v4358_v35  ;;  %v5184_v45 = vpop.eup %5183  ;;  %vm4470_vm7 = vweird.f32 %v5182_v25  ;;  %vm4456_vm9 = vmor %vm4454_vm8, %vm4455_vm6 }
 0x764   : > { %v4451_v17 = vsub.f32 1.0, %v4450_v13  ;;  %v5186_v44 = vpop.eup %5185  ;;  %v3678_v55 = vmul.f32 0.6931472, %v5184_v45  ;;  %vm4471_vm12 = vmor %vm4469_vm10, %vm4470_vm7 }
 0x765   : > { %v4466_v37 = vsub.f32 1.0, %v4465_v46  ;;  %v3669_v41 = vmul.f32 0.6931472, %v5186_v44 }
 0x766   : > { %v4452_v54 = vmul.f32 %v5180_v11, %v4451_v17  ;;  %v3684_v63 = vsel %vm3683_vm0, %v3681_v56, %v3678_v55 }
 0x767   : > { %v4467_v62 = vmul.f32 %v5182_v25, %v4466_v37  ;;  %v3675_v33 = vsel %vm3674_vm1, %v3672_v28, %v3669_v41  ;;  %v3692_v30 = vadd.f32 %v3684_v63, %v3580_v20 }
 0x768   : > { %v4453_v58 = vadd.f32 %v5180_v11, %v4452_v54  ;;  %v3691_v5 = vadd.f32 %v3675_v33, %v3579_v0 }
 0x769   : > { %v4468_v12 = vadd.f32 %v5182_v25, %v4467_v62 }
 0x76a   : > { %v4457_v40 = vsel %vm4456_vm9, %v5180_v11, %v4453_v58 }
 0x76b   : > { %v4462_v19 = vsel %vm4459_vm11, %v4461_v4, %v4457_v40  ;;  %v4472_v52 = vsel %vm4471_vm12, %v5182_v25, %v4468_v12 }
 0x76c   : > { %v4485_v14 = vmul.f32 1.002, %v4462_v19  ;;  %v4477_v53 = vsel %vm4474_vm13, %v4476_v51, %v4472_v52 }
 0x76d   : > { %v4486_v9 = vmul.f32 1.002, %v4477_v53 }
 0x76e   : > { %v5072_v7 = vadd.f32 -0.001, %v4485_v14 }
 0x76f   : > { %v5073_v34 = vadd.f32 -0.001, %v4486_v9 }
 0x770   : > { %v4509_v22 = vrot.slane %v5072_v7, 7 }
 0x771   : > { %v4510_v24 = vrot.slane %v5073_v34, 7 }
 0x772   : > { %v4526_v15 = vsel %vm4519_vm14, %v3691_v5, %v4509_v22 }
 0x773   : > { %v4527_v59 = vsel %vm4519_vm14, %v3692_v30, %v4510_v24 }
 0x774   : > { %v4539_v27 = vrot.slane %v4527_v59, 4 }
 0x776   : > { %v4544_v61 = vsel %vm4540_vm15, %v4526_v15, %v4539_v27 }
 0x777   : > { %4552 = vst [vmem:[%s6985_s17 + $0x18] sm:$0xff] %v4544_v61 }
 0x778   : > { %5214 = shalt.err (!%p5211_p3)
}
 0x779   : > { %5080 = dma.vmem_to_hbm [thread:$0]  (%p5360_p5), %s4568_s29, 512, %s4570_s2, %s4554_s22  }
 0x77a PF: > { %p5086_p4 = scmp.ge.s32.totalorder %s5249_s28, 2  ;;  %s4581_s15 = sand.u32 1, %s5237_s25  }
 0x77b   : > { %s4582_s17 = scalar_lea.sflag [#allocation3], %s4581_s15 }
 0x77c   : > { %p5083_p7 = pnand %p5086_p4, %p5364_p6 }
 0x77e   : > { %p5084_p8 = pneg %p5083_p7 }
 0x780   : > { %5232 = dma.done.wait (%p5084_p8), %s4582_s17, 512  }
 0x781   : > { %5234 = vsyncadd (%p5084_p8), %s4582_s17, 4294966784  ;;  %s7107_s23 = sld [smem:[#allocation5_spill]]  ;;  %p23_p9 = scmp.ge.s32.totalorder %s5347_s14, 4  }
 0x782   : > { %s7108_s25 = smov %s5241_s26  ;;  %s7109_s26 = smov %s5245_s27 }
 0x783   : > { %s7111_s28 = smov %s5347_s14  ;;  %25 = sbr.rel (!%p23_p9) target bundleno = 6 (0x6), region = 125 }
 0x787   : > { %s7110_s27 = smov %s7107_s23 }
 0x788   :  { %4588 = vsyncpa [#allocation3], 1 }
 0x789   :  { %4590 = vsyncpa [#allocation3 + $0x1], 1 }

</bundles_post_ra>
